<compile_context>
chip_gen: v5e
topology: v5e:2x2
jax: 0.10.0
libtpu: 0.0.40
codegen_flags: <defaults>
</compile_context>

<pallas_src>
import functools

import jax
import jax.numpy as jnp
from jax.experimental import pallas as pl
from jax.experimental.pallas import tpu as pltpu

TAU = 2.0
V_TH = 1.0
EXPANSION = 4


def _sew(out, identity, cnf):
    # NOTE: SEW 'AND'/'OR' assume a binary identity; here identity is the raw
    # float input, which matches the PyTorch module when downsample is None.
    if cnf == "ADD":
        return out + identity
    elif cnf == "AND":
        return out * identity
    elif cnf == "OR":
        return out + identity - out * identity
    else:
        raise NotImplementedError(cnf)


def _bottleneck_kernel(x_ref, w1_ref, s1_ref, b1_ref,
                       w2_ref, s2_ref, b2_ref,
                       w3_ref, s3_ref, b3_ref,
                       o_ref, pad_ref, *, cnf):
    # x_ref  : (Nb, H, W, Cin)  f32 block of Nb images
    # w*_ref : bf16 weights; w2 is pre-flattened to (9*width, width)
    # s*/b*  : f32 BN-folded scale/bias with 1/tau folded in, shape (1, C)
    # o_ref  : (Nb, H, W, Cout) f32
    # pad_ref: (Nb, H+2, W+2, width) bf16 zero-padded stage-1 spikes (scratch)
    Nb, H, W, Cin = x_ref.shape
    width = w1_ref.shape[1]
    Cout = w3_ref.shape[1]
    M = Nb * H * W

    # Zero only the 1-wide halo; the interior is fully overwritten below.
    # Done every step (not gated on program_id) so the batch axis can be
    # "parallel" (megacore sharding on v7x).
    zrow = jnp.zeros((Nb, 1, W + 2, width), pad_ref.dtype)
    zcol = jnp.zeros((Nb, H + 2, 1, width), pad_ref.dtype)
    pad_ref[:, 0:1, :, :] = zrow
    pad_ref[:, H + 1:H + 2, :, :] = zrow
    pad_ref[:, :, 0:1, :] = zcol
    pad_ref[:, :, W + 1:W + 2, :] = zcol

    # ---- stage 1: 1x1 conv (bf16 MXU) + folded BN + LIF --------------------
    x_bf = x_ref[...].astype(jnp.bfloat16).reshape(M, Cin)
    y1 = jnp.dot(x_bf, w1_ref[...], preferred_element_type=jnp.float32)
    sp1 = (y1 * s1_ref[...] + b1_ref[...] >= V_TH).astype(jnp.bfloat16)
    pad_ref[:, 1:H + 1, 1:W + 1, :] = sp1.reshape(Nb, H, W, width)

    # ---- stage 2: 3x3 conv (pad=1, stride=1) as ONE im2col matmul ----------
    # Per-tap loads come straight from the scratch ref (no full-slab live
    # value); the 9 taps are concatenated on the channel axis to K = 9*width.
    taps = [pad_ref[:, dy:dy + H, dx:dx + W, :]
            for dy in range(3) for dx in range(3)]
    slab = jnp.concatenate(taps, axis=-1).reshape(M, 9 * width)
    y2 = jnp.dot(slab, w2_ref[...], preferred_element_type=jnp.float32)
    sp2 = (y2 * s2_ref[...] + b2_ref[...] >= V_TH).astype(jnp.bfloat16)

    # ---- stage 3: 1x1 conv (bf16 MXU) + folded BN + LIF --------------------
    y3 = jnp.dot(sp2, w3_ref[...], preferred_element_type=jnp.float32)
    sp3 = (y3 * s3_ref[...] + b3_ref[...] >= V_TH).astype(jnp.float32)

    # ---- SEW residual fusion (identity reloaded at the epilogue) -----------
    identity = x_ref[...].astype(jnp.float32).reshape(M, Cout)
    fused = _sew(sp3, identity, cnf)
    o_ref[...] = fused.reshape(Nb, H, W, Cout).astype(o_ref.dtype)


def _full_spec(arr):
    nd = arr.ndim
    return pl.BlockSpec(arr.shape, lambda n, _nd=nd: (0,) * _nd)


def _pick_block_n(N, H, W, Cin, Cout, width, budget_bytes):
    """block_n sized from the real per-step working set (incl. temporaries)."""
    hw = H * W
    io_bytes = 2 * 4 * hw * (Cin + Cout)              # double-buffered f32 I/O blocks
    pad_bytes = 2 * (H + 2) * (W + 2) * width         # bf16 padded-spike scratch
    tmp_bytes = (2 * hw * Cin                          # bf16 stage-1 LHS
                 + 2 * hw * 9 * width                  # bf16 im2col slab
                 + 4 * hw * 2 * width                  # f32 y1 / y2
                 + 2 * hw * width                      # bf16 sp2
                 + 4 * hw * 2 * Cout                   # f32 sp3 / fused
                 + 4 * hw * Cin)                       # f32 identity reload
    per_img = io_bytes + pad_bytes + tmp_bytes
    block_n = max(1, budget_bytes // per_img)
    if N >= 2:
        block_n = min(block_n, N // 2)                 # >=2 grid steps for v7x megacore
    block_n = max(1, min(block_n, N))
    while N % block_n:
        block_n -= 1
    return block_n, per_img


def bottleneck_forward(x, params, cnf="ADD", block_n=None,
                       vmem_budget_bytes=24 * 1024 * 1024):
    (w1, s1, b1, w2, s2, b2, w3, s3, b3) = params
    N, H, W, Cin = x.shape
    width = w1.shape[1]
    Cout = w3.shape[1]
    assert Cin == Cout, "downsample=None requires in_planes == planes * expansion"

    if block_n is None:
        block_n, per_img = _pick_block_n(N, H, W, Cin, Cout, width,
                                         vmem_budget_bytes)
    else:
        _, per_img = _pick_block_n(N, H, W, Cin, Cout, width, vmem_budget_bytes)

    weight_bytes = 2 * 2 * (Cin * width + 9 * width * width + width * Cout)
    need = block_n * per_img + weight_bytes + (2 << 20)
    vmem_limit = int(min(max(need, 16 << 20), 48 << 20))

    kernel = functools.partial(_bottleneck_kernel, cnf=cnf)

    flops = 2 * N * H * W * (Cin * width + 9 * width * width + width * Cout)
    bytes_accessed = (4 * int(x.size) + 4 * N * H * W * Cout
                      + 2 * (int(w1.size) + int(w2.size) + int(w3.size))
                      + 4 * (int(s1.size) + int(b1.size) + int(s2.size)
                             + int(b2.size) + int(s3.size) + int(b3.size)))

    return pl.pallas_call(
        kernel,
        out_shape=jax.ShapeDtypeStruct((N, H, W, Cout), jnp.float32),
        grid=(N // block_n,),
        in_specs=[
            pl.BlockSpec((block_n, H, W, Cin), lambda n: (n, 0, 0, 0)),
            _full_spec(w1), _full_spec(s1), _full_spec(b1),
            _full_spec(w2), _full_spec(s2), _full_spec(b2),
            _full_spec(w3), _full_spec(s3), _full_spec(b3),
        ],
        out_specs=pl.BlockSpec((block_n, H, W, Cout), lambda n: (n, 0, 0, 0)),
        scratch_shapes=[
            pltpu.VMEM((block_n, H + 2, W + 2, width), jnp.bfloat16)],
        compiler_params=pltpu.CompilerParams(
            dimension_semantics=("parallel",),
            vmem_limit_bytes=vmem_limit),
        cost_estimate=pl.CostEstimate(
            flops=flops, transcendentals=0, bytes_accessed=bytes_accessed),
    )(x, w1, s1, b1, w2, s2, b2, w3, s3, b3)


def init_params(key, in_planes, planes, base_width=64, groups=1):
    width = int(planes * (base_width / 64.0)) * groups
    out_planes = planes * EXPANSION
    ks = jax.random.split(key, 15)

    def bn_fold(k0, k1, k2, k3, c):
        gamma = jax.random.uniform(k0, (c,), minval=0.5, maxval=1.5)
        beta = jax.random.normal(k1, (c,)) * 0.2
        mean = jax.random.normal(k2, (c,)) * 0.2
        var = jax.random.uniform(k3, (c,), minval=0.5, maxval=1.5)
        scale = gamma * jax.lax.rsqrt(var + 1e-5)
        bias = beta - mean * scale
        # Fold the LIF 1/tau factor into the BN affine: LIF becomes v >= v_th.
        scale = scale / TAU
        bias = bias / TAU
        return (scale.reshape(1, c).astype(jnp.float32),
                bias.reshape(1, c).astype(jnp.float32))

    # conv1 1x1: torch weight (width, in_planes, 1, 1) -> (in_planes, width), bf16
    w1 = (jax.random.normal(ks[0], (in_planes, width)) /
          jnp.sqrt(in_planes)).astype(jnp.bfloat16)
    s1, b1 = bn_fold(ks[1], ks[2], ks[3], ks[4], width)
    # conv2 3x3: torch (width, width, 3, 3) -> HWIO (3,3,width,width)
    #            -> flattened (9*width, width) for the im2col matmul, bf16
    w2_hwio = (jax.random.normal(ks[5], (3, 3, width, width)) /
               jnp.sqrt(float(width)))
    w2 = w2_hwio.reshape(9 * width, width).astype(jnp.bfloat16)
    s2, b2 = bn_fold(ks[6], ks[7], ks[8], ks[9], width)
    # conv3 1x1: torch weight (out_planes, width, 1, 1) -> (width, out_planes), bf16
    w3 = (jax.random.normal(ks[10], (width, out_planes)) /
          jnp.sqrt(float(width))).astype(jnp.bfloat16)
    s3, b3 = bn_fold(ks[11], ks[12], ks[13], ks[14], out_planes)
    return (w1, s1, b1, w2, s2, b2, w3, s3, b3)


def bottleneck_reference(x, params, cnf="ADD"):
    # Pure-JAX reference (NHWC).  Mirrors the kernel's bf16 MXU operands with
    # f32 accumulation so LIF thresholds agree (spike values are bf16-exact).
    (w1, s1, b1, w2f, s2, b2, w3, s3, b3) = params
    width = w1.shape[1]
    lif = lambda v: (v >= V_TH).astype(jnp.float32)
    xb = x.astype(jnp.bfloat16)
    y1 = jnp.einsum("nhwc,cd->nhwd", xb, w1,
                    preferred_element_type=jnp.float32)
    o1 = lif(y1 * s1[0] + b1[0]).astype(jnp.bfloat16)
    w2 = w2f.reshape(3, 3, width, width)
    y2 = jax.lax.conv_general_dilated(
        o1, w2, window_strides=(1, 1), padding=((1, 1), (1, 1)),
        dimension_numbers=("NHWC", "HWIO", "NHWC"),
        preferred_element_type=jnp.float32)
    o2 = lif(y2 * s2[0] + b2[0]).astype(jnp.bfloat16)
    y3 = jnp.einsum("nhwc,cd->nhwd", o2, w3,
                    preferred_element_type=jnp.float32)
    o3 = lif(y3 * s3[0] + b3[0])
    return _sew(o3, x.astype(jnp.float32), cnf)


if __name__ == "__main__":
    key = jax.random.PRNGKey(0)
    kx, kp = jax.random.split(key)

    # in_planes == planes * expansion so the residual SEW fusion is valid with
    # downsample=None (the module's default path).  Cout=128 keeps the output
    # store lane-dense.
    in_planes, planes = 128, 32
    N, H, W = 4, 8, 8
    cnf = "ADD"

    x = jax.random.normal(kx, (N, H, W, in_planes), dtype=jnp.float32) * 2.0
    params = init_params(kp, in_planes, planes)

    out = bottleneck_forward(x, params, cnf=cnf)
    out = jax.block_until_ready(out)

    ref = bottleneck_reference(x, params, cnf=cnf)
    assert out.shape == (N, H, W, planes * EXPANSION)
    if not bool(jnp.allclose(out, ref, atol=1e-3, rtol=0.0)):
        n_bad = int(jnp.sum(jnp.abs(out - ref) > 1e-3))
        raise AssertionError(
            f"Pallas kernel does not match JAX reference ({n_bad} mismatches)")

    print("KERNEL_OK")
</pallas_src>

<mosaic_0001>
module attributes {stable_mosaic.version = 11 : i64} {
  func.func @_bottleneck_kernel(%arg0: i32, %arg1: memref<2x8x8x128xf32, #tpu.memory_space<vmem>>, %arg2: memref<128x32xbf16, #tpu.memory_space<vmem>>, %arg3: memref<1x32xf32, #tpu.memory_space<vmem>>, %arg4: memref<1x32xf32, #tpu.memory_space<vmem>>, %arg5: memref<288x32xbf16, #tpu.memory_space<vmem>>, %arg6: memref<1x32xf32, #tpu.memory_space<vmem>>, %arg7: memref<1x32xf32, #tpu.memory_space<vmem>>, %arg8: memref<32x128xbf16, #tpu.memory_space<vmem>>, %arg9: memref<1x128xf32, #tpu.memory_space<vmem>>, %arg10: memref<1x128xf32, #tpu.memory_space<vmem>>, %arg11: memref<2x8x8x128xf32, #tpu.memory_space<vmem>>, %arg12: memref<2x10x10x32xbf16, #tpu.memory_space<vmem>>) attributes {dimension_semantics = [#tpu.dimension_semantics<parallel>], iteration_bounds = array<i64: 2>, scalar_prefetch = 0 : i64, scratch_operands = 1 : i64, tpu.core_type = #tpu.core_type<tc>, window_params = [{transform_indices = @transform_0, window_bounds = array<i64: 2, 8, 8, 128>}, {pipeline_mode = #tpu.pipeline_mode<synchronous>, transform_indices = @transform_1, window_bounds = array<i64: 128, 32>}, {pipeline_mode = #tpu.pipeline_mode<synchronous>, transform_indices = @transform_2, window_bounds = array<i64: 1, 32>}, {pipeline_mode = #tpu.pipeline_mode<synchronous>, transform_indices = @transform_3, window_bounds = array<i64: 1, 32>}, {pipeline_mode = #tpu.pipeline_mode<synchronous>, transform_indices = @transform_4, window_bounds = array<i64: 288, 32>}, {pipeline_mode = #tpu.pipeline_mode<synchronous>, transform_indices = @transform_5, window_bounds = array<i64: 1, 32>}, {pipeline_mode = #tpu.pipeline_mode<synchronous>, transform_indices = @transform_6, window_bounds = array<i64: 1, 32>}, {pipeline_mode = #tpu.pipeline_mode<synchronous>, transform_indices = @transform_7, window_bounds = array<i64: 32, 128>}, {pipeline_mode = #tpu.pipeline_mode<synchronous>, transform_indices = @transform_8, window_bounds = array<i64: 1, 128>}, {pipeline_mode = #tpu.pipeline_mode<synchronous>, transform_indices = @transform_9, window_bounds = array<i64: 1, 128>}, {transform_indices = @transform_10, window_bounds = array<i64: 2, 8, 8, 128>}]} {
    %cst = arith.constant 0.000000e+00 : bf16
    %0 = vector.broadcast %cst : bf16 to vector<2x1x10x32xbf16>
    %cst_0 = arith.constant 0.000000e+00 : bf16
    %1 = vector.broadcast %cst_0 : bf16 to vector<2x10x1x32xbf16>
    %c0 = arith.constant 0 : index
    %c0_1 = arith.constant 0 : index
    %c0_2 = arith.constant 0 : index
    %c0_3 = arith.constant 0 : index
    %2 = vector.load %arg12[%c0, %c0_1, %c0_2, %c0_3] : memref<2x10x10x32xbf16, #tpu.memory_space<vmem>>, vector<2x1x10x32xbf16>
    tpu.vector_store %arg12[%c0, %c0_1, %c0_2, %c0_3], %0 {strides = array<i32>} : memref<2x10x10x32xbf16, #tpu.memory_space<vmem>>, vector<2x1x10x32xbf16>,
    %c0_4 = arith.constant 0 : index
    %c9 = arith.constant 9 : index
    %c0_5 = arith.constant 0 : index
    %c0_6 = arith.constant 0 : index
    %3 = vector.load %arg12[%c0_4, %c9, %c0_5, %c0_6] : memref<2x10x10x32xbf16, #tpu.memory_space<vmem>>, vector<2x1x10x32xbf16>
    tpu.vector_store %arg12[%c0_4, %c9, %c0_5, %c0_6], %0 {strides = array<i32>} : memref<2x10x10x32xbf16, #tpu.memory_space<vmem>>, vector<2x1x10x32xbf16>,
    %c0_7 = arith.constant 0 : index
    %c0_8 = arith.constant 0 : index
    %c0_9 = arith.constant 0 : index
    %c0_10 = arith.constant 0 : index
    %4 = vector.load %arg12[%c0_7, %c0_8, %c0_9, %c0_10] : memref<2x10x10x32xbf16, #tpu.memory_space<vmem>>, vector<2x10x1x32xbf16>
    tpu.vector_store %arg12[%c0_7, %c0_8, %c0_9, %c0_10], %1 {strides = array<i32>} : memref<2x10x10x32xbf16, #tpu.memory_space<vmem>>, vector<2x10x1x32xbf16>,
    %c0_11 = arith.constant 0 : index
    %c0_12 = arith.constant 0 : index
    %c9_13 = arith.constant 9 : index
    %c0_14 = arith.constant 0 : index
    %5 = vector.load %arg12[%c0_11, %c0_12, %c9_13, %c0_14] : memref<2x10x10x32xbf16, #tpu.memory_space<vmem>>, vector<2x10x1x32xbf16>
    tpu.vector_store %arg12[%c0_11, %c0_12, %c9_13, %c0_14], %1 {strides = array<i32>} : memref<2x10x10x32xbf16, #tpu.memory_space<vmem>>, vector<2x10x1x32xbf16>,
    %c0_15 = arith.constant 0 : index
    %c0_16 = arith.constant 0 : index
    %c0_17 = arith.constant 0 : index
    %c0_18 = arith.constant 0 : index
    %6 = vector.load %arg1[%c0_15, %c0_16, %c0_17, %c0_18] : memref<2x8x8x128xf32, #tpu.memory_space<vmem>>, vector<2x8x8x128xf32>
    %7 = arith.truncf %6 : vector<2x8x8x128xf32> to vector<2x8x8x128xbf16>
    %8 = vector.shape_cast %7 : vector<2x8x8x128xbf16> to vector<128x128xbf16>
    %c0_19 = arith.constant 0 : index
    %c0_20 = arith.constant 0 : index
    %9 = vector.load %arg2[%c0_19, %c0_20] : memref<128x32xbf16, #tpu.memory_space<vmem>>, vector<128x32xbf16>
    %cst_21 = arith.constant dense<0.000000e+00> : vector<128x32xf32>
    %10 = tpu.matmul %8, %9, %cst_21 {dimension_numbers = #tpu.dot_dimension_numbers<[1], [0], [0], [1], [0, 0, 1, 1], [], []>} : vector<128x128xbf16>, vector<128x32xbf16>, vector<128x32xf32> -> vector<128x32xf32>
    %c0_22 = arith.constant 0 : index
    %c0_23 = arith.constant 0 : index
    %11 = vector.load %arg3[%c0_22, %c0_23] : memref<1x32xf32, #tpu.memory_space<vmem>>, vector<1x32xf32>
    %12 = vector.broadcast %11 : vector<1x32xf32> to vector<128x32xf32>
    %13 = arith.mulf %10, %12 : vector<128x32xf32>
    %c0_24 = arith.constant 0 : index
    %c0_25 = arith.constant 0 : index
    %14 = vector.load %arg4[%c0_24, %c0_25] : memref<1x32xf32, #tpu.memory_space<vmem>>, vector<1x32xf32>
    %15 = vector.broadcast %14 : vector<1x32xf32> to vector<128x32xf32>
    %16 = arith.addf %13, %15 : vector<128x32xf32>
    %cst_26 = arith.constant 1.000000e+00 : f32
    %17 = vector.broadcast %cst_26 : f32 to vector<128x32xf32>
    %18 = arith.cmpf oge, %16, %17 : vector<128x32xf32>
    %19 = arith.extui %18 : vector<128x32xi1> to vector<128x32xi32>
    %20 = arith.sitofp %19 : vector<128x32xi32> to vector<128x32xf32>
    %21 = arith.truncf %20 : vector<128x32xf32> to vector<128x32xbf16>
    %22 = vector.shape_cast %21 : vector<128x32xbf16> to vector<2x8x8x32xbf16>
    %c0_27 = arith.constant 0 : index
    %c1 = arith.constant 1 : index
    %c1_28 = arith.constant 1 : index
    %c0_29 = arith.constant 0 : index
    %23 = vector.load %arg12[%c0_27, %c1, %c1_28, %c0_29] : memref<2x10x10x32xbf16, #tpu.memory_space<vmem>>, vector<2x8x8x32xbf16>
    tpu.vector_store %arg12[%c0_27, %c1, %c1_28, %c0_29], %22 {strides = array<i32>} : memref<2x10x10x32xbf16, #tpu.memory_space<vmem>>, vector<2x8x8x32xbf16>,
    %c0_30 = arith.constant 0 : index
    %c0_31 = arith.constant 0 : index
    %c0_32 = arith.constant 0 : index
    %c0_33 = arith.constant 0 : index
    %24 = vector.load %arg12[%c0_30, %c0_31, %c0_32, %c0_33] : memref<2x10x10x32xbf16, #tpu.memory_space<vmem>>, vector<2x8x8x32xbf16>
    %c0_34 = arith.constant 0 : index
    %c0_35 = arith.constant 0 : index
    %c1_36 = arith.constant 1 : index
    %c0_37 = arith.constant 0 : index
    %25 = vector.load %arg12[%c0_34, %c0_35, %c1_36, %c0_37] : memref<2x10x10x32xbf16, #tpu.memory_space<vmem>>, vector<2x8x8x32xbf16>
    %c0_38 = arith.constant 0 : index
    %c0_39 = arith.constant 0 : index
    %c2 = arith.constant 2 : index
    %c0_40 = arith.constant 0 : index
    %26 = vector.load %arg12[%c0_38, %c0_39, %c2, %c0_40] : memref<2x10x10x32xbf16, #tpu.memory_space<vmem>>, vector<2x8x8x32xbf16>
    %c0_41 = arith.constant 0 : index
    %c1_42 = arith.constant 1 : index
    %c0_43 = arith.constant 0 : index
    %c0_44 = arith.constant 0 : index
    %27 = vector.load %arg12[%c0_41, %c1_42, %c0_43, %c0_44] : memref<2x10x10x32xbf16, #tpu.memory_space<vmem>>, vector<2x8x8x32xbf16>
    %c0_45 = arith.constant 0 : index
    %c1_46 = arith.constant 1 : index
    %c1_47 = arith.constant 1 : index
    %c0_48 = arith.constant 0 : index
    %28 = vector.load %arg12[%c0_45, %c1_46, %c1_47, %c0_48] : memref<2x10x10x32xbf16, #tpu.memory_space<vmem>>, vector<2x8x8x32xbf16>
    %c0_49 = arith.constant 0 : index
    %c1_50 = arith.constant 1 : index
    %c2_51 = arith.constant 2 : index
    %c0_52 = arith.constant 0 : index
    %29 = vector.load %arg12[%c0_49, %c1_50, %c2_51, %c0_52] : memref<2x10x10x32xbf16, #tpu.memory_space<vmem>>, vector<2x8x8x32xbf16>
    %c0_53 = arith.constant 0 : index
    %c2_54 = arith.constant 2 : index
    %c0_55 = arith.constant 0 : index
    %c0_56 = arith.constant 0 : index
    %30 = vector.load %arg12[%c0_53, %c2_54, %c0_55, %c0_56] : memref<2x10x10x32xbf16, #tpu.memory_space<vmem>>, vector<2x8x8x32xbf16>
    %c0_57 = arith.constant 0 : index
    %c2_58 = arith.constant 2 : index
    %c1_59 = arith.constant 1 : index
    %c0_60 = arith.constant 0 : index
    %31 = vector.load %arg12[%c0_57, %c2_58, %c1_59, %c0_60] : memref<2x10x10x32xbf16, #tpu.memory_space<vmem>>, vector<2x8x8x32xbf16>
    %c0_61 = arith.constant 0 : index
    %c2_62 = arith.constant 2 : index
    %c2_63 = arith.constant 2 : index
    %c0_64 = arith.constant 0 : index
    %32 = vector.load %arg12[%c0_61, %c2_62, %c2_63, %c0_64] : memref<2x10x10x32xbf16, #tpu.memory_space<vmem>>, vector<2x8x8x32xbf16>
    %33 = tpu.concatenate %24, %25, %26, %27, %28, %29, %30, %31, %32 in 3 : vector<2x8x8x32xbf16>, vector<2x8x8x32xbf16>, vector<2x8x8x32xbf16>, vector<2x8x8x32xbf16>, vector<2x8x8x32xbf16>, vector<2x8x8x32xbf16>, vector<2x8x8x32xbf16>, vector<2x8x8x32xbf16>, vector<2x8x8x32xbf16> -> vector<2x8x8x288xbf16>
    %34 = vector.shape_cast %33 : vector<2x8x8x288xbf16> to vector<128x288xbf16>
    %c0_65 = arith.constant 0 : index
    %c0_66 = arith.constant 0 : index
    %35 = vector.load %arg5[%c0_65, %c0_66] : memref<288x32xbf16, #tpu.memory_space<vmem>>, vector<288x32xbf16>
    %cst_67 = arith.constant dense<0.000000e+00> : vector<128x32xf32>
    %36 = tpu.matmul %34, %35, %cst_67 {dimension_numbers = #tpu.dot_dimension_numbers<[1], [0], [0], [1], [0, 0, 1, 1], [], []>} : vector<128x288xbf16>, vector<288x32xbf16>, vector<128x32xf32> -> vector<128x32xf32>
    %c0_68 = arith.constant 0 : index
    %c0_69 = arith.constant 0 : index
    %37 = vector.load %arg6[%c0_68, %c0_69] : memref<1x32xf32, #tpu.memory_space<vmem>>, vector<1x32xf32>
    %38 = vector.broadcast %37 : vector<1x32xf32> to vector<128x32xf32>
    %39 = arith.mulf %36, %38 : vector<128x32xf32>
    %c0_70 = arith.constant 0 : index
    %c0_71 = arith.constant 0 : index
    %40 = vector.load %arg7[%c0_70, %c0_71] : memref<1x32xf32, #tpu.memory_space<vmem>>, vector<1x32xf32>
    %41 = vector.broadcast %40 : vector<1x32xf32> to vector<128x32xf32>
    %42 = arith.addf %39, %41 : vector<128x32xf32>
    %cst_72 = arith.constant 1.000000e+00 : f32
    %43 = vector.broadcast %cst_72 : f32 to vector<128x32xf32>
    %44 = arith.cmpf oge, %42, %43 : vector<128x32xf32>
    %45 = arith.extui %44 : vector<128x32xi1> to vector<128x32xi32>
    %46 = arith.sitofp %45 : vector<128x32xi32> to vector<128x32xf32>
    %47 = arith.truncf %46 : vector<128x32xf32> to vector<128x32xbf16>
    %c0_73 = arith.constant 0 : index
    %c0_74 = arith.constant 0 : index
    %48 = vector.load %arg8[%c0_73, %c0_74] : memref<32x128xbf16, #tpu.memory_space<vmem>>, vector<32x128xbf16>
    %cst_75 = arith.constant dense<0.000000e+00> : vector<128x128xf32>
    %49 = tpu.matmul %47, %48, %cst_75 {dimension_numbers = #tpu.dot_dimension_numbers<[1], [0], [0], [1], [0, 0, 1, 1], [], []>} : vector<128x32xbf16>, vector<32x128xbf16>, vector<128x128xf32> -> vector<128x128xf32>
    %c0_76 = arith.constant 0 : index
    %c0_77 = arith.constant 0 : index
    %50 = vector.load %arg9[%c0_76, %c0_77] : memref<1x128xf32, #tpu.memory_space<vmem>>, vector<1x128xf32>
    %51 = vector.broadcast %50 : vector<1x128xf32> to vector<128x128xf32>
    %52 = arith.mulf %49, %51 : vector<128x128xf32>
    %c0_78 = arith.constant 0 : index
    %c0_79 = arith.constant 0 : index
    %53 = vector.load %arg10[%c0_78, %c0_79] : memref<1x128xf32, #tpu.memory_space<vmem>>, vector<1x128xf32>
    %54 = vector.broadcast %53 : vector<1x128xf32> to vector<128x128xf32>
    %55 = arith.addf %52, %54 : vector<128x128xf32>
    %cst_80 = arith.constant 1.000000e+00 : f32
    %56 = vector.broadcast %cst_80 : f32 to vector<128x128xf32>
    %57 = arith.cmpf oge, %55, %56 : vector<128x128xf32>
    %58 = arith.extui %57 : vector<128x128xi1> to vector<128x128xi32>
    %59 = arith.sitofp %58 : vector<128x128xi32> to vector<128x128xf32>
    %c0_81 = arith.constant 0 : index
    %c0_82 = arith.constant 0 : index
    %c0_83 = arith.constant 0 : index
    %c0_84 = arith.constant 0 : index
    %60 = vector.load %arg1[%c0_81, %c0_82, %c0_83, %c0_84] : memref<2x8x8x128xf32, #tpu.memory_space<vmem>>, vector<2x8x8x128xf32>
    %61 = vector.shape_cast %60 : vector<2x8x8x128xf32> to vector<128x128xf32>
    %62 = arith.addf %59, %61 : vector<128x128xf32>
    %63 = vector.shape_cast %62 : vector<128x128xf32> to vector<2x8x8x128xf32>
    %c0_85 = arith.constant 0 : index
    %c0_86 = arith.constant 0 : index
    %c0_87 = arith.constant 0 : index
    %c0_88 = arith.constant 0 : index
    %64 = vector.load %arg11[%c0_85, %c0_86, %c0_87, %c0_88] : memref<2x8x8x128xf32, #tpu.memory_space<vmem>>, vector<2x8x8x128xf32>
    tpu.vector_store %arg11[%c0_85, %c0_86, %c0_87, %c0_88], %63 {strides = array<i32>} : memref<2x8x8x128xf32, #tpu.memory_space<vmem>>, vector<2x8x8x128xf32>,
    return
  }
  func.func @transform_0(%arg0: i32) -> (i32, i32, i32, i32) {
    %c0_i32 = arith.constant 0 : i32
    %c0_i32_0 = arith.constant 0 : i32
    %c0_i32_1 = arith.constant 0 : i32
    %c0_i32_2 = arith.constant 0 : i32
    return %arg0, %c0_i32, %c0_i32_0, %c0_i32_1 : i32, i32, i32, i32
  }
  func.func @transform_1(%arg0: i32) -> (i32, i32) {
    %c0_i32 = arith.constant 0 : i32
    %c0_i32_0 = arith.constant 0 : i32
    %c0_i32_1 = arith.constant 0 : i32
    return %c0_i32, %c0_i32_0 : i32, i32
  }
  func.func @transform_2(%arg0: i32) -> (i32, i32) {
    %c0_i32 = arith.constant 0 : i32
    %c0_i32_0 = arith.constant 0 : i32
    %c0_i32_1 = arith.constant 0 : i32
    return %c0_i32, %c0_i32_0 : i32, i32
  }
  func.func @transform_3(%arg0: i32) -> (i32, i32) {
    %c0_i32 = arith.constant 0 : i32
    %c0_i32_0 = arith.constant 0 : i32
    %c0_i32_1 = arith.constant 0 : i32
    return %c0_i32, %c0_i32_0 : i32, i32
  }
  func.func @transform_4(%arg0: i32) -> (i32, i32) {
    %c0_i32 = arith.constant 0 : i32
    %c0_i32_0 = arith.constant 0 : i32
    %c0_i32_1 = arith.constant 0 : i32
    return %c0_i32, %c0_i32_0 : i32, i32
  }
  func.func @transform_5(%arg0: i32) -> (i32, i32) {
    %c0_i32 = arith.constant 0 : i32
    %c0_i32_0 = arith.constant 0 : i32
    %c0_i32_1 = arith.constant 0 : i32
    return %c0_i32, %c0_i32_0 : i32, i32
  }
  func.func @transform_6(%arg0: i32) -> (i32, i32) {
    %c0_i32 = arith.constant 0 : i32
    %c0_i32_0 = arith.constant 0 : i32
    %c0_i32_1 = arith.constant 0 : i32
    return %c0_i32, %c0_i32_0 : i32, i32
  }
  func.func @transform_7(%arg0: i32) -> (i32, i32) {
    %c0_i32 = arith.constant 0 : i32
    %c0_i32_0 = arith.constant 0 : i32
    %c0_i32_1 = arith.constant 0 : i32
    return %c0_i32, %c0_i32_0 : i32, i32
  }
  func.func @transform_8(%arg0: i32) -> (i32, i32) {
    %c0_i32 = arith.constant 0 : i32
    %c0_i32_0 = arith.constant 0 : i32
    %c0_i32_1 = arith.constant 0 : i32
    return %c0_i32, %c0_i32_0 : i32, i32
  }
  func.func @transform_9(%arg0: i32) -> (i32, i32) {
    %c0_i32 = arith.constant 0 : i32
    %c0_i32_0 = arith.constant 0 : i32
    %c0_i32_1 = arith.constant 0 : i32
    return %c0_i32, %c0_i32_0 : i32, i32
  }
  func.func @transform_10(%arg0: i32) -> (i32, i32, i32, i32) {
    %c0_i32 = arith.constant 0 : i32
    %c0_i32_0 = arith.constant 0 : i32
    %c0_i32_1 = arith.constant 0 : i32
    %c0_i32_2 = arith.constant 0 : i32
    return %arg0, %c0_i32, %c0_i32_0, %c0_i32_1 : i32, i32, i32, i32
  }
}

</mosaic_0001>

<bundles_post_ra>
// kernel: tpu_custom_call.1
= control target key start
LH: loop header
LB: loop body
LE: loop exit
PB: predicated region body
PF: predicated region fallthrough
CT: control target
= control target key end

     0   :  { %15 = vsyncpa [#allocation4], 0  ;;  %s5079_s0 = inlined_call_operand.vmem [shape: f32[4,8,8,128], index: 0, kind: input, shape index: {}]   ;;  %s5080_s1 = inlined_call_operand.vmem [shape: bf16[128,32], index: 1, kind: input, shape index: {}]   ;;  %s5081_s2 = inlined_call_operand.hbm [shape: f32[1,32], index: 2, kind: input, shape index: {}]   ;;  %s5082_s3 = inlined_call_operand.vmem [shape: f32[1,32], index: 3, kind: input, shape index: {}]   ;;  %s5083_s4 = inlined_call_operand.vmem [shape: bf16[288,32], index: 4, kind: input, shape index: {}]   ;;  %s5084_s5 = inlined_call_operand.vmem [shape: f32[1,32], index: 5, kind: input, shape index: {}]   ;;  %s5085_s6 = inlined_call_operand.vmem [shape: f32[1,32], index: 6, kind: input, shape index: {}]   ;;  %s5086_s7 = inlined_call_operand.vmem [shape: bf16[32,128], index: 7, kind: input, shape index: {}]   ;;  %s5087_s8 = inlined_call_operand.vmem [shape: f32[1,128], index: 8, kind: input, shape index: {}]   ;;  %s5088_s9 = inlined_call_operand.vmem [shape: f32[1,128], index: 9, kind: input, shape index: {}]   ;;  %s5089_s10 = inlined_call_operand.hbm [shape: f32[4,8,8,128], index: 10, kind: output, shape index: {}]  }
   0x1   :  { %16 = vsyncpa [#allocation5], 0 }
   0x2   :  { %18 = vsyncpa [#allocation5 + $0x1], 0  ;;  %s3751_s13 = smov 0   ;;  %s3753_s14 = smov 0  }
   0x3   :  { %s3755_s15 = smov 0   ;;  %s3757_s16 = smov 0  }
   0x4 LB: > { %s3772_s17 = sadd.s32 4294967295, %s3686_s16   ;;  %s3283_s18 = sadd.s32 4294967294, %s3686_s16   ;;  %s3686_s16 = sphi %s3757_s16, %s5141_s16   ;;  %s3682_s15 = sphi %s3755_s15, %s5140_s15   ;;  %s3678_s14 = sphi %s3753_s14, %s5139_s14   ;;  %s3674_s13 = sphi %s3751_s13, %s5138_s13  }
   0x5   : > { %s3776_s19 = sadd.s32 1, %s3686_s16   ;;  %s246_s20 = sadd.s32 1, %s3682_s15 }
   0x6   : > { %s243_s21 = ssub.s32 %s3686_s16, %s3776_s19  ;;  %p256_p0 = scmp.ne.s32.totalorder %s3682_s15, %s3678_s14 }
   0x7   : > { %p244_p1 = scmp.eq.s32.totalorder %s243_s21, 0  ;;  %p257_p2 = scmp.eq.s32.totalorder %s3772_s17, 1 }
   0x8   : > { %p262_p3 = scmp.ne.s32.totalorder %s3678_s14, %s3674_s13  ;;  %p263_p4 = scmp.eq.s32.totalorder %s3283_s18, 1 }
   0x9   : > { %s3787_s22 = scalar_select %p244_p1, %s3682_s15, %s246_s20  }
   0xa   : > { %p3789_p5 = por %p257_p2, %p256_p0  ;;  %p3793_p6 = por %p263_p4, %p262_p3 }
   0xb   : > { %p3284_p7 = scmp.ge.s32.totalorder %s3686_s16, 1  ;;  %p270_p8 = scmp.lt.s32.totalorder %s3686_s16, 3 }
   0xc   : > { %p3530_p9 = scmp.eq.s32.totalorder %s3772_s17, 0  ;;  %s285_s27 = sshll.u32 %s5081_s2, 4  ;;  %s286_s27 = int_to_ptr.hbm [resolvable:$true] %s285_s27 }
   0xd   : > { %p271_p10 = pnand %p3284_p7, %p270_p8  ;;  %s3688_s28 = smov [#allocation3]  }
   0xe   : > { %s287_s29 = sshll.u32 %s3688_s28, 4  ;;  %s288_s29 = int_to_ptr.vmem [resolvable:$true] %s287_s29 }
   0xf   : > { %p3522_p11 = pneg %p271_p10  ;;  %331 = sbr.rel (%p271_p10) target bundleno = 877 (0x36d), region = 60 }
  0x11   : > { %p3523_p12 = pnand %p3530_p9, %p3522_p11 }
  0x13   : > { %3525 = dma.hbm_to_vmem [thread:$0]  (!%p3523_p12), %s286_s27, 16, %s288_s29, [#allocation4]  }
  0x14   : > { %3665 = dma.done.wait (%p3530_p9), [#allocation4], 16  }
  0x15   : > { %3667 = vsyncadd (%p3530_p9), [#allocation4], 4294967280  ;;  %v3483_v0 = vld [vmem:[%s5080_s1 + $0x38] sm:$0xff]  ;;  %s3290_s12 = sshll.u32 %s3772_s17, 1  ;;  %v3482_v1 = vld [vmem:[%s5080_s1 + $0x30] sm:$0xff]  ;;  %vm382_vm0 = vcmask 253952  }
  0x16   : > { %660 = vmatpush.bf16.msra.mxu0 %v3483_v0  ;;  %3506 = vmatpush.bf16.msra.mxu1 %v3483_v0  ;;  %p372_p13 = scmp.lt.s32.totalorder %s3290_s12, 3  ;;  %v3481_v2 = vld [vmem:[%s5080_s1 + $0x28] sm:$0xff]  ;;  %v3480_v3 = vld [vmem:[%s5080_s1 + $0x20] sm:$0xff]  ;;  %v3479_v4 = vld [vmem:[%s5080_s1 + $0x18] sm:$0xff]  ;;  %vm392_vm1 = vsmask.f32 256 }
  0x17   : > { %v3478_v5 = vld [vmem:[%s5080_s1 + $0x10] sm:$0xff]  ;;  %v3477_v14 = vld [vmem:[%s5080_s1 + $0x8] sm:$0xff]  ;;  %v3476_v19 = vld [vmem:[%s5080_s1] sm:$0xff]  ;;  %vm454_vm3 = vsmask.f32 7938  ;;  %vm380_vm5 = vcmask 257024  }
  0x18   : > { %s5143_s12 = smov (!%p372_p13, %s3290_s12), 3  ;;  %v397_v51 = vld [vmem:[#allocation2 + $0x8] sm:$0x1]  ;;  %vm3848_vm2 = vmand %vm382_vm0, %vm392_vm1  ;;  %v459_v54 = vld [vmem:[#allocation2 + $0xc] sm:$0x1]  ;;  %s3690_s29 = smov 64  }
  0x19   : > { %s3475_s28 = sshll.u32 %s5143_s12, 6  ;;  %v398_v55 = vsel %vm3848_vm2, 0, %v397_v51  ;;  %vm3856_vm4 = vmand %vm382_vm0, %vm454_vm3  ;;  %s3691_s30 = smov 32  }
  0x1a   : > { %661 = vmatpush.bf16.msra.mxu0 %v3482_v1  ;;  %3507 = vmatpush.bf16.msra.mxu1 %v3482_v1  ;;  %s3822_s20 = scalar_lea.vmem %s5079_s0, %s3475_s28  ;;  %399 = vst [vmem:[#allocation2 + $0x8] sm:$0x1] %v398_v55  ;;  %v460_v57 = vsel %vm3856_vm4, 0, %v459_v54  ;;  %s3692_s21 = smov 96   ;;  %vm3936_vm8 = vmand %vm380_vm5, %vm454_vm3 }
  0x1b   : > { %v516_v6 = vld [vmem:[%s3822_s20] sm:$0xff]  ;;  %v517_v7 = vld [vmem:[%s3822_s20 + $0x8] sm:$0xff]  ;;  %v518_v22 = vld [vmem:[%s3822_s20 + $0x10] sm:$0xff]  ;;  %461 = vst [vmem:[#allocation2 + $0xc] sm:$0x1] %v460_v57  ;;  %s3505_s11 = sshll.u32 %s3772_s17, 7 }
  0x1c   : > { %v528_v8 = vld [vmem:[%s3822_s20 + $0x60] sm:$0xff]  ;;  %v529_v9 = vld [vmem:[%s3822_s20 + $0x68] sm:$0xff]  ;;  %v532_v10 = vpack.c.bf16 %v516_v6, %v516_v6  ;;  %v533_v11 = vpack.c.bf16 %v517_v7, %v517_v7  ;;  %v519_v23 = vld [vmem:[%s3822_s20 + $0x18] sm:$0xff]  ;;  %v534_v26 = vpack.c.bf16 %v518_v22, %v518_v22  ;;  %v3689_v6 = vmov 0   ;;  %s3205_s12 = scalar_lea.hbm %s5089_s10, %s3505_s11 }
  0x1d   : > { %v544_v12 = vpack.c.bf16 %v528_v8, %v528_v8  ;;  %v545_v13 = vpack.c.bf16 %v529_v9, %v529_v9  ;;  %v530_v24 = vld [vmem:[%s3822_s20 + $0x70] sm:$0xff]  ;;  %v531_v25 = vld [vmem:[%s3822_s20 + $0x78] sm:$0xff]  ;;  %v535_v27 = vpack.c.bf16 %v519_v23, %v519_v23  ;;  %v520_v36 = vld [vmem:[%s3822_s20 + $0x20] sm:$0xff]  ;;  %387 = vst.msk [vmem:[#allocation2 + $0x48] sm:$0xf] %vm380_vm5, %v3689_v6 }
  0x1e   : > { %662 = vmatpush.bf16.msra.mxu0 %v3481_v2  ;;  %3508 = vmatpush.bf16.msra.mxu1 %v3481_v2  ;;  %v580_v15 = vunpack.c.l.b16 %v532_v10  ;;  %v581_v16 = vunpack.c.l.b16 %v533_v11  ;;  %v546_v28 = vpack.c.bf16 %v530_v24, %v530_v24  ;;  %v547_v29 = vpack.c.bf16 %v531_v25, %v531_v25  ;;  %v521_v37 = vld [vmem:[%s3822_s20 + $0x28] sm:$0xff]  ;;  %v522_v43 = vld [vmem:[%s3822_s20 + $0x30] sm:$0xff]  ;;  %v523_v44 = vld [vmem:[%s3822_s20 + $0x38] sm:$0xff]  ;;  %388 = vst.msk [vmem:[#allocation2 + $0x4c] sm:$0x1] %vm382_vm0, %v3689_v6 }
  0x1f   : > { %v592_v17 = vunpack.c.l.b16 %v544_v12  ;;  %v593_v18 = vunpack.c.l.b16 %v545_v13  ;;  %v582_v30 = vunpack.c.l.b16 %v534_v26  ;;  %v583_v31 = vunpack.c.l.b16 %v535_v27  ;;  %v524_v50 = vld [vmem:[%s3822_s20 + $0x40] sm:$0xff]  ;;  %v525_v52 = vld [vmem:[%s3822_s20 + $0x48] sm:$0xff]  ;;  %v526_v63 = vld [vmem:[%s3822_s20 + $0x50] sm:$0xff]  ;;  %381 = vst.msk [vmem:[#allocation2] sm:$0xf] %vm380_vm5, %v3689_v6 }
  0x20   : > { %v596_v20 = vpack.c.b16 %v581_v16, %v580_v15  ;;  %v594_v32 = vunpack.c.l.b16 %v546_v28  ;;  %v595_v33 = vunpack.c.l.b16 %v547_v29  ;;  %v536_v38 = vpack.c.bf16 %v520_v36, %v520_v36  ;;  %v527_v0 = vld [vmem:[%s3822_s20 + $0x58] sm:$0xff]  ;;  %383 = vst.msk [vmem:[#allocation2 + $0x4] sm:$0x1] %vm382_vm0, %v3689_v6 }
  0x21   : > { %v602_v21 = vpack.c.b16 %v593_v18, %v592_v17  ;;  %v597_v34 = vpack.c.b16 %v583_v31, %v582_v30  ;;  %v537_v39 = vpack.c.bf16 %v521_v37, %v521_v37  ;;  %v538_v45 = vpack.c.bf16 %v522_v43, %v522_v43  ;;  %384 = vst.msk [vmem:[#allocation2 + $0x50] sm:$0xf] %vm380_vm5, %v3689_v6  ;;  %v439_v16 = vld [vmem:[#allocation2 + $0x78] sm:$0x1]  ;;  %v501_v17 = vld [vmem:[#allocation2 + $0x7c] sm:$0x1] }
  0x22   : > { %663 = vmatpush.bf16.msra.mxu0 %v3480_v3  ;;  %3509 = vmatpush.bf16.msra.mxu1 %v3480_v3  ;;  %v603_v35 = vpack.c.b16 %v595_v33, %v594_v32  ;;  %v584_v40 = vunpack.c.l.b16 %v536_v38  ;;  %v539_v46 = vpack.c.bf16 %v523_v44, %v523_v44  ;;  %v540_v58 = vpack.c.bf16 %v524_v50, %v524_v50  ;;  %v400_v38 = vld [vmem:[#allocation2 + $0x10] sm:$0x1]  ;;  %v442_v43 = vld [vmem:[#allocation2 + $0x80] sm:$0x1]  ;;  %v504_v44 = vld [vmem:[#allocation2 + $0x84] sm:$0x1] }
  0x23   : > { %v585_v41 = vunpack.c.l.b16 %v537_v39  ;;  %v586_v47 = vunpack.c.l.b16 %v538_v45  ;;  %v541_v59 = vpack.c.bf16 %v525_v52, %v525_v52  ;;  %v542_v1 = vpack.c.bf16 %v526_v63, %v526_v63  ;;  %385 = vst.msk [vmem:[#allocation2 + $0x54] sm:$0x1] %vm382_vm0, %v3689_v6  ;;  %v462_v39 = vld [vmem:[#allocation2 + $0x14] sm:$0x1]  ;;  %v465_v63 = vld [vmem:[#allocation2 + $0x1c] sm:$0x1] }
  0x24   : > { %v587_v48 = vunpack.c.l.b16 %v539_v46  ;;  %v588_v60 = vunpack.c.l.b16 %v540_v58  ;;  %v543_v2 = vpack.c.bf16 %v527_v0, %v527_v0  ;;  %389 = vst.msk [vmem:[#allocation2 + $0x98] sm:$0xf] %vm380_vm5, %v3689_v6  ;;  %v421_v7 = vld [vmem:[#allocation2 + $0x48] sm:$0x1]  ;;  %v443_v46 = vsel %vm3848_vm2, 0, %v442_v43 }
  0x25   : > { %v598_v42 = vpack.c.b16 %v585_v41, %v584_v40  ;;  %v589_v61 = vunpack.c.l.b16 %v541_v59  ;;  %v590_v3 = vunpack.c.l.b16 %v542_v1  ;;  %390 = vst.msk [vmem:[#allocation2 + $0x9c] sm:$0x1] %vm382_vm0, %v3689_v6  ;;  %v422_v8 = vsel %vm3848_vm2, 0, %v421_v7  ;;  %v483_v27 = vld [vmem:[#allocation2 + $0x4c] sm:$0x1] }
  0x26   : > { %664 = vmatpush.bf16.msra.mxu0 %v3479_v4  ;;  %3510 = vmatpush.bf16.msra.mxu1 %v3479_v4  ;;  %v599_v49 = vpack.c.b16 %v587_v48, %v586_v47  ;;  %v591_v4 = vunpack.c.l.b16 %v543_v2  ;;  %423 = vst [vmem:[#allocation2 + $0x48] sm:$0x1] %v422_v8  ;;  %v394_v10 = vld [vmem:[#allocation2] sm:$0x1]  ;;  %v1104_v24 = vld [vmem:[#allocation2] sm:$0xe] }
  0x27   : > { %v600_v62 = vpack.c.b16 %v589_v61, %v588_v60  ;;  %v456_v9 = vld [vmem:[#allocation2 + $0x4] sm:$0x1]  ;;  %v395_v12 = vsel %vm3848_vm2, 0, %v394_v10  ;;  %v1457_v28 = vunpack.c.l.b16 %v1104_v24  ;;  %v484_v30 = vsel %vm3856_vm4, 0, %v483_v27  ;;  %444 = vst [vmem:[#allocation2 + $0x80] sm:$0x1] %v443_v46 }
  0x28   : > { %v457_v11 = vsel %vm3856_vm4, 0, %v456_v9  ;;  %396 = vst [vmem:[#allocation2] sm:$0x1] %v395_v12  ;;  %v424_v23 = vld [vmem:[#allocation2 + $0x50] sm:$0x1]  ;;  %v401_v41 = vsel %vm3848_vm2, 0, %v400_v38 }
  0x29   : > { %458 = vst [vmem:[#allocation2 + $0x4] sm:$0x1] %v457_v11  ;;  %v425_v26 = vsel %vm3848_vm2, 0, %v424_v23  ;;  %v505_v47 = vsel %vm3856_vm4, 0, %v504_v44  ;;  %v466_v2 = vsel %vm3856_vm4, 0, %v465_v63  ;;  %vm2209_vm0 = vcmask 261120  }
  0x2a   : > { %665 = vmatpush.bf16.msra.mxu0 %v3478_v5  ;;  %3511 = vmatpush.bf16.msra.mxu1 %v3478_v5  ;;  %v601_v5 = vpack.c.b16 %v591_v4, %v590_v3  ;;  %v486_v29 = vld [vmem:[#allocation2 + $0x54] sm:$0x1]  ;;  %426 = vst [vmem:[#allocation2 + $0x50] sm:$0x1] %v425_v26  ;;  %v445_v3 = vld [vmem:[#allocation2 + $0x88] sm:$0x1] }
  0x2b   : > { %v487_v32 = vsel %vm3856_vm4, 0, %v486_v29  ;;  %485 = vst [vmem:[#allocation2 + $0x4c] sm:$0x1] %v484_v30  ;;  %v3909_v4 = vld [vmem:[#allocation3] ss:$0 sm:$0xff] }
  0x2c   : > { %488 = vst [vmem:[#allocation2 + $0x54] sm:$0x1] %v487_v32  ;;  %v507_v7 = vld [vmem:[#allocation2 + $0x8c] sm:$0x1]  ;;  %v3918_v12 = vld [vmem:[%s5082_s3] ss:$0 sm:$0xff] }
  0x2d   : > { %v1176_v13 = vld [vmem:[#allocation2 + $0x48] sm:$0xf]  ;;  %402 = vst [vmem:[#allocation2 + $0x10] sm:$0x1] %v401_v41  ;;  %v508_v10 = vsel %vm3856_vm4, 0, %v507_v7 }
  0x2e   : > { %666 = vmatpush.bf16.msra.mxu0 %v3477_v14  ;;  %3512 = vmatpush.bf16.msra.mxu1 %v3477_v14  ;;  %v1896_v14 = vunpack.c.l.b16 %v1176_v13  ;;  %506 = vst [vmem:[#allocation2 + $0x84] sm:$0x1] %v505_v47  ;;  %v406_v24 = vld [vmem:[#allocation2 + $0x20] sm:$0x1] }
  0x2f   : > { %v1072_v22 = vld [vmem:[#allocation2] sm:$0xf]  ;;  %467 = vst [vmem:[#allocation2 + $0x1c] sm:$0x1] %v466_v2  ;;  %v407_v27 = vsel %vm3848_vm2, 0, %v406_v24 }
  0x30   : > { %v1912_v15 = vpack.c.b16 %v1896_v14, %v1896_v14  ;;  %v1088_v18 = vld [vmem:[#allocation2 + $0x4] sm:$0x1]  ;;  %v1249_v25 = vunpack.c.l.b16 %v1072_v22  ;;  %509 = vst [vmem:[#allocation2 + $0x8c] sm:$0x1] %v508_v10 }
  0x31   : > { %v1080_v52 = vld [vmem:[#allocation2 + $0x50] sm:$0xf]  ;;  %408 = vst [vmem:[#allocation2 + $0x20] sm:$0x1] %v407_v27 }
  0x32   : > { %667 = vmatpush.bf16.msra.mxu0 %v3476_v19  ;;  %3513 = vmatpush.bf16.msra.mxu1 %v3476_v19  ;;  %v440_v19 = vsel %vm3848_vm2, 0, %v439_v16  ;;  %v3894_v45 = vld [vmem:[#allocation2 + $0x4c] sm:$0x1]  ;;  %v1265_v55 = vunpack.c.l.b16 %v1080_v52  ;;  %v409_v52 = vld [vmem:[#allocation2 + $0x28] sm:$0x1] }
  0x33   : > { %1935 = vrot.lane.b32.xlu0 %v1912_v15, %s3690_s29  ;;  %441 = vst [vmem:[#allocation2 + $0x78] sm:$0x1] %v440_v19  ;;  %v1096_v48 = vld [vmem:[#allocation2 + $0x54] sm:$0x1]  ;;  %v1976_v54 = vunpack.c.l.b16 %v3894_v45 }
  0x34   : > { %v1266_v50 = vunpack.c.l.b16 %v1096_v48 }
  0x35   : > { %668 = vmatmul.bf16.vlgmr.msra.gmra.mxu0 %v596_v20  ;;  %698 = vmatmul.bf16.vlgmr.msra.gmra.mxu1 %v602_v21  ;;  %v502_v20 = vsel %vm3856_vm4, 0, %v501_v17  ;;  %v1250_v21 = vunpack.c.l.b16 %v1088_v18  ;;  %v1992_v60 = vpack.c.b16 %v1976_v54, %v1896_v14 }
  0x36   : > { %503 = vst [vmem:[#allocation2 + $0x7c] sm:$0x1] %v502_v20  ;;  %v1289_v58 = vpack.c.b16 %v1266_v50, %v1265_v55  ;;  %v471_v55 = vld [vmem:[#allocation2 + $0x2c] sm:$0x1] }
  0x37   : > { %v1281_v31 = vpack.c.b16 %v1250_v21, %v1249_v25  ;;  %v1473_v33 = vpack.c.b16 %v1250_v21, %v1457_v28  ;;  %v2051_v8 = vshrl.u32 %v1992_v60, 16  ;;  %v2053_v9 = vshll.u32 %v1992_v60, 16  ;;  %v468_v28 = vld [vmem:[#allocation2 + $0x24] sm:$0x1] }
  0x38   : > { %v1356_v61 = vshll.u32 %v1289_v58, 16  ;;  %v1354_v0 = vshrl.u32 %v1289_v58, 16  ;;  %v5090_v21 = vmov 0.0   ;;  %v472_v2 = vsel %vm3856_vm4, 0, %v471_v55 }
  0x39   : > { %v1298_v36 = vshrl.u32 %v1281_v31, 16  ;;  %v2055_v13 = vrot.slane %v2053_v9, 1  ;;  %v474_v9 = vld [vmem:[#allocation2 + $0x34] sm:$0x1]  ;;  %473 = vst [vmem:[#allocation2 + $0x2c] sm:$0x1] %v472_v2 }
  0x3a   : > { %v1358_v6 = vrot.slane %v1356_v61, 1  ;;  %v1048_v43 = vld [vmem:[#allocation2 + $0x78] sm:$0xf] }
  0x3b   : > { %v2056_v18 = vor.u32 %v2055_v13, %v2051_v8  ;;  %v412_v8 = vld [vmem:[#allocation2 + $0x30] sm:$0x1] }
  0x3c   : > { %v1359_v11 = vor.u32 %v1358_v6, %v1354_v0  ;;  %v413_v10 = vsel %vm3848_vm2, 0, %v412_v8 }
  0x3d   : > { %v1051_v44 = vld [vmem:[#allocation2 + $0x7c] sm:$0x1]  ;;  %414 = vst [vmem:[#allocation2 + $0x30] sm:$0x1] %v413_v10 }
  0x45   : > { %673 = vmatmul.bf16.gmra.mxu0 %v597_v34  ;;  %703 = vmatmul.bf16.gmra.mxu1 %v603_v35  ;;  %v1300_v34 = vshll.u32 %v1281_v31, 16  ;;  %v1489_v35 = vrot.slane %v1473_v33, 1  ;;  %v469_v31 = vsel %vm3856_vm4, 0, %v468_v28 }
  0x46   : > { %470 = vst [vmem:[#allocation2 + $0x24] sm:$0x1] %v469_v31 }
  0x47   : > { %v1302_v37 = vrot.slane %v1300_v34, 1  ;;  %1505 = vrot.lane.b32.xlu2 %v1489_v35, %s3690_s29 }
  0x49   : > { %v1303_v40 = vor.u32 %v1302_v37, %v1298_v36 }
  0x4b   : > { %1409 = vrot.lane.b32.xlu0 %v1303_v40, %s3691_s30  ;;  %v976_v40 = vld [vmem:[#allocation2 + $0x8] sm:$0xf] }
  0x53   : > { %1425 = vrot.lane.b32.xlu0 %v1359_v11, %s3691_s30 }
  0x55   : > { %678 = vmatmul.bf16.gmra.mxu0 %v598_v42  ;;  %v463_v42 = vsel %vm3856_vm4, 0, %v462_v39 }
  0x56   : > { %464 = vst [vmem:[#allocation2 + $0x14] sm:$0x1] %v463_v42  ;;  %v979_v42 = vld [vmem:[#allocation2 + $0xc] sm:$0x1] }
  0x65   : > { %683 = vmatmul.bf16.gmra.mxu0 %v599_v49  ;;  %v1112_v49 = vld [vmem:[#allocation2 + $0x50] sm:$0xe] }
  0x66   : > { %v1465_v51 = vunpack.c.l.b16 %v1112_v49 }
  0x68   : > { %v1481_v57 = vpack.c.b16 %v1266_v50, %v1465_v51 }
  0x6a   : > { %v1497_v59 = vrot.slane %v1481_v57, 1  ;;  %v410_v57 = vsel %vm3848_vm2, 0, %v409_v52 }
  0x6b   : > { %411 = vst [vmem:[#allocation2 + $0x28] sm:$0x1] %v410_v57 }
  0x6c   : > { %1521 = vrot.lane.b32.xlu2 %v1497_v59, %s3690_s29 }
  0x74   : > { %2127 = vrot.lane.b32.xlu2 %v2056_v18, %s3692_s21  ;;  %v1054_v18 = vld [vmem:[#allocation2 + $0x80] sm:$0xf] }
  0x75   : > { %688 = vmatmul.bf16.gmra.mxu0 %v600_v62  ;;  %v403_v62 = vld [vmem:[#allocation2 + $0x18] sm:$0x1] }
  0x76   : > { %v404_v1 = vsel %vm3848_vm2, 0, %v403_v62 }
  0x77   : > { %405 = vst [vmem:[#allocation2 + $0x18] sm:$0x1] %v404_v1 }
  0x85   : > { %693 = vmatmul.bf16.gmra.mxu0 %v601_v5  ;;  %v446_v5 = vsel %vm3848_vm2, 0, %v445_v3 }
  0x86   : > { %447 = vst [vmem:[#allocation2 + $0x88] sm:$0x1] %v446_v5 }
  0x8d   : > { %v1060_v10 = vld [vmem:[#allocation2 + $0x88] sm:$0xf] }
  0xb2   : > { %v669_v14 = vpop.f32.mrf.mxu0  ;;  %v699_v15 = vpop.f32.mrf.mxu1 }
  0xb3   : > { %v713_v16 = vmul.f32 %v3909_v4, %v669_v14  ;;  %v725_v17 = vmul.f32 %v3909_v4, %v699_v15  ;;  %v475_v15 = vsel %vm3856_vm4, 0, %v474_v9  ;;  %v3500_v9 = vld [vmem:[%s5083_s4 + $0x80] sm:$0xff] }
  0xb4   : > { %476 = vst [vmem:[#allocation2 + $0x34] sm:$0x1] %v475_v15 }
  0xb5   : > { %v733_v19 = vadd.f32 %v3918_v12, %v713_v16  ;;  %v745_v20 = vadd.f32 %v3918_v12, %v725_v17  ;;  %v982_v16 = vld [vmem:[#allocation2 + $0x10] sm:$0xf]  ;;  %v985_v17 = vld [vmem:[#allocation2 + $0x14] sm:$0x1] }
  0xb7   : > { %vm749_vm6 = vcmp.ge.f32.partialorder %v733_v19, 1.0  ;;  %vm761_vm7 = vcmp.ge.f32.partialorder %v745_v20, 1.0 }
  0xb8   : > { %v3325_v22 = vsel %vm749_vm6, 1.0, %v5090_v21  ;;  %v3337_v23 = vsel %vm761_vm7, 1.0, %v5090_v21 }
  0xb9   : > { %v797_v25 = vpack.c.bf16 %v3325_v22, %v3325_v22  ;;  %v809_v26 = vpack.c.bf16 %v3337_v23, %v3337_v23  ;;  %v3501_v22 = vld [vmem:[%s5083_s4 + $0x88] sm:$0xff] }
  0xba   : > { %v671_v29 = vpop.f32.mrf.mxu0  ;;  %v701_v30 = vpop.f32.mrf.mxu1  ;;  %2828 = vmatpush.bf16.msrb.mxu0 %v3501_v22  ;;  %3514 = vmatpush.bf16.msra.mxu3 %v3501_v22 }
  0xbb   : > { %v814_v32 = vshrl.u32 %v797_v25, 16  ;;  %v910_v33 = vshrl.u32 %v809_v26, 16  ;;  %v913_v34 = vshll.u32 %v809_v26, 16  ;;  %v714_v35 = vmul.f32 %v3909_v4, %v671_v29  ;;  %v1057_v26 = vld [vmem:[#allocation2 + $0x84] sm:$0x1] }
  0xbc   : > { %v726_v36 = vmul.f32 %v3909_v4, %v701_v30  ;;  %v817_v38 = vshll.u32 %v797_v25, 16 }
  0xbd   : > { %v816_v37 = vrot.slane %v814_v32, 7  ;;  %v912_v41 = vrot.slane %v910_v33, 7  ;;  %v734_v46 = vadd.f32 %v3918_v12, %v714_v35 }
  0xbe   : > { %v746_v47 = vadd.f32 %v3918_v12, %v726_v36  ;;  %2829 = vmatpush.bf16.msrb.mxu0 %v3500_v9  ;;  %3515 = vmatpush.bf16.msra.mxu3 %v3500_v9 }
  0xbf   : > { %v819_v48 = vor.u32 %v817_v38, %v816_v37  ;;  %v820_v49 = vrot.slane %v816_v37, 4  ;;  %v915_v50 = vor.u32 %v913_v34, %v912_v41  ;;  %v916_v51 = vrot.slane %v912_v41, 4 }
  0xc0   : > { %vm750_vm9 = vcmp.ge.f32.partialorder %v734_v46, 1.0  ;;  %vm762_vm10 = vcmp.ge.f32.partialorder %v746_v47, 1.0 }
  0xc1   : > { %v977_v58 = vsel %vm3936_vm8, %v819_v48, %v976_v40  ;;  %v980_v59 = vsel %vm3848_vm2, %v820_v49, %v979_v42  ;;  %v1049_v60 = vsel %vm3936_vm8, %v915_v50, %v1048_v43  ;;  %v1052_v61 = vsel %vm3848_vm2, %v916_v51, %v1051_v44 }
  0xc2   : > { %978 = vst [vmem:[#allocation2 + $0x8] sm:$0xf] %v977_v58  ;;  %v3326_v62 = vsel %vm750_vm9, 1.0, %v5090_v21  ;;  %v3338_v63 = vsel %vm762_vm10, 1.0, %v5090_v21  ;;  %v674_v0 = vpop.f32.mrf.mxu0  ;;  %v704_v1 = vpop.f32.mrf.mxu1 }
  0xc3   : > { %981 = vst [vmem:[#allocation2 + $0xc] sm:$0x1] %v980_v59  ;;  %v798_v3 = vpack.c.bf16 %v3326_v62, %v3326_v62  ;;  %v810_v5 = vpack.c.bf16 %v3338_v63, %v3338_v63  ;;  %v715_v6 = vmul.f32 %v3909_v4, %v674_v0  ;;  %v727_v7 = vmul.f32 %v3909_v4, %v704_v1  ;;  %v988_v0 = vld [vmem:[#allocation2 + $0x18] sm:$0xf] }
  0xc4   : > { %1050 = vst [vmem:[#allocation2 + $0x78] sm:$0xf] %v1049_v60 }
  0xc5   : > { %1053 = vst [vmem:[#allocation2 + $0x7c] sm:$0x1] %v1052_v61  ;;  %v822_v11 = vshrl.u32 %v798_v3, 16  ;;  %v918_v13 = vshrl.u32 %v810_v5, 16  ;;  %v921_v14 = vshll.u32 %v810_v5, 16  ;;  %v735_v19 = vadd.f32 %v3918_v12, %v715_v6 }
  0xc6   : > { %v747_v20 = vadd.f32 %v3918_v12, %v727_v7  ;;  %v825_v24 = vshll.u32 %v798_v3, 16  ;;  %v991_v7 = vld [vmem:[#allocation2 + $0x1c] sm:$0x1] }
  0xc7   : > { %v824_v23 = vrot.slane %v822_v11, 7  ;;  %v920_v25 = vrot.slane %v918_v13, 7  ;;  %vm751_vm11 = vcmp.ge.f32.partialorder %v735_v19, 1.0  ;;  %v1063_v11 = vld [vmem:[#allocation2 + $0x8c] sm:$0x1] }
  0xc8   : > { %vm763_vm12 = vcmp.ge.f32.partialorder %v747_v20, 1.0  ;;  %v3327_v33 = vsel %vm751_vm11, 1.0, %v5090_v21 }
  0xc9   : > { %v827_v27 = vor.u32 %v825_v24, %v824_v23  ;;  %v828_v28 = vrot.slane %v824_v23, 4  ;;  %v923_v29 = vor.u32 %v921_v14, %v920_v25  ;;  %v924_v30 = vrot.slane %v920_v25, 4  ;;  %v1120_v31 = vld [vmem:[#allocation2 + $0x8] sm:$0xf] }
  0xca   : > { %v1073_v32 = vld [vmem:[#allocation2 + $0x8] sm:$0xf]  ;;  %v3339_v34 = vsel %vm763_vm12, 1.0, %v5090_v21  ;;  %v676_v35 = vpop.f32.mrf.mxu0  ;;  %v3969_v36 = vld [vmem:[#allocation2 + $0xc] sm:$0x1]  ;;  %v1553_v37 = vunpack.c.l.b16 %v1120_v31  ;;  %v799_v47 = vpack.c.bf16 %v3327_v33, %v3327_v33 }
  0xcb   : > { %v3971_v38 = vld [vmem:[#allocation2 + $0xc] sm:$0x1]  ;;  %v1251_v40 = vunpack.c.l.b16 %v1073_v32  ;;  %v983_v41 = vsel %vm3936_vm8, %v827_v27, %v982_v16  ;;  %v986_v42 = vsel %vm3848_vm2, %v828_v28, %v985_v17  ;;  %v1055_v43 = vsel %vm3936_vm8, %v923_v29, %v1054_v18  ;;  %v1180_v46 = vld [vmem:[#allocation2 + $0x78] sm:$0xf]  ;;  %v1152_v59 = vld [vmem:[#allocation2 + $0x8] sm:$0xe] }
  0xcc   : > { %v1058_v44 = vsel %vm3848_vm2, %v924_v30, %v1057_v26  ;;  %984 = vst [vmem:[#allocation2 + $0x10] sm:$0xf] %v983_v41  ;;  %v811_v48 = vpack.c.bf16 %v3339_v34, %v3339_v34  ;;  %v716_v49 = vmul.f32 %v3909_v4, %v676_v35  ;;  %v1569_v50 = vpack.c.b16 %v1553_v37, %v1553_v37  ;;  %v3982_v51 = vld [vmem:[#allocation2 + $0x7c] sm:$0x1]  ;;  %v1085_v20 = vld [vmem:[#allocation2 + $0x78] sm:$0xf] }
  0xcd   : > { %987 = vst [vmem:[#allocation2 + $0x14] sm:$0x1] %v986_v42  ;;  %v1633_v52 = vunpack.c.l.b16 %v3969_v36  ;;  %v1900_v55 = vunpack.c.l.b16 %v1180_v46  ;;  %v1980_v57 = vunpack.c.l.b16 %v3982_v51  ;;  %v1252_v58 = vunpack.c.l.b16 %v3971_v38  ;;  %v4009_v31 = vld [vmem:[#allocation2 + $0x7c] sm:$0x1]  ;;  %v1105_v32 = vld [vmem:[#allocation2 + $0x8] sm:$0xe] }
  0xce   : > { %1056 = vst [vmem:[#allocation2 + $0x80] sm:$0xf] %v1055_v43  ;;  %v830_v60 = vshrl.u32 %v799_v47, 16  ;;  %v833_v61 = vshll.u32 %v799_v47, 16  ;;  %v926_v62 = vshrl.u32 %v811_v48, 16  ;;  %v929_v63 = vshll.u32 %v811_v48, 16  ;;  %1585 = vrot.lane.b32.xlu1 %v1569_v50, %s3692_s21 }
  0xcf   : > { %1059 = vst [vmem:[#allocation2 + $0x84] sm:$0x1] %v1058_v44  ;;  %v736_v1 = vadd.f32 %v3918_v12, %v716_v49  ;;  %v3989_v2 = vpack.c.b16 %v1633_v52, %v1553_v37  ;;  %v1916_v3 = vpack.c.b16 %v1900_v55, %v1900_v55  ;;  %v1996_v5 = vpack.c.b16 %v1980_v57, %v1900_v55  ;;  %v415_v37 = vld [vmem:[#allocation2 + $0x38] sm:$0x1] }
  0xd0   : > { %v832_v6 = vrot.slane %v830_v60, 7  ;;  %v928_v8 = vrot.slane %v926_v62, 7  ;;  %v1282_v13 = vpack.c.b16 %v1252_v58, %v1251_v40  ;;  %v1793_v14 = vunpack.c.l.b16 %v1152_v59  ;;  %v477_v40 = vld [vmem:[#allocation2 + $0x3c] sm:$0x1] }
  0xd1   : > { %vm752_vm13 = vcmp.ge.f32.partialorder %v736_v1, 1.0  ;;  %1943 = vrot.lane.b32.xlu0 %v1916_v3, %s3690_s29  ;;  %v2079_v24 = vshrl.u32 %v1996_v5, 16  ;;  %v2081_v25 = vshll.u32 %v1996_v5, 16  ;;  %v1275_v44 = vunpack.c.l.b16 %v1085_v20  ;;  %v994_v1 = vld [vmem:[#allocation2 + $0x20] sm:$0xf] }
  0xd2   : > { %v835_v15 = vor.u32 %v833_v61, %v832_v6  ;;  %v836_v16 = vrot.slane %v832_v6, 4  ;;  %v931_v17 = vor.u32 %v929_v63, %v928_v8  ;;  %v932_v18 = vrot.slane %v928_v8, 4  ;;  %v679_v19 = vpop.f32.mrf.mxu0  ;;  %v997_v3 = vld [vmem:[#allocation2 + $0x24] sm:$0x1] }
  0xd3   : > { %v3328_v22 = vsel %vm752_vm13, 1.0, %v5090_v21  ;;  %v717_v23 = vmul.f32 %v3909_v4, %v679_v19  ;;  %v1121_v26 = vld [vmem:[#allocation2 + $0x10] sm:$0xf]  ;;  %v2083_v35 = vrot.slane %v2081_v25, 1  ;;  %v1305_v36 = vshrl.u32 %v1282_v13, 16 }
  0xd4   : > { %v989_v27 = vsel %vm3936_vm8, %v835_v15, %v988_v0  ;;  %v992_v28 = vsel %vm3848_vm2, %v836_v16, %v991_v7  ;;  %v1061_v29 = vsel %vm3936_vm8, %v931_v17, %v1060_v10  ;;  %v1064_v30 = vsel %vm3848_vm2, %v932_v18, %v1063_v11  ;;  %v4014_v46 = vld [vmem:[#allocation2 + $0x14] sm:$0x1]  ;;  %v1201_v0 = vld [vmem:[#allocation2 + $0x10] sm:$0xe]  ;;  %v1000_v15 = vld [vmem:[#allocation2 + $0x28] sm:$0xf] }
  0xd5   : > { %990 = vst [vmem:[#allocation2 + $0x18] sm:$0xf] %v989_v27  ;;  %v800_v33 = vpack.c.bf16 %v3328_v22, %v3328_v22  ;;  %v737_v34 = vadd.f32 %v3918_v12, %v717_v23  ;;  %v1307_v41 = vshll.u32 %v1282_v13, 16  ;;  %v1809_v42 = vpack.c.b16 %v1633_v52, %v1793_v14  ;;  %v1003_v16 = vld [vmem:[#allocation2 + $0x2c] sm:$0x1] }
  0xd6   : > { %993 = vst [vmem:[#allocation2 + $0x1c] sm:$0x1] %v992_v28  ;;  %v4012_v43 = vunpack.c.l.b16 %v1121_v26  ;;  %v2084_v49 = vor.u32 %v2083_v35, %v2079_v24  ;;  %v1276_v62 = vunpack.c.l.b16 %v4009_v31  ;;  %v1458_v63 = vunpack.c.l.b16 %v1105_v32  ;;  %v1181_v28 = vld [vmem:[#allocation2 + $0x80] sm:$0xf] }
  0xd7   : > { %1062 = vst [vmem:[#allocation2 + $0x88] sm:$0xf] %v1061_v29  ;;  %v838_v47 = vshrl.u32 %v800_v33, 16  ;;  %v841_v48 = vshll.u32 %v800_v33, 16  ;;  %vm753_vm14 = vcmp.ge.f32.partialorder %v737_v34, 1.0  ;;  %v1309_v55 = vrot.slane %v1307_v41, 1 }
  0xd8   : > { %1065 = vst [vmem:[#allocation2 + $0x8c] sm:$0x1] %v1064_v30  ;;  %v3329_v50 = vsel %vm753_vm14, 1.0, %v5090_v21  ;;  %v1825_v59 = vrot.slane %v1809_v42, 1  ;;  %v1570_v60 = vpack.c.b16 %v4012_v43, %v4012_v43  ;;  %2135 = vrot.lane.b32.xlu2 %v2084_v49, %s3692_s21  ;;  %v416_v7 = vsel %vm3848_vm2, 0, %v415_v37 }
  0xd9   : > { %v840_v61 = vrot.slane %v838_v47, 7  ;;  %v801_v52 = vpack.c.bf16 %v3329_v50, %v3329_v50  ;;  %v1310_v5 = vor.u32 %v1309_v55, %v1305_v36  ;;  %v478_v8 = vsel %vm3856_vm4, 0, %v477_v40  ;;  %417 = vst [vmem:[#allocation2 + $0x38] sm:$0x1] %v416_v7  ;;  %v4043_v36 = vld [vmem:[#allocation2 + $0x7c] sm:$0x1] }
  0xda   : > { %1841 = vrot.lane.b32.xlu0 %v1825_v59, %s3691_s30  ;;  %v681_v6 = vpop.f32.mrf.mxu0  ;;  %v1969_v9 = vunpack.c.l.b16 %v4014_v46  ;;  %v1294_v18 = vpack.c.b16 %v1276_v62, %v1275_v44  ;;  %v1474_v19 = vpack.c.b16 %v1252_v58, %v1458_v63  ;;  %479 = vst [vmem:[#allocation2 + $0x3c] sm:$0x1] %v478_v8  ;;  %v2161_v22 = vunpack.c.l.b16 %v1201_v0  ;;  %v1169_v41 = vld [vmem:[#allocation2 + $0x10] sm:$0xf]  ;;  %v1164_v49 = vld [vmem:[#allocation2 + $0x78] sm:$0xe] }
  0xdb   : > { %v843_v10 = vor.u32 %v841_v48, %v840_v61  ;;  %v844_v11 = vrot.slane %v840_v61, 4  ;;  %v846_v13 = vshrl.u32 %v801_v52, 16  ;;  %v849_v14 = vshll.u32 %v801_v52, 16  ;;  %1411 = vrot.lane.b32.xlu1 %v1310_v5, %s3691_s30  ;;  %v418_v50 = vld [vmem:[#allocation2 + $0x40] sm:$0x1] }
  0xdc   : > { %v718_v17 = vmul.f32 %v3909_v4, %v681_v6  ;;  %v1202_v20 = vld [vmem:[#allocation2 + $0x18] sm:$0xe]  ;;  %v1389_v30 = vshrl.u32 %v1294_v18, 16  ;;  %v1391_v38 = vshll.u32 %v1294_v18, 16  ;;  %v1490_v58 = vrot.slane %v1474_v19, 1 }
  0xdd   : > { %v995_v23 = vsel %vm3936_vm8, %v843_v10, %v994_v1  ;;  %v998_v24 = vsel %vm3848_vm2, %v844_v11, %v997_v3  ;;  %v848_v25 = vrot.slane %v846_v13, 7  ;;  %v4037_v26 = vld [vmem:[#allocation2 + $0x1c] sm:$0x1]  ;;  %v2162_v27 = vunpack.c.l.b16 %v1202_v20  ;;  %v480_v0 = vld [vmem:[#allocation2 + $0x44] sm:$0x1] }
  0xde   : > { %996 = vst [vmem:[#allocation2 + $0x20] sm:$0xf] %v995_v23  ;;  %v738_v29 = vadd.f32 %v3918_v12, %v718_v17  ;;  %v1970_v34 = vunpack.c.l.b16 %v4037_v26  ;;  %v2177_v35 = vpack.c.b16 %v1969_v9, %v2161_v22  ;;  %v1393_v37 = vrot.slane %v1391_v38, 1  ;;  %v4060_v6 = vld [vmem:[#allocation2 + $0x14] sm:$0x1] }
  0xdf   : > { %999 = vst [vmem:[#allocation2 + $0x24] sm:$0x1] %v998_v24  ;;  %v851_v32 = vor.u32 %v849_v14, %v848_v25  ;;  %v852_v33 = vrot.slane %v848_v25, 4  ;;  %v4045_v40 = vunpack.c.l.b16 %v1181_v28  ;;  %v1889_v3 = vunpack.c.l.b16 %v1169_v41  ;;  %v1106_v13 = vld [vmem:[#allocation2 + $0x10] sm:$0xe] }
  0xe0   : > { %vm754_vm15 = vcmp.ge.f32.partialorder %v738_v29, 1.0  ;;  %1587 = vrot.lane.b32.xlu2 %v1570_v60, %s3692_s21  ;;  %v2178_v48 = vpack.c.b16 %v1970_v34, %v2162_v27  ;;  %v1394_v59 = vor.u32 %v1393_v37, %v1389_v30  ;;  %v2193_v52 = vrot.slane %v2177_v35, 1  ;;  %v4063_v14 = vld [vmem:[#allocation2 + $0x84] sm:$0x1]  ;;  %v1165_v22 = vld [vmem:[#allocation2 + $0x80] sm:$0xe] }
  0xe1   : > { %v1001_v42 = vsel %vm3936_vm8, %v851_v32, %v1000_v15  ;;  %v1004_v44 = vsel %vm3848_vm2, %v852_v33, %v1003_v16  ;;  %v3330_v47 = vsel %vm754_vm15, 1.0, %v5090_v21  ;;  %v1917_v63 = vpack.c.b16 %v4045_v40, %v4045_v40  ;;  %v1006_v15 = vld [vmem:[#allocation2 + $0x30] sm:$0xf]  ;;  %v1009_v16 = vld [vmem:[#allocation2 + $0x34] sm:$0x1] }
  0xe2   : > { %1002 = vst [vmem:[#allocation2 + $0x28] sm:$0xf] %v1001_v42  ;;  %v802_v55 = vpack.c.bf16 %v3330_v47, %v3330_v47  ;;  %1507 = vrot.lane.b32.xlu0 %v1490_v58, %s3690_s29  ;;  %v684_v61 = vpop.f32.mrf.mxu0  ;;  %v2194_v60 = vrot.slane %v2178_v48, 1  ;;  %v1645_v5 = vunpack.c.l.b16 %v4043_v36  ;;  %v2470_v10 = vunpack.c.l.b16 %v2193_v52  ;;  %v1117_v23 = vld [vmem:[#allocation2 + $0x78] sm:$0xe] }
  0xe3   : > { %1005 = vst [vmem:[#allocation2 + $0x2c] sm:$0x1] %v1004_v44  ;;  %v719_v1 = vmul.f32 %v3909_v4, %v684_v61  ;;  %1435 = vrot.lane.b32.xlu1 %v1394_v59, %s3691_s30  ;;  %v1805_v11 = vunpack.c.l.b16 %v1164_v49  ;;  %v1905_v19 = vpack.c.b16 %v1889_v3, %v1889_v3  ;;  %v419_v20 = vsel %vm3848_vm2, 0, %v418_v50  ;;  %v427_v29 = vld [vmem:[#allocation2 + $0x58] sm:$0x1] }
  0xe4   : > { %v854_v7 = vshrl.u32 %v802_v55, 16  ;;  %v857_v8 = vshll.u32 %v802_v55, 16  ;;  %v2473_v18 = vunpack.c.l.b16 %v2194_v60  ;;  %420 = vst [vmem:[#allocation2 + $0x40] sm:$0x1] %v419_v20  ;;  %v481_v27 = vsel %vm3856_vm4, 0, %v480_v0 }
  0xe5   : > { %v739_v17 = vadd.f32 %v3918_v12, %v719_v1  ;;  %v1821_v25 = vpack.c.b16 %v1645_v5, %v1805_v11  ;;  %v1254_v28 = vunpack.c.l.b16 %v4060_v6  ;;  %482 = vst [vmem:[#allocation2 + $0x44] sm:$0x1] %v481_v27  ;;  %v1459_v38 = vunpack.c.l.b16 %v1106_v13  ;;  %v489_v32 = vld [vmem:[#allocation2 + $0x5c] sm:$0x1]  ;;  %v4079_v49 = vld [vmem:[#allocation2 + $0x84] sm:$0x1] }
  0xe6   : > { %v856_v24 = vrot.slane %v854_v7, 7  ;;  %v2554_v30 = vpack.c.b16 %v2473_v18, %v2470_v10  ;;  %v1646_v58 = vunpack.c.l.b16 %v4063_v14  ;;  %v1806_v47 = vunpack.c.l.b16 %v1165_v22  ;;  %v1153_v0 = vld [vmem:[#allocation2 + $0x10] sm:$0xe]  ;;  %v1012_v10 = vld [vmem:[#allocation2 + $0x38] sm:$0xf] }
  0xe7   : > { %vm755_vm1 = vcmp.ge.f32.partialorder %v739_v17, 1.0  ;;  %v1837_v41 = vrot.slane %v1821_v25, 1  ;;  %v1475_v44 = vpack.c.b16 %v1254_v28, %v1459_v38  ;;  %v1470_v48 = vunpack.c.l.b16 %v1117_v23  ;;  %v1015_v11 = vld [vmem:[#allocation2 + $0x3c] sm:$0x1]  ;;  %v4099_v18 = vld [vmem:[#allocation2 + $0x24] sm:$0x1] }
  0xe8   : > { %v859_v33 = vor.u32 %v857_v8, %v856_v24  ;;  %v860_v35 = vrot.slane %v856_v24, 4  ;;  %v3331_v37 = vsel %vm755_vm1, 1.0, %v5090_v21  ;;  %3413 = vmatmul.msk.bf16.vlgmr.msrb.gmra.mxu0 %vm2209_vm0, %v2554_v30  ;;  %1945 = vrot.lane.b32.xlu2 %v1917_v63, %s3690_s29  ;;  %v428_v61 = vsel %vm3848_vm2, 0, %v427_v29  ;;  %v1137_v63 = vld [vmem:[#allocation2 + $0x14] sm:$0x1] }
  0xe9   : > { %v803_v42 = vpack.c.bf16 %v3331_v37, %v3331_v37  ;;  %v490_v52 = vsel %vm3856_vm4, 0, %v489_v32  ;;  %v1491_v8 = vrot.slane %v1475_v44, 1  ;;  %v1822_v13 = vpack.c.b16 %v1646_v58, %v1806_v47  ;;  %429 = vst [vmem:[#allocation2 + $0x58] sm:$0x1] %v428_v61  ;;  %v492_v46 = vld [vmem:[#allocation2 + $0x64] sm:$0x1] }
  0xea   : > { %v1007_v50 = vsel %vm3936_vm8, %v859_v33, %v1006_v15  ;;  %v1010_v55 = vsel %vm3848_vm2, %v860_v35, %v1009_v16  ;;  %1865 = vrot.lane.b32.xlu0 %v1837_v41, %s3691_s30  ;;  %v686_v59 = vpop.f32.mrf.mxu0  ;;  %v1486_v15 = vpack.c.b16 %v1276_v62, %v1470_v48  ;;  %v1985_v16 = vpack.c.b16 %v1969_v9, %v1889_v3  ;;  %v4106_v30 = vld [vmem:[#allocation2 + $0x2c] sm:$0x1]  ;;  %v1203_v37 = vld [vmem:[#allocation2 + $0x20] sm:$0xe]  ;;  %v1204_v41 = vld [vmem:[#allocation2 + $0x28] sm:$0xe] }
  0xeb   : > { %1008 = vst [vmem:[#allocation2 + $0x30] sm:$0xf] %v1007_v50  ;;  %v862_v1 = vshrl.u32 %v803_v42, 16  ;;  %v865_v60 = vshll.u32 %v803_v42, 16  ;;  %v720_v7 = vmul.f32 %v3909_v4, %v686_v59  ;;  %1921 = vrot.lane.b32.xlu1 %v1905_v19, %s3690_s29  ;;  %v1981_v17 = vunpack.c.l.b16 %v4079_v49  ;;  %v430_v19 = vld [vmem:[#allocation2 + $0x60] sm:$0x1] }
  0xec   : > { %1011 = vst [vmem:[#allocation2 + $0x34] sm:$0x1] %v1010_v55  ;;  %v1634_v23 = vunpack.c.l.b16 %v1137_v63  ;;  %v1794_v24 = vunpack.c.l.b16 %v1153_v0  ;;  %v1838_v25 = vrot.slane %v1822_v13, 1  ;;  %v1502_v27 = vrot.slane %v1486_v15, 1  ;;  %v1170_v48 = vld [vmem:[#allocation2 + $0x18] sm:$0xf] }
  0xed   : > { %v864_v20 = vrot.slane %v862_v1, 7  ;;  %v740_v22 = vadd.f32 %v3918_v12, %v720_v7  ;;  %491 = vst [vmem:[#allocation2 + $0x5c] sm:$0x1] %v490_v52  ;;  %v1997_v31 = vpack.c.b16 %v1981_v17, %v4045_v40  ;;  %v1971_v62 = vunpack.c.l.b16 %v4099_v18  ;;  %v448_v50 = vld [vmem:[#allocation2 + $0x90] sm:$0x1] }
  0xee   : > { %v2002_v29 = vshrl.u32 %v1985_v16, 16  ;;  %v2004_v32 = vshll.u32 %v1985_v16, 16  ;;  %v4115_v47 = vpack.c.b16 %v1634_v23, %v4012_v43  ;;  %v510_v55 = vld [vmem:[#allocation2 + $0x94] sm:$0x1]  ;;  %v1810_v63 = vpack.c.b16 %v1634_v23, %v1794_v24  ;;  %v1018_v24 = vld [vmem:[#allocation2 + $0x40] sm:$0xf] }
  0xef   : > { %v867_v9 = vor.u32 %v865_v60, %v864_v20  ;;  %v868_v3 = vrot.slane %v864_v20, 4  ;;  %vm756_vm3 = vcmp.ge.f32.partialorder %v740_v22, 1.0  ;;  %v2086_v33 = vshrl.u32 %v1997_v31, 16  ;;  %v1133_v36 = vld [vmem:[#allocation2 + $0x80] sm:$0xf] }
  0xf0   : > { %v3332_v38 = vsel %vm756_vm3, 1.0, %v5090_v21  ;;  %v2088_v35 = vshll.u32 %v1997_v31, 16  ;;  %1509 = vrot.lane.b32.xlu2 %v1491_v8, %s3690_s29  ;;  %v2006_v61 = vrot.slane %v2004_v32, 1  ;;  %v431_v0 = vsel %vm3848_vm2, 0, %v430_v19  ;;  %v706_v8 = vpop.f32.mrf.mxu1  ;;  %v1021_v19 = vld [vmem:[#allocation2 + $0x44] sm:$0x1] }
  0xf1   : > { %v1013_v42 = vsel %vm3936_vm8, %v867_v9, %v1012_v10  ;;  %v1016_v40 = vsel %vm3848_vm2, %v868_v3, %v1015_v11  ;;  %v804_v44 = vpack.c.bf16 %v3332_v38, %v3332_v38  ;;  %v493_v43 = vsel %vm3856_vm4, 0, %v492_v46  ;;  %432 = vst [vmem:[#allocation2 + $0x60] sm:$0x1] %v431_v0  ;;  %v495_v0 = vld [vmem:[#allocation2 + $0x6c] sm:$0x1] }
  0xf2   : > { %1014 = vst [vmem:[#allocation2 + $0x38] sm:$0xf] %v1013_v42  ;;  %1531 = vrot.lane.b32.xlu0 %v1502_v27, %s3690_s29  ;;  %v689_v59 = vpop.f32.mrf.mxu0  ;;  %v2090_v52 = vrot.slane %v2088_v35, 1  ;;  %v2007_v10 = vor.u32 %v2006_v61, %v2002_v29  ;;  %v1826_v13 = vrot.slane %v1810_v63, 1  ;;  %v1972_v15 = vunpack.c.l.b16 %v4106_v30  ;;  %v1125_v30 = vld [vmem:[#allocation2 + $0x30] sm:$0xf] }
  0xf3   : > { %1017 = vst [vmem:[#allocation2 + $0x3c] sm:$0x1] %v1016_v40  ;;  %v870_v1 = vshrl.u32 %v804_v44, 16  ;;  %v873_v60 = vshll.u32 %v804_v44, 16  ;;  %v721_v7 = vmul.f32 %v3909_v4, %v689_v59  ;;  %1867 = vrot.lane.b32.xlu1 %v1838_v25, %s3691_s30  ;;  %v2163_v22 = vunpack.c.l.b16 %v1203_v37  ;;  %v1074_v44 = vld [vmem:[#allocation2 + $0x10] sm:$0xf] }
  0xf4   : > { %v2091_v11 = vor.u32 %v2090_v52, %v2086_v33  ;;  %494 = vst [vmem:[#allocation2 + $0x64] sm:$0x1] %v493_v43  ;;  %v2164_v23 = vunpack.c.l.b16 %v1204_v41  ;;  %v4126_v27 = vunpack.c.l.b16 %v1170_v48  ;;  %v449_v31 = vsel %vm3848_vm2, 0, %v448_v50  ;;  %v433_v48 = vld [vmem:[#allocation2 + $0x68] sm:$0x1] }
  0xf5   : > { %v872_v16 = vrot.slane %v870_v1, 7  ;;  %v741_v20 = vadd.f32 %v3918_v12, %v721_v7  ;;  %v511_v25 = vsel %vm3856_vm4, 0, %v510_v55  ;;  %v728_v46 = vmul.f32 %v3909_v4, %v706_v8  ;;  %450 = vst [vmem:[#allocation2 + $0x90] sm:$0x1] %v449_v31 }
  0xf6   : > { %v2179_v29 = vpack.c.b16 %v1971_v62, %v2163_v22  ;;  %v2180_v32 = vpack.c.b16 %v1972_v15, %v2164_v23  ;;  %v1986_v33 = vpack.c.b16 %v1970_v34, %v4126_v27  ;;  %512 = vst [vmem:[#allocation2 + $0x94] sm:$0x1] %v511_v25  ;;  %v1027_v22 = vld [vmem:[#allocation2 + $0x5c] sm:$0x1]  ;;  %v1906_v6 = vpack.c.b16 %v4126_v27, %v4126_v27 }
  0xf7   : > { %v875_v9 = vor.u32 %v873_v60, %v872_v16  ;;  %v876_v3 = vrot.slane %v872_v16, 4  ;;  %vm757_vm5 = vcmp.ge.f32.partialorder %v741_v20, 1.0  ;;  %v748_v35 = vadd.f32 %v3918_v12, %v728_v46  ;;  %v1182_v16 = vld [vmem:[#allocation2 + $0x88] sm:$0xf]  ;;  %v1024_v20 = vld [vmem:[#allocation2 + $0x58] sm:$0xf] }
  0xf8   : > { %v3333_v38 = vsel %vm757_vm5, 1.0, %v5090_v21  ;;  %2113 = vrot.lane.b32.xlu2 %v2007_v10, %s3692_s21  ;;  %v2195_v40 = vrot.slane %v2179_v29, 1  ;;  %v2196_v34 = vrot.slane %v2180_v32, 1  ;;  %v2009_v50 = vshrl.u32 %v1986_v33, 16 }
  0xf9   : > { %v1019_v37 = vsel %vm3936_vm8, %v875_v9, %v1018_v24  ;;  %v1022_v41 = vsel %vm3848_vm2, %v876_v3, %v1021_v19  ;;  %v805_v42 = vpack.c.bf16 %v3333_v38, %v3333_v38  ;;  %v2011_v55 = vshll.u32 %v1986_v33, 16  ;;  %v4156_v9 = vld [vmem:[#allocation2 + $0x8c] sm:$0x1]  ;;  %v1126_v45 = vld [vmem:[#allocation2 + $0x38] sm:$0xf] }
  0xfa   : > { %1020 = vst [vmem:[#allocation2 + $0x40] sm:$0xf] %v1019_v37  ;;  %1843 = vrot.lane.b32.xlu0 %v1826_v13, %s3691_s30  ;;  %v691_v26 = vpop.f32.mrf.mxu0  ;;  %vm764_vm6 = vcmp.ge.f32.partialorder %v748_v35, 1.0  ;;  %v2476_v63 = vunpack.c.l.b16 %v2195_v40  ;;  %v2479_v1 = vunpack.c.l.b16 %v2196_v34  ;;  %v1253_v13 = vunpack.c.l.b16 %v1074_v44  ;;  %v436_v34 = vld [vmem:[#allocation2 + $0x70] sm:$0x1] }
  0xfb   : > { %1023 = vst [vmem:[#allocation2 + $0x44] sm:$0x1] %v1022_v41  ;;  %v878_v59 = vshrl.u32 %v805_v42, 16  ;;  %v881_v61 = vshll.u32 %v805_v42, 16  ;;  %v722_v52 = vmul.f32 %v3909_v4, %v691_v26  ;;  %2137 = vrot.lane.b32.xlu1 %v2091_v11, %s3692_s21  ;;  %v2013_v60 = vrot.slane %v2011_v55, 1 }
  0xfc   : > { %v3340_v7 = vsel %vm764_vm6, 1.0, %v5090_v21  ;;  %v2557_v23 = vpack.c.b16 %v2479_v1, %v2476_v63  ;;  %v434_v19 = vsel %vm3848_vm2, 0, %v433_v48  ;;  %v496_v11 = vsel %vm3856_vm4, 0, %v495_v0  ;;  %v1066_v42 = vld [vmem:[#allocation2 + $0x90] sm:$0xf] }
  0xfd   : > { %v880_v43 = vrot.slane %v878_v59, 7  ;;  %v742_v8 = vadd.f32 %v3918_v12, %v722_v52  ;;  %v812_v10 = vpack.c.bf16 %v3340_v7, %v3340_v7  ;;  %v2014_v24 = vor.u32 %v2013_v60, %v2009_v50  ;;  %435 = vst [vmem:[#allocation2 + $0x68] sm:$0x1] %v434_v19  ;;  %v1069_v40 = vld [vmem:[#allocation2 + $0x94] sm:$0x1] }
  0xfe   : > { %3414 = vmatmul.msk.bf16.gmra.mxu0 %vm2209_vm0, %v2557_v23  ;;  %v1283_v38 = vpack.c.b16 %v1254_v28, %v1253_v13  ;;  %v4162_v32 = vunpack.c.l.b16 %v1182_v16  ;;  %497 = vst [vmem:[#allocation2 + $0x6c] sm:$0x1] %v496_v11  ;;  %v1982_v48 = vunpack.c.l.b16 %v4156_v9  ;;  %v1122_v26 = vld [vmem:[#allocation2 + $0x18] sm:$0xf]  ;;  %v1030_v52 = vld [vmem:[#allocation2 + $0x60] sm:$0xf] }
  0xff   : > { %v883_v31 = vor.u32 %v881_v61, %v880_v43  ;;  %v884_v25 = vrot.slane %v880_v43, 4  ;;  %vm758_vm7 = vcmp.ge.f32.partialorder %v742_v8, 1.0  ;;  %v934_v46 = vshrl.u32 %v812_v10, 16  ;;  %v498_v60 = vld [vmem:[#allocation2 + $0x74] sm:$0x1] }
 0x100   : > { %v3334_v3 = vsel %vm758_vm7, 1.0, %v5090_v21  ;;  %v937_v29 = vshll.u32 %v812_v10, 16  ;;  %2115 = vrot.lane.b32.xlu2 %v2014_v24, %s3692_s21  ;;  %v1314_v28 = vshll.u32 %v1283_v38, 16  ;;  %v1312_v63 = vshrl.u32 %v1283_v38, 16  ;;  %v1075_v10 = vld [vmem:[#allocation2 + $0x18] sm:$0xf] }
 0x101   : > { %v1025_v33 = vsel %vm3936_vm8, %v883_v31, %v1024_v20  ;;  %v1028_v35 = vsel %vm3848_vm2, %v884_v25, %v1027_v22  ;;  %v806_v37 = vpack.c.bf16 %v3334_v3, %v3334_v3  ;;  %v936_v41 = vrot.slane %v934_v46, 7  ;;  %v4181_v13 = vld [vmem:[#allocation2 + $0x1c] sm:$0x1]  ;;  %v1033_v16 = vld [vmem:[#allocation2 + $0x64] sm:$0x1] }
 0x102   : > { %1026 = vst [vmem:[#allocation2 + $0x58] sm:$0xf] %v1025_v33  ;;  %v694_v44 = vpop.f32.mrf.mxu0  ;;  %v1316_v0 = vrot.slane %v1314_v28, 1  ;;  %v1998_v27 = vpack.c.b16 %v1982_v48, %v4162_v32  ;;  %v1555_v11 = vunpack.c.l.b16 %v1122_v26  ;;  %v437_v31 = vsel %vm3848_vm2, 0, %v436_v34  ;;  %v1171_v28 = vld [vmem:[#allocation2 + $0x20] sm:$0xf] }
 0x103   : > { %1029 = vst [vmem:[#allocation2 + $0x5c] sm:$0x1] %v1028_v35  ;;  %v886_v50 = vshrl.u32 %v806_v37, 16  ;;  %v889_v55 = vshll.u32 %v806_v37, 16  ;;  %v939_v59 = vor.u32 %v937_v29, %v936_v41  ;;  %v940_v61 = vrot.slane %v936_v41, 4  ;;  %1923 = vrot.lane.b32.xlu1 %v1906_v6, %s3690_s29 }
 0x104   : > { %v723_v1 = vmul.f32 %v3909_v4, %v694_v44  ;;  %v1317_v20 = vor.u32 %v1316_v0, %v1312_v63  ;;  %v2093_v22 = vshrl.u32 %v1998_v27, 16  ;;  %v2095_v23 = vshll.u32 %v1998_v27, 16  ;;  %438 = vst [vmem:[#allocation2 + $0x70] sm:$0x1] %v437_v31  ;;  %v1138_v29 = vld [vmem:[#allocation2 + $0x1c] sm:$0x1] }
 0x105   : > { %v888_v7 = vrot.slane %v886_v50, 7  ;;  %v1067_v43 = vsel %vm3936_vm8, %v939_v59, %v1066_v42  ;;  %v1070_v8 = vsel %vm3848_vm2, %v940_v61, %v1069_v40  ;;  %v1255_v46 = vunpack.c.l.b16 %v1075_v10  ;;  %v1154_v37 = vld [vmem:[#allocation2 + $0x18] sm:$0xe]  ;;  %v1123_v26 = vld [vmem:[#allocation2 + $0x20] sm:$0xf] }
 0x106   : > { %1068 = vst [vmem:[#allocation2 + $0x90] sm:$0xf] %v1067_v43  ;;  %v743_v4 = vadd.f32 %v3918_v12, %v723_v1  ;;  %1413 = vrot.lane.b32.xlu0 %v1317_v20, %s3691_s30  ;;  %v2097_v25 = vrot.slane %v2095_v23, 1  ;;  %v1256_v3 = vunpack.c.l.b16 %v4181_v13  ;;  %v499_v35 = vsel %vm3856_vm4, 0, %v498_v60  ;;  %v3579_v50 = vld [vmem:[#allocation3] ss:$0 sm:$0xff] }
 0x107   : > { %v891_v24 = vor.u32 %v889_v55, %v888_v7  ;;  %v892_v19 = vrot.slane %v888_v7, 4  ;;  %1071 = vst [vmem:[#allocation2 + $0x94] sm:$0x1] %v1070_v8  ;;  %v1571_v40 = vpack.c.b16 %v1555_v11, %v1555_v11  ;;  %v1918_v34 = vpack.c.b16 %v4162_v32, %v4162_v32  ;;  %v1139_v61 = vld [vmem:[#allocation2 + $0x24] sm:$0x1] }
 0x108   : > { %vm759_vm9 = vcmp.ge.f32.partialorder %v743_v4, 1.0  ;;  %v2098_v42 = vor.u32 %v2097_v25, %v2093_v22  ;;  %v1284_v44 = vpack.c.b16 %v1256_v3, %v1255_v46  ;;  %v1635_v59 = vunpack.c.l.b16 %v1138_v29  ;;  %500 = vst [vmem:[#allocation2 + $0x74] sm:$0x1] %v499_v35  ;;  %v3580_v60 = vld [vmem:[%s5082_s3] ss:$0 sm:$0xff] }
 0x109   : > { %v1031_v12 = vsel %vm3936_vm8, %v891_v24, %v1030_v52  ;;  %v1034_v38 = vsel %vm3848_vm2, %v892_v19, %v1033_v16  ;;  %v3335_v33 = vsel %vm759_vm9, 1.0, %v5090_v21  ;;  %v1155_v52 = vld [vmem:[#allocation2 + $0x20] sm:$0xe]  ;;  %v1795_v27 = vunpack.c.l.b16 %v1154_v37  ;;  %v1107_v4 = vld [vmem:[#allocation2 + $0x18] sm:$0xe] }
 0x10a   : > { %1032 = vst [vmem:[#allocation2 + $0x60] sm:$0xf] %v1031_v12  ;;  %v807_v41 = vpack.c.bf16 %v3335_v33, %v3335_v33  ;;  %v696_v6 = vpop.f32.mrf.mxu0  ;;  %2139 = vrot.lane.b32.xlu2 %v2098_v42, %s3692_s21  ;;  %v1321_v1 = vshll.u32 %v1284_v44, 16  ;;  %v4204_v32 = vpack.c.b16 %v1635_v59, %v1555_v11  ;;  %v4206_v43 = vunpack.c.l.b16 %v1123_v26  ;;  %v1036_v22 = vld [vmem:[#allocation2 + $0x68] sm:$0xf] }
 0x10b   : > { %1035 = vst [vmem:[#allocation2 + $0x64] sm:$0x1] %v1034_v38  ;;  %v724_v55 = vmul.f32 %v3579_v50, %v696_v6  ;;  %1589 = vrot.lane.b32.xlu1 %v1571_v40, %s3692_s21  ;;  %v1319_v10 = vshrl.u32 %v1284_v44, 16  ;;  %v1636_v20 = vunpack.c.l.b16 %v1139_v61  ;;  %v1039_v23 = vld [vmem:[#allocation2 + $0x6c] sm:$0x1]  ;;  %v1891_v24 = vunpack.c.l.b16 %v1171_v28 }
 0x10c   : > { %v894_v63 = vshrl.u32 %v807_v41, 16  ;;  %v897_v0 = vshll.u32 %v807_v41, 16  ;;  %v1323_v16 = vrot.slane %v1321_v1, 1  ;;  %v1796_v19 = vunpack.c.l.b16 %v1155_v52  ;;  %v1092_v33 = vld [vmem:[#allocation2 + $0x24] sm:$0x1] }
 0x10d   : > { %v744_v7 = vadd.f32 %v3580_v60, %v724_v55  ;;  %v1811_v11 = vpack.c.b16 %v1635_v59, %v1795_v27  ;;  %v1907_v12 = vpack.c.b16 %v1891_v24, %v1891_v24  ;;  %v4211_v38 = vpack.c.b16 %v1636_v20, %v4206_v43  ;;  %v1076_v35 = vld [vmem:[#allocation2 + $0x20] sm:$0xf]  ;;  %v4213_v37 = vld [vmem:[#allocation2 + $0x34] sm:$0x1]  ;;  %v4219_v28 = vld [vmem:[#allocation2 + $0x3c] sm:$0x1]  ;;  %v4232_v60 = vpop.permute.xlu2 %1505 }
 0x10e   : > { %v896_v8 = vrot.slane %v894_v63, 7  ;;  %1947 = vrot.lane.b32.xlu0 %v1918_v34, %s3690_s29  ;;  %v1324_v40 = vor.u32 %v1323_v16, %v1319_v10  ;;  %v1460_v6 = vunpack.c.l.b16 %v1107_v4  ;;  %v1205_v44 = vld [vmem:[#allocation2 + $0x30] sm:$0xe]  ;;  %v1206_v26 = vld [vmem:[#allocation2 + $0x38] sm:$0xe]  ;;  %v1812_v55 = vpack.c.b16 %v1636_v20, %v1796_v19 }
 0x10f   : > { %vm760_vm10 = vcmp.ge.f32.partialorder %v744_v7, 1.0  ;;  %v1827_v61 = vrot.slane %v1811_v11, 1  ;;  %v1572_v52 = vpack.c.b16 %v4206_v43, %v4206_v43  ;;  %v1108_v63 = vld [vmem:[#allocation2 + $0x20] sm:$0xe]  ;;  %v1973_v1 = vunpack.c.l.b16 %v4213_v37  ;;  %v1042_v20 = vld [vmem:[#allocation2 + $0x70] sm:$0xf] }
 0x110   : > { %v899_v31 = vor.u32 %v897_v0, %v896_v8  ;;  %v900_v25 = vrot.slane %v896_v8, 4  ;;  %v3336_v46 = vsel %vm760_vm10, 1.0, %v5090_v21  ;;  %v4229_v0 = vpack.c.b16 %v1971_v62, %v1891_v24  ;;  %v1045_v4 = vld [vmem:[#allocation2 + $0x74] sm:$0x1]  ;;  %v1172_v62 = vld [vmem:[#allocation2 + $0x28] sm:$0xf] }
 0x111   : > { %v808_v29 = vpack.c.bf16 %v3336_v46, %v3336_v46  ;;  %v1258_v7 = vunpack.c.l.b16 %v1092_v33  ;;  %v1257_v8 = vunpack.c.l.b16 %v1076_v35  ;;  %v1974_v10 = vunpack.c.l.b16 %v4219_v28  ;;  %v1209_v16 = vld [vmem:[#allocation2 + $0x60] sm:$0xe]  ;;  %v1157_v21 = vld [vmem:[#allocation2 + $0x30] sm:$0xe]  ;;  %v3485_v37 = vld [vmem:[%s5083_s4 + $0x8] sm:$0xff] }
 0x112   : > { %v1037_v41 = vsel %vm3936_vm8, %v899_v31, %v1036_v22  ;;  %v1040_v42 = vsel %vm3848_vm2, %v900_v25, %v1039_v23  ;;  %v4221_v59 = vld [vmem:[#allocation2 + $0x64] sm:$0x1]  ;;  %1925 = vrot.lane.b32.xlu2 %v1907_v12, %s3690_s29  ;;  %v1476_v43 = vpack.c.b16 %v1256_v3, %v1460_v6  ;;  %v2165_v22 = vunpack.c.l.b16 %v1205_v44 }
 0x113   : > { %1038 = vst [vmem:[#allocation2 + $0x68] sm:$0xf] %v1037_v41  ;;  %v902_v34 = vshrl.u32 %v808_v29, 16  ;;  %v905_v50 = vshll.u32 %v808_v29, 16  ;;  %1415 = vrot.lane.b32.xlu1 %v1324_v40, %s3691_s30  ;;  %v2166_v23 = vunpack.c.l.b16 %v1206_v26  ;;  %v5093_v18 = vunpack.c.l.b16 %v4221_v59  ;;  %v1124_v41 = vld [vmem:[#allocation2 + $0x28] sm:$0xf] }
 0x114   : > { %1041 = vst [vmem:[#allocation2 + $0x6c] sm:$0x1] %v1040_v42  ;;  %v1828_v31 = vrot.slane %v1812_v55, 1  ;;  %v1461_v25 = vunpack.c.l.b16 %v1108_v63  ;;  %v2018_v46 = vshll.u32 %v4229_v0, 16  ;;  %v2181_v11 = vpack.c.b16 %v1973_v1, %v2165_v22 }
 0x115   : > { %v904_v27 = vrot.slane %v902_v34, 7  ;;  %v2182_v13 = vpack.c.b16 %v1974_v10, %v2166_v23  ;;  %v2169_v3 = vunpack.c.l.b16 %v1209_v16  ;;  %v4248_v33 = vpack.c.b16 %v1258_v7, %v1257_v8  ;;  %v4264_v16 = vld [vmem:[#allocation2 + $0x2c] sm:$0x1]  ;;  %v4266_v22 = vpop.permute.xlu2 %1521 }
 0x116   : > { %1845 = vrot.lane.b32.xlu0 %v1827_v61, %s3691_s30  ;;  %v4250_v35 = vunpack.c.l.b16 %v1172_v62  ;;  %v2016_v42 = vshrl.u32 %v4229_v0, 16  ;;  %v2197_v40 = vrot.slane %v2181_v11, 1  ;;  %v1477_v26 = vpack.c.b16 %v1258_v7, %v1461_v25  ;;  %v1077_v62 = vld [vmem:[#allocation2 + $0x28] sm:$0xf]  ;;  %v3491_v25 = vld [vmem:[%s5083_s4 + $0x38] sm:$0xff] }
 0x117   : > { %v907_v24 = vor.u32 %v905_v50, %v904_v27  ;;  %v908_v19 = vrot.slane %v904_v27, 4  ;;  %v2198_v6 = vrot.slane %v2182_v13, 1  ;;  %v2185_v44 = vpack.c.b16 %v5093_v18, %v2169_v3  ;;  %2724 = vmatpush.bf16.msrb.mxu1 %v3491_v25  ;;  %v1156_v25 = vld [vmem:[#allocation2 + $0x28] sm:$0xe] }
 0x118   : > { %v2482_v50 = vunpack.c.l.b16 %v2197_v40  ;;  %v1988_v63 = vpack.c.b16 %v1972_v15, %v4250_v35  ;;  %v2020_v0 = vrot.slane %v2018_v46, 1  ;;  %v1328_v27 = vshll.u32 %v4248_v33, 16 }
 0x119   : > { %v1043_v29 = vsel %vm3936_vm8, %v907_v24, %v1042_v20  ;;  %v1046_v12 = vsel %vm3848_vm2, %v908_v19, %v1045_v4  ;;  %v2485_v55 = vunpack.c.l.b16 %v2198_v6  ;;  %v2201_v7 = vrot.slane %v2185_v44, 1  ;;  %v4270_v24 = vld [vmem:[#allocation2 + $0x2c] sm:$0x1] }
 0x11a   : > { %1044 = vst [vmem:[#allocation2 + $0x70] sm:$0xf] %v1043_v29  ;;  %v1210_v34 = vld [vmem:[#allocation2 + $0x68] sm:$0xe]  ;;  %1591 = vrot.lane.b32.xlu2 %v1572_v52, %s3692_s21  ;;  %v1492_v20 = vrot.slane %v1476_v43, 1  ;;  %v1557_v52 = vunpack.c.l.b16 %v1124_v41  ;;  %v1493_v15 = vrot.slane %v1477_v26, 1  ;;  %v1637_v43 = vunpack.c.l.b16 %v4264_v16 }
 0x11b   : > { %1047 = vst [vmem:[#allocation2 + $0x74] sm:$0x1] %v1046_v12  ;;  %v4255_v39 = vld [vmem:[#allocation2 + $0x6c] sm:$0x1]  ;;  %1847 = vrot.lane.b32.xlu1 %v1828_v31, %s3691_s30  ;;  %v2170_v8 = vunpack.c.l.b16 %v1210_v34  ;;  %v2560_v4 = vpack.c.b16 %v2485_v55, %v2482_v50  ;;  %v1326_v19 = vshrl.u32 %v4248_v33, 16  ;;  %v2025_v31 = vshll.u32 %v1988_v63, 16 }
 0x11c   : > { %v5096_v61 = vunpack.c.l.b16 %v4255_v39  ;;  %v2021_v46 = vor.u32 %v2020_v0, %v2016_v42  ;;  %v1330_v11 = vrot.slane %v1328_v27, 1  ;;  %v2494_v3 = vunpack.c.l.b16 %v2201_v7  ;;  %v4279_v29 = vld [vmem:[#allocation2 + $0x34] sm:$0x1]  ;;  %v1212_v55 = vld [vmem:[#allocation2 + $0x78] sm:$0xe] }
 0x11d   : > { %3415 = vmatmul.msk.bf16.gmra.mxu0 %vm2209_vm0, %v2560_v4  ;;  %v1259_v12 = vunpack.c.l.b16 %v1077_v62  ;;  %v1260_v41 = vunpack.c.l.b16 %v4270_v24  ;;  %v4284_v33 = vpack.c.b16 %v1637_v43, %v1557_v52  ;;  %v4288_v44 = vunpack.c.l.b16 %v1125_v30  ;;  %v3490_v42 = vld [vmem:[%s5083_s4 + $0x30] sm:$0xff] }
 0x11e   : > { %v2186_v23 = vpack.c.b16 %v5096_v61, %v2170_v8  ;;  %1511 = vrot.lane.b32.xlu0 %v1492_v20, %s3690_s29  ;;  %v2023_v34 = vshrl.u32 %v1988_v63, 16  ;;  %v2027_v50 = vrot.slane %v2025_v31, 1  ;;  %v1638_v0 = vunpack.c.l.b16 %v4279_v29  ;;  %v4296_v8 = vpop.permute.xlu0 %1935  ;;  %2725 = vmatpush.bf16.msrb.mxu1 %v3490_v42  ;;  %v4313_v31 = vpop.permute.xlu2 %2127  ;;  %v3486_v16 = vld [vmem:[%s5083_s4 + $0x10] sm:$0xff] }
 0x11f   : > { %v1331_v4 = vor.u32 %v1330_v11, %v1326_v19  ;;  %v2172_v63 = vunpack.c.l.b16 %v1212_v55  ;;  %v4311_v19 = vld [vmem:[#allocation2 + $0x44] sm:$0x1]  ;;  %v1207_v11 = vld [vmem:[#allocation2 + $0x40] sm:$0xe]  ;;  %vm2291_vm8 = vcmask 785408  }
 0x120   : > { %v2202_v13 = vrot.slane %v2186_v23, 1  ;;  %v1286_v23 = vpack.c.b16 %v1260_v41, %v1259_v12  ;;  %v4304_v62 = vpack.c.b16 %v1638_v0, %v4288_v44  ;;  %v2028_v30 = vor.u32 %v2027_v50, %v2023_v34 }
 0x121   : > { %v1211_v6 = vld [vmem:[#allocation2 + $0x70] sm:$0xe]  ;;  %v2188_v42 = vpack.c.b16 %v1980_v57, %v2172_v63  ;;  %v1797_v34 = vunpack.c.l.b16 %v1156_v25  ;;  %v2167_v50 = vunpack.c.l.b16 %v1207_v11  ;;  %v3487_v11 = vld [vmem:[%s5083_s4 + $0x18] sm:$0xff] }
 0x122   : > { %v4286_v40 = vld [vmem:[#allocation2 + $0x74] sm:$0x1]  ;;  %v2497_v26 = vunpack.c.l.b16 %v2202_v13  ;;  %1513 = vrot.lane.b32.xlu2 %v1493_v15, %s3690_s29  ;;  %v2171_v20 = vunpack.c.l.b16 %v1211_v6  ;;  %v3489_v15 = vld [vmem:[%s5083_s4 + $0x28] sm:$0xff]  ;;  %v1335_v12 = vshll.u32 %v1286_v23, 16  ;;  %v3488_v6 = vld [vmem:[%s5083_s4 + $0x20] sm:$0xff] }
 0x123   : > { %2117 = vrot.lane.b32.xlu1 %v2021_v46, %s3692_s21  ;;  %v5092_v7 = vunpack.c.l.b16 %v4286_v40  ;;  %v1208_v13 = vld [vmem:[#allocation2 + $0x48] sm:$0xe]  ;;  %2726 = vmatpush.bf16.msrb.mxu1 %v3489_v15 }
 0x124   : > { %v2566_v27 = vpack.c.b16 %v2497_v26, %v2494_v3  ;;  %v1573_v3 = vpack.c.b16 %v1557_v52, %v1557_v52  ;;  %v1975_v26 = vunpack.c.l.b16 %v4311_v19  ;;  %v2168_v55 = vunpack.c.l.b16 %v1208_v13 }
 0x125   : > { %v2187_v46 = vpack.c.b16 %v5092_v7, %v2171_v20  ;;  %v1908_v52 = vpack.c.b16 %v4250_v35, %v4250_v35  ;;  %v1337_v15 = vrot.slane %v1335_v12, 1  ;;  %v1813_v35 = vpack.c.b16 %v1637_v43, %v1797_v34  ;;  %v4350_v7 = vld [vmem:[#allocation2 + $0x3c] sm:$0x1] }
 0x126   : > { %3417 = vmatmul.msk.bf16.vlgmr.msra.gmra.mxu3 %vm2209_vm0, %v2566_v27  ;;  %1417 = vrot.lane.b32.xlu0 %v1331_v4, %s3691_s30  ;;  %v1173_v27 = vld [vmem:[#allocation2 + $0x30] sm:$0xf]  ;;  %v1333_v4 = vshrl.u32 %v1286_v23, 16  ;;  %v2183_v51 = vpack.c.b16 %v1975_v26, %v2167_v50  ;;  %v2184_v57 = vpack.c.b16 %v1976_v54, %v2168_v55  ;;  %v4331_v63 = vpop.permute.xlu0 %1409  ;;  %v1214_v55 = vld [vmem:[#allocation2 + $0x88] sm:$0xe] }
 0x127   : > { %v2203_v20 = vrot.slane %v2187_v46, 1  ;;  %2727 = vmatpush.bf16.msrb.mxu1 %v3488_v6  ;;  %v1893_v25 = vunpack.c.l.b16 %v1173_v27  ;;  %v1109_v6 = vld [vmem:[#allocation2 + $0x28] sm:$0xe]  ;;  %v1078_v27 = vld [vmem:[#allocation2 + $0x30] sm:$0xf] }
 0x128   : > { %v2199_v46 = vrot.slane %v2183_v51, 1  ;;  %v2200_v23 = vrot.slane %v2184_v57, 1  ;;  %v1338_v12 = vor.u32 %v1337_v15, %v1333_v4  ;;  %v1213_v4 = vld [vmem:[#allocation2 + $0x80] sm:$0xe]  ;;  %v4346_v15 = vunpack.c.l.b16 %v1126_v45 }
 0x129   : > { %v2500_v13 = vunpack.c.l.b16 %v2203_v20  ;;  %v1909_v54 = vpack.c.b16 %v1893_v25, %v1893_v25  ;;  %v2173_v29 = vunpack.c.l.b16 %v1213_v4 }
 0x12a   : > { %2119 = vrot.lane.b32.xlu2 %v2028_v30, %s3692_s21  ;;  %v2204_v30 = vrot.slane %v2188_v42, 1  ;;  %v2488_v50 = vunpack.c.l.b16 %v2199_v46  ;;  %v2491_v42 = vunpack.c.l.b16 %v2200_v23  ;;  %v1462_v46 = vunpack.c.l.b16 %v1109_v6 }
 0x12b   : > { %1593 = vrot.lane.b32.xlu1 %v1573_v3, %s3692_s21  ;;  %v1798_v3 = vunpack.c.l.b16 %v1157_v21  ;;  %2728 = vmatpush.bf16.msrb.mxu1 %v3487_v11  ;;  %v1829_v21 = vrot.slane %v1813_v35, 1  ;;  %v2174_v23 = vunpack.c.l.b16 %v1214_v55  ;;  %v1174_v11 = vld [vmem:[#allocation2 + $0x38] sm:$0xf]  ;;  %v1639_v35 = vunpack.c.l.b16 %v4350_v7 }
 0x12c   : > { %v2503_v34 = vunpack.c.l.b16 %v2204_v30  ;;  %v2563_v20 = vpack.c.b16 %v2491_v42, %v2488_v50  ;;  %v1110_v30 = vld [vmem:[#allocation2 + $0x30] sm:$0xe]  ;;  %v1478_v55 = vpack.c.b16 %v1260_v41, %v1462_v46  ;;  %v2189_v9 = vpack.c.b16 %v1981_v17, %v2173_v29  ;;  %v4392_v41 = vld [vmem:[#allocation2 + $0x44] sm:$0x1]  ;;  %v4395_v46 = vld [vmem:[#allocation2 + $0x38] sm:$0xf] }
 0x12d   : > { %v1814_v57 = vpack.c.b16 %v1638_v0, %v1798_v3  ;;  %v4358_v0 = vunpack.c.l.b16 %v1174_v11  ;;  %v1463_v45 = vunpack.c.l.b16 %v1110_v30  ;;  %v2190_v6 = vpack.c.b16 %v1982_v48, %v2174_v23  ;;  %v1127_v48 = vld [vmem:[#allocation2 + $0x40] sm:$0xf]  ;;  %v4397_v23 = vld [vmem:[#allocation2 + $0x3c] sm:$0x1] }
 0x12e   : > { %1927 = vrot.lane.b32.xlu0 %v1908_v52, %s3690_s29  ;;  %v1094_v52 = vld [vmem:[#allocation2 + $0x34] sm:$0x1]  ;;  %v2569_v51 = vpack.c.b16 %v2503_v34, %v2500_v13  ;;  %3416 = vmatmul.msk.bf16.gmra.mxu0 %vm2209_vm0, %v2563_v20  ;;  %v4363_v13 = vpack.c.b16 %v1639_v35, %v4346_v15  ;;  %v4370_v3 = vpop.permute.xlu0 %1425  ;;  %v4390_v24 = vunpack.c.l.b16 %v1127_v48  ;;  %v1640_v20 = vunpack.c.l.b16 %v4392_v41 }
 0x12f   : > { %v1262_v18 = vunpack.c.l.b16 %v1094_v52  ;;  %2729 = vmatpush.bf16.msrb.mxu1 %v3486_v16  ;;  %v1830_v42 = vrot.slane %v1814_v57, 1  ;;  %v1990_v56 = vpack.c.b16 %v1974_v10, %v4358_v0  ;;  %v1494_v4 = vrot.slane %v1478_v55, 1  ;;  %v4423_v48 = vld [vmem:[#allocation2 + $0x94] sm:$0x1] }
 0x130   : > { %v2205_v57 = vrot.slane %v2189_v9, 1  ;;  %v4402_v28 = vpack.c.b16 %v1640_v20, %v4390_v24  ;;  %v5115_v19 = vunpack.c.l.b16 %v4397_v23 }
 0x131   : > { %v2039_v10 = vshll.u32 %v1990_v56, 16 }
 0x132   : > { %v4342_v43 = vpop.permute.xlu2 %2135  ;;  %1929 = vrot.lane.b32.xlu2 %v1909_v54, %s3690_s29  ;;  %v1989_v54 = vpack.c.b16 %v1973_v1, %v1893_v25  ;;  %v513_v1 = vld [vmem:[#allocation2 + $0x9c] sm:$0x1]  ;;  %v1574_v25 = vpack.c.b16 %v4288_v44, %v4288_v44  ;;  %v3484_v44 = vld [vmem:[%s5083_s4] sm:$0xff] }
 0x133   : > { %5113 = vst [vmem:[#allocation9_spill] sm:$0xff] %v4342_v43  ;;  %1419 = vrot.lane.b32.xlu1 %v1338_v12, %s3691_s30  ;;  %v1261_v12 = vunpack.c.l.b16 %v1078_v27  ;;  %v514_v50 = vsel %vm3856_vm4, 0, %v513_v1  ;;  %2730 = vmatpush.bf16.msrb.mxu1 %v3485_v37  ;;  %v1479_v27 = vpack.c.b16 %v1262_v18, %v1463_v45  ;;  %v1263_v1 = vunpack.c.l.b16 %v4395_v46 }
 0x134   : > { %v2032_v16 = vshll.u32 %v1989_v54, 16  ;;  %515 = vst [vmem:[#allocation2 + $0x9c] sm:$0x1] %v514_v50  ;;  %v2030_v49 = vshrl.u32 %v1989_v54, 16  ;;  %v3498_v50 = vld [vmem:[%s5083_s4 + $0x70] sm:$0xff]  ;;  %v2041_v9 = vrot.slane %v2039_v10, 1 }
 0x135   : > { %v1287_v34 = vpack.c.b16 %v1262_v18, %v1261_v12  ;;  %v3499_v18 = vld [vmem:[%s5083_s4 + $0x78] sm:$0xff]  ;;  %v1495_v11 = vrot.slane %v1479_v27, 1  ;;  %v1215_v12 = vld [vmem:[#allocation2 + $0x90] sm:$0xe]  ;;  %vm2258_vm4 = vcmask 523264  }
 0x136   : > { %3418 = vmatmul.msk.bf16.gmra.mxu3 %vm2209_vm0, %v2569_v51  ;;  %1849 = vrot.lane.b32.xlu0 %v1829_v21, %s3691_s30  ;;  %v2206_v21 = vrot.slane %v2190_v6, 1  ;;  %v2034_v17 = vrot.slane %v2032_v16, 1  ;;  %v1216_v6 = vld [vmem:[#allocation2 + $0x98] sm:$0xe]  ;;  %v2506_v16 = vunpack.c.l.b16 %v2205_v57  ;;  %v5094_v57 = vunpack.c.l.b16 %v4423_v48 }
 0x137   : > { %v1342_v51 = vshll.u32 %v1287_v34, 16  ;;  %2731 = vmatpush.bf16.msrb.mxu1 %v3484_v44  ;;  %v1340_v30 = vshrl.u32 %v1287_v34, 16  ;;  %2773 = vmatpush.bf16.msra.mxu2 %v3499_v18  ;;  %v2037_v44 = vshrl.u32 %v1990_v56, 16  ;;  %v1132_v10 = vld [vmem:[#allocation2 + $0x78] sm:$0xf]  ;;  %v3497_v18 = vld [vmem:[%s5083_s4 + $0x68] sm:$0xff] }
 0x138   : > { %v2509_v54 = vunpack.c.l.b16 %v2206_v21  ;;  %v2035_v29 = vor.u32 %v2034_v17, %v2030_v49  ;;  %v2176_v49 = vunpack.c.l.b16 %v1216_v6  ;;  %v1158_v6 = vld [vmem:[#allocation2 + $0x38] sm:$0xe] }
 0x139   : > { %v1344_v37 = vrot.slane %v1342_v51, 1  ;;  %v2042_v56 = vor.u32 %v2041_v9, %v2037_v44  ;;  %v1128_v9 = vld [vmem:[#allocation2 + $0x58] sm:$0xf] }
 0x13a   : > { %v4381_v52 = vpop.permute.xlu2 %1587  ;;  %1595 = vrot.lane.b32.xlu2 %v1574_v25, %s3692_s21  ;;  %v5098_v25 = vunpack.c.l.b16 %v4397_v23  ;;  %v2572_v27 = vpack.c.b16 %v2509_v54, %v2506_v16  ;;  %v1575_v54 = vpack.c.b16 %v4346_v15, %v4346_v15  ;;  %v3581_v16 = vld [vmem:[#allocation2] sm:$0xf] }
 0x13b   : > { %1851 = vrot.lane.b32.xlu1 %v1830_v42, %s3691_s30  ;;  %v4410_v45 = vld [vmem:[#allocation2 + $0x9c] sm:$0x1]  ;;  %v1345_v17 = vor.u32 %v1344_v37, %v1340_v30  ;;  %2774 = vmatpush.bf16.msra.mxu2 %v3498_v50  ;;  %v3496_v37 = vld [vmem:[%s5083_s4 + $0x60] sm:$0xff]  ;;  %v4447_v50 = vunpack.c.l.b16 %v1132_v10  ;;  %v2212_v44 = vsel %vm2209_vm0, %v3581_v16, %v4331_v63  ;;  %v1910_v10 = vpack.c.b16 %v4358_v0, %v4358_v0 }
 0x13c   : > { %v5095_v21 = vunpack.c.l.b16 %v4410_v45  ;;  %v1288_v51 = vpack.c.b16 %v5098_v25, %v1263_v1  ;;  %v3495_v0 = vld [vmem:[%s5083_s4 + $0x58] sm:$0xff] }
 0x13e   : > { %1515 = vrot.lane.b32.xlu0 %v1494_v4, %s3690_s29  ;;  %v2175_v4 = vunpack.c.l.b16 %v1215_v12  ;;  %v2192_v30 = vpack.c.b16 %v5095_v21, %v2176_v49  ;;  %v1349_v12 = vshll.u32 %v1288_v51, 16  ;;  %v1347_v63 = vshrl.u32 %v1288_v51, 16 }
 0x13f   : > { %2775 = vmatpush.bf16.msra.mxu2 %v3497_v18  ;;  %v4456_v18 = vunpack.c.l.b16 %v1128_v9  ;;  %v1799_v21 = vunpack.c.l.b16 %v1158_v6  ;;  %v2260_v51 = vsel %vm2258_vm4, %v2212_v44, %v4232_v60  ;;  %v3582_v44 = vld [vmem:[#allocation2 + $0x8] sm:$0xf] }
 0x140   : > { %v4421_v34 = vpop.permute.xlu1 %1585  ;;  %v2208_v49 = vrot.slane %v2192_v30, 1  ;;  %v1351_v16 = vrot.slane %v1349_v12, 1 }
 0x141   : > { %v1815_v9 = vpack.c.b16 %v1639_v35, %v1799_v21  ;;  %v2293_v60 = vsel %vm2291_vm8, %v2260_v51, %v4421_v34  ;;  %v4486_v35 = vunpack.c.l.b16 %v1133_v36 }
 0x142   : > { %v4415_v42 = vpop.permute.xlu2 %1945  ;;  %1517 = vrot.lane.b32.xlu2 %v1495_v11, %s3690_s29  ;;  %v2191_v11 = vpack.c.b16 %v5094_v57, %v2175_v4  ;;  %v1352_v6 = vor.u32 %v1351_v16, %v1347_v63  ;;  %v2468_v51 = vunpack.c.l.b16 %v2293_v60 }
 0x143   : > { %v4417_v55 = vpop.permute.xlu0 %1943  ;;  %2121 = vrot.lane.b32.xlu1 %v2035_v29, %s3692_s21  ;;  %v4440_v29 = vld [vmem:[#allocation2 + $0x5c] sm:$0x1]  ;;  %2776 = vmatpush.bf16.msra.mxu2 %v3496_v37  ;;  %v2515_v37 = vunpack.c.l.b16 %v2208_v49  ;;  %v1831_v16 = vrot.slane %v1815_v9, 1  ;;  %v3492_v9 = vld [vmem:[%s5083_s4 + $0x40] sm:$0xff] }
 0x144   : > { %5114 = vst [vmem:[#allocation10_spill] sm:$0xff] %v4417_v55  ;;  %v2207_v4 = vrot.slane %v2191_v11, 1 }
 0x146   : > { %3419 = vmatmul.msk.bf16.gmra.mxu3 %vm2209_vm0, %v2572_v27  ;;  %1421 = vrot.lane.b32.xlu0 %v1345_v17, %s3691_s30  ;;  %v1175_v27 = vld [vmem:[#allocation2 + $0x40] sm:$0xf]  ;;  %v5097_v17 = vunpack.c.l.b16 %v4440_v29  ;;  %v2512_v12 = vunpack.c.l.b16 %v2207_v4 }
 0x147   : > { %v1895_v30 = vunpack.c.l.b16 %v1175_v27  ;;  %2777 = vmatpush.bf16.msra.mxu2 %v3495_v0  ;;  %v3494_v27 = vld [vmem:[%s5083_s4 + $0x50] sm:$0xff] }
 0x148   : > { %v4466_v11 = vpack.c.b16 %v5097_v17, %v4456_v18  ;;  %v1111_v17 = vld [vmem:[#allocation2 + $0x38] sm:$0xe]  ;;  %v2575_v49 = vpack.c.b16 %v2515_v37, %v2512_v12  ;;  %v1129_v12 = vld [vmem:[#allocation2 + $0x60] sm:$0xf] }
 0x149   : > { %v1464_v63 = vunpack.c.l.b16 %v1111_v17  ;;  %v1160_v17 = vld [vmem:[#allocation2 + $0x58] sm:$0xe] }
 0x14a   : > { %v4445_v1 = vpop.permute.xlu2 %1509  ;;  %2123 = vrot.lane.b32.xlu2 %v2042_v56, %s3692_s21  ;;  %v1159_v56 = vld [vmem:[#allocation2 + $0x40] sm:$0xe]  ;;  %v1801_v14 = vunpack.c.l.b16 %v1160_v17 }
 0x14b   : > { %1597 = vrot.lane.b32.xlu1 %v1575_v54, %s3692_s21  ;;  %v1661_v54 = vpack.c.b16 %v1645_v5, %v4447_v50  ;;  %v1911_v5 = vpack.c.b16 %v1895_v30, %v1895_v30  ;;  %v1800_v61 = vunpack.c.l.b16 %v1159_v56  ;;  %2778 = vmatpush.bf16.msra.mxu2 %v3494_v27 }
 0x14c   : > { %v4453_v15 = vpop.permute.xlu0 %1841 }
 0x14d   : > { %v1412_v57 = vpop.permute.xlu1 %1411  ;;  %v1752_v25 = vshll.u32 %v1661_v54, 16  ;;  %v1816_v34 = vpack.c.b16 %v1640_v20, %v1800_v61  ;;  %v1750_v36 = vshrl.u32 %v1661_v54, 16  ;;  %v3493_v61 = vld [vmem:[%s5083_s4 + $0x48] sm:$0xff]  ;;  %v1177_v20 = vld [vmem:[#allocation2 + $0x60] sm:$0xf] }
 0x14e   : > { %1931 = vrot.lane.b32.xlu0 %v1910_v10, %s3690_s29  ;;  %v2215_v4 = vsel %vm2209_vm0, %v3582_v44, %v1412_v57  ;;  %v1991_v57 = vpack.c.b16 %v1975_v26, %v1895_v30  ;;  %v1480_v26 = vpack.c.b16 %v5115_v19, %v1464_v63  ;;  %v4518_v44 = vld [vmem:[#allocation2 + $0x64] sm:$0x1] }
 0x14f   : > { %v1832_v54 = vrot.slane %v1816_v34, 1  ;;  %2779 = vmatpush.bf16.msra.mxu2 %v3493_v61  ;;  %v1098_v61 = vld [vmem:[#allocation2 + $0x64] sm:$0x1] }
 0x150   : > { %v2046_v30 = vshll.u32 %v1991_v57, 16  ;;  %v2044_v63 = vshrl.u32 %v1991_v57, 16 }
 0x152   : > { %v4479_v10 = vpop.permute.xlu2 %2113  ;;  %1933 = vrot.lane.b32.xlu2 %v1911_v5, %s3690_s29 }
 0x153   : > { %1423 = vrot.lane.b32.xlu1 %v1352_v6, %s3691_s30  ;;  %v1754_v6 = vrot.slane %v1752_v25, 1  ;;  %v1576_v25 = vpack.c.b16 %v4390_v24, %v4390_v24  ;;  %v4516_v24 = vunpack.c.l.b16 %v1177_v20  ;;  %2780 = vmatpush.bf16.msra.mxu2 %v3492_v9 }
 0x154   : > { %v1508_v7 = vpop.permute.xlu0 %1507 }
 0x155   : > { %v2262_v21 = vsel %vm2258_vm4, %v2215_v4, %v1508_v7  ;;  %v1436_v56 = vpop.permute.xlu1 %1435  ;;  %v1755_v37 = vor.u32 %v1754_v6, %v1750_v36  ;;  %v1496_v4 = vrot.slane %v1480_v26, 1  ;;  %v1913_v57 = vpack.c.b16 %v4516_v24, %v4516_v24  ;;  %v4541_v26 = vld [vmem:[#allocation2 + $0x60] sm:$0xf] }
 0x156   : > { %v2295_v0 = vsel %vm2291_vm8, %v2262_v21, %v4381_v52  ;;  %3420 = vmatmul.msk.bf16.gmra.mxu3 %vm2209_vm0, %v2575_v49  ;;  %1853 = vrot.lane.b32.xlu0 %v1831_v16, %s3691_s30  ;;  %v1662_v52 = vpack.c.b16 %v1646_v58, %v4486_v35  ;;  %v4507_v58 = vunpack.c.l.b16 %v1129_v12  ;;  %v5100_v21 = vunpack.c.l.b16 %v4518_v44  ;;  %v1113_v12 = vld [vmem:[#allocation2 + $0x58] sm:$0xe] }
 0x157   : > { %v2471_v5 = vunpack.c.l.b16 %v2295_v0  ;;  %v2048_v16 = vrot.slane %v2046_v30, 1  ;;  %v1097_v0 = vld [vmem:[#allocation2 + $0x5c] sm:$0x1]  ;;  %v1269_v9 = vunpack.c.l.b16 %v4541_v26 }
 0x158   : > { %v1759_v60 = vshll.u32 %v1662_v52, 16  ;;  %v4535_v6 = vpack.c.b16 %v5100_v21, %v4507_v58  ;;  %v1757_v20 = vshrl.u32 %v1662_v52, 16  ;;  %v1668_v52 = vshll.u32 %v3989_v2, 16 }
 0x159   : > { %v2552_v41 = vpack.c.b16 %v2471_v5, %v2468_v51  ;;  %v4528_v51 = vld [vmem:[#allocation2 + $0x58] sm:$0xf]  ;;  %v5116_v5 = vunpack.c.l.b16 %v4440_v29  ;;  %v2049_v29 = vor.u32 %v2048_v16, %v2044_v63 }
 0x15a   : > { %1599 = vrot.lane.b32.xlu2 %v1576_v25, %s3692_s21  ;;  %v4514_v23 = vpop.permute.xlu2 %2115  ;;  %v1761_v17 = vrot.slane %v1759_v60, 1  ;;  %v1267_v19 = vunpack.c.l.b16 %v4528_v51  ;;  %v3583_v25 = vld [vmem:[#allocation2 + $0x78] sm:$0xf] }
 0x15b   : > { %2732 = vmatmul.bf16.vlgmr.msrb.gmra.mxu1 %v2552_v41  ;;  %1855 = vrot.lane.b32.xlu1 %v1832_v54, %s3691_s30  ;;  %v1817_v36 = vpack.c.b16 %v5116_v5, %v1801_v14  ;;  %v2251_v54 = vsel %vm2209_vm0, %v3583_v25, %v1436_v56  ;;  %v1270_v14 = vunpack.c.l.b16 %v1098_v61  ;;  %v1114_v5 = vld [vmem:[#allocation2 + $0x60] sm:$0xe]  ;;  %v1577_v25 = vpack.c.b16 %v4456_v18, %v4456_v18 }
 0x15c   : > { %v1866_v27 = vpop.permute.xlu0 %1865 }
 0x15d   : > { %v2362_v7 = vsel %vm2209_vm0, %v1755_v37, %v1866_v27  ;;  %v4522_v49 = vpop.permute.xlu1 %1921  ;;  %v1833_v41 = vrot.slane %v1817_v36, 1  ;;  %v1466_v37 = vunpack.c.l.b16 %v1113_v12  ;;  %v1762_v27 = vor.u32 %v1761_v17, %v1757_v20  ;;  %v4558_v36 = vld [vmem:[#allocation2 + $0x94] sm:$0x1] }
 0x15e   : > { %v4526_v34 = vsel %vm2258_vm4, %v2362_v7, %v4415_v42  ;;  %1519 = vrot.lane.b32.xlu0 %v1496_v4, %s3690_s29  ;;  %v1268_v42 = vunpack.c.l.b16 %v1097_v0  ;;  %v1178_v7 = vld [vmem:[#allocation2 + $0x68] sm:$0xf]  ;;  %v1578_v0 = vpack.c.b16 %v4507_v58, %v4507_v58  ;;  %v1291_v12 = vpack.c.b16 %v1270_v14, %v1269_v9  ;;  %v4568_v58 = vld [vmem:[#allocation2 + $0x6c] sm:$0x1] }
 0x15f   : > { %v4561_v61 = vunpack.c.l.b16 %v1178_v7  ;;  %v5119_v9 = vunpack.c.l.b16 %v4255_v39 }
 0x160   : > { %v1290_v4 = vpack.c.b16 %v1268_v42, %v1267_v19  ;;  %v1482_v17 = vpack.c.b16 %v1268_v42, %v1466_v37  ;;  %v5099_v19 = vunpack.c.l.b16 %v4558_v36  ;;  %v1675_v37 = vshll.u32 %v4115_v47, 16 }
 0x161   : > { %v1370_v18 = vshll.u32 %v1291_v12, 16  ;;  %v1994_v7 = vpack.c.b16 %v5119_v9, %v4561_v61  ;;  %v1161_v9 = vld [vmem:[#allocation2 + $0x60] sm:$0xe] }
 0x162   : > { %1937 = vrot.lane.b32.xlu2 %v1913_v57, %s3690_s29  ;;  %v1135_v57 = vld [vmem:[#allocation2 + $0x90] sm:$0xf] }
 0x163   : > { %2125 = vrot.lane.b32.xlu1 %v2049_v29, %s3692_s21  ;;  %v1363_v29 = vshll.u32 %v1290_v4, 16  ;;  %v4564_v20 = vunpack.c.l.b16 %v1135_v57  ;;  %v2067_v55 = vshll.u32 %v1994_v7, 16 }
 0x164   : > { %v1532_v30 = vpop.permute.xlu0 %1531  ;;  %v4551_v63 = vpop.permute.xlu2 %2139 }
 0x165   : > { %v4548_v60 = vsel %vm2258_vm4, %v2251_v54, %v1532_v30  ;;  %v1868_v56 = vpop.permute.xlu1 %1867  ;;  %v1467_v54 = vunpack.c.l.b16 %v1114_v5  ;;  %v4570_v30 = vld [vmem:[#allocation2 + $0x8c] sm:$0x1]  ;;  %v4575_v42 = vpack.c.b16 %v5099_v19, %v4564_v20  ;;  %v1130_v5 = vld [vmem:[#allocation2 + $0x68] sm:$0xf]  ;;  %v1365_v43 = vrot.slane %v1363_v29, 1 }
 0x166   : > { %5117 = vst [vmem:[#allocation11_spill] sm:$0xff] %v4548_v60  ;;  %v4554_v16 = vsel %vm2209_vm0, %v1762_v27, %v1868_v56  ;;  %1857 = vrot.lane.b32.xlu0 %v1833_v41, %s3691_s30  ;;  %v1134_v27 = vld [vmem:[#allocation2 + $0x88] sm:$0xf]  ;;  %v1670_v56 = vrot.slane %v1668_v52, 1  ;;  %v1498_v41 = vrot.slane %v1482_v17, 1  ;;  %v5102_v52 = vunpack.c.l.b16 %v4568_v58 }
 0x167   : > { %5118 = vst [vmem:[#allocation12_spill] sm:$0xff] %v4575_v42  ;;  %v4584_v57 = vunpack.c.l.b16 %v1130_v5  ;;  %v4587_v21 = vunpack.c.l.b16 %v1134_v27  ;;  %v1483_v42 = vpack.c.b16 %v1270_v14, %v1467_v54  ;;  %v1361_v60 = vshrl.u32 %v1290_v4, 16 }
 0x168   : > { %v1673_v14 = vshrl.u32 %v4115_v47, 16  ;;  %v1368_v4 = vshrl.u32 %v1291_v12, 16  ;;  %v1372_v29 = vrot.slane %v1370_v18, 1  ;;  %v2065_v47 = vshrl.u32 %v1994_v7, 16  ;;  %v1131_v7 = vld [vmem:[#allocation2 + $0x70] sm:$0xf] }
 0x169   : > { %v4599_v5 = vpack.c.b16 %v5102_v52, %v4584_v57  ;;  %v1499_v52 = vrot.slane %v1483_v42, 1  ;;  %v2069_v12 = vrot.slane %v2067_v55, 1 }
 0x16a   : > { %1603 = vrot.lane.b32.xlu2 %v1578_v0, %s3692_s21  ;;  %v1666_v0 = vshrl.u32 %v3989_v2, 16  ;;  %v1677_v2 = vrot.slane %v1675_v37, 1  ;;  %v1373_v18 = vor.u32 %v1372_v29, %v1368_v4  ;;  %v1564_v29 = vunpack.c.l.b16 %v1131_v7 }
 0x16b   : > { %1601 = vrot.lane.b32.xlu1 %v1577_v25, %s3692_s21  ;;  %5120 = vst [vmem:[#allocation13_spill] sm:$0xff] %v4599_v5  ;;  %v1366_v5 = vor.u32 %v1365_v43, %v1361_v60  ;;  %v2070_v55 = vor.u32 %v2069_v12, %v2065_v47  ;;  %v1099_v47 = vld [vmem:[#allocation2 + $0x6c] sm:$0x1]  ;;  %v4637_v12 = vld [vmem:[#allocation2 + $0x68] sm:$0xf] }
 0x16c   : > { %v4590_v25 = vpop.permute.xlu2 %1925  ;;  %v1671_v27 = vor.u32 %v1670_v56, %v1666_v0  ;;  %v1844_v19 = vpop.permute.xlu0 %1843  ;;  %v1802_v56 = vunpack.c.l.b16 %v1161_v9  ;;  %v1678_v37 = vor.u32 %v1677_v2, %v1673_v14 }
 0x16d   : > { %v2138_v17 = vpop.permute.xlu1 %2137 }
 0x16e   : > { %v4594_v39 = vsel %vm2291_vm8, %v4526_v34, %v2138_v17  ;;  %1523 = vrot.lane.b32.xlu0 %v1498_v41, %s3690_s29  ;;  %v5121_v34 = vunpack.c.l.b16 %v4570_v30  ;;  %v2326_v17 = vsel %vm2209_vm0, %v1671_v27, %v4453_v15  ;;  %v2329_v0 = vsel %vm2209_vm0, %v1678_v37, %v1844_v19  ;;  %v1162_v27 = vld [vmem:[#allocation2 + $0x68] sm:$0xe] }
 0x16f   : > { %v2373_v41 = vsel %vm2258_vm4, %v2326_v17, %v4522_v49  ;;  %v5123_v15 = vunpack.c.l.b16 %v4518_v44  ;;  %v5124_v49 = vunpack.c.l.b16 %v4221_v59  ;;  %v1179_v44 = vld [vmem:[#allocation2 + $0x70] sm:$0xf]  ;;  %v1914_v59 = vpack.c.b16 %v4561_v61, %v4561_v61 }
 0x170   : > { %v4606_v54 = vpack.c.b16 %v5121_v34, %v4587_v21  ;;  %v2405_v60 = vsel %vm2291_vm8, %v2373_v41, %v4479_v10 }
 0x171   : > { %v1818_v43 = vpack.c.b16 %v5123_v15, %v1802_v56  ;;  %v1993_v42 = vpack.c.b16 %v5124_v49, %v4516_v24  ;;  %v2469_v9 = vunpack.c.l.b16 %v2405_v60  ;;  %v4632_v24 = vunpack.c.l.b16 %v1179_v44  ;;  %v1115_v60 = vld [vmem:[#allocation2 + $0x68] sm:$0xe] }
 0x172   : > { %5122 = vst [vmem:[#allocation14_spill] sm:$0xff] %v4606_v54  ;;  %1525 = vrot.lane.b32.xlu2 %v1499_v52, %s3690_s29  ;;  %v5125_v15 = vunpack.c.l.b16 %v4568_v58  ;;  %v1272_v49 = vunpack.c.l.b16 %v1099_v47  ;;  %v1116_v58 = vld [vmem:[#allocation2 + $0x70] sm:$0xe]  ;;  %v1579_v47 = vpack.c.b16 %v4584_v57, %v4584_v57 }
 0x173   : > { %1427 = vrot.lane.b32.xlu1 %v1366_v5, %s3691_s30  ;;  %v1834_v14 = vrot.slane %v1818_v43, 1  ;;  %v2060_v10 = vshll.u32 %v1993_v42, 16  ;;  %v2058_v41 = vshrl.u32 %v1993_v42, 16  ;;  %v1915_v61 = vpack.c.b16 %v4632_v24, %v4632_v24 }
 0x174   : > { %v4615_v34 = vpop.permute.xlu2 %1591  ;;  %v1271_v42 = vunpack.c.l.b16 %v4637_v12 }
 0x175   : > { %v1924_v54 = vpop.permute.xlu1 %1923  ;;  %v2062_v37 = vrot.slane %v2060_v10, 1  ;;  %v1580_v10 = vpack.c.b16 %v1564_v29, %v1564_v29 }
 0x176   : > { %v2375_v52 = vsel %vm2258_vm4, %v2329_v0, %v1924_v54  ;;  %1429 = vrot.lane.b32.xlu0 %v1373_v18, %s3691_s30  ;;  %v4634_v54 = vld [vmem:[#allocation2 + $0x74] sm:$0x1] }
 0x177   : > { %v2407_v19 = vsel %vm2291_vm8, %v2375_v52, %v4514_v23  ;;  %v1803_v23 = vunpack.c.l.b16 %v1162_v27  ;;  %v1644_v17 = vunpack.c.l.b16 %v4634_v54  ;;  %v451_v27 = vld [vmem:[#allocation2 + $0x98] sm:$0x1]  ;;  %v4699_v54 = vld [vmem:[#allocation2 + $0x80] sm:$0xf] }
 0x178   : > { %v2472_v5 = vunpack.c.l.b16 %v2407_v19  ;;  %v1414_v2 = vpop.permute.xlu0 %1413 }
 0x179   : > { %v4643_v0 = vpack.c.b16 %v1644_v17, %v1564_v29  ;;  %v1819_v43 = vpack.c.b16 %v5125_v15, %v1803_v23  ;;  %v1469_v23 = vunpack.c.l.b16 %v1116_v58 }
 0x17a   : > { %v2553_v4 = vpack.c.b16 %v2472_v5, %v2469_v9  ;;  %2131 = vrot.lane.b32.xlu2 %v2070_v55, %s3692_s21  ;;  %v2063_v55 = vor.u32 %v2062_v37, %v2058_v41  ;;  %v1468_v9 = vunpack.c.l.b16 %v1115_v60  ;;  %v1292_v5 = vpack.c.b16 %v1272_v49, %v1271_v42 }
 0x17b   : > { %1859 = vrot.lane.b32.xlu1 %v1834_v14, %s3691_s30  ;;  %v1835_v7 = vrot.slane %v1819_v43, 1  ;;  %v452_v14 = vsel %vm3848_vm2, 0, %v451_v27  ;;  %v4666_v43 = vld [vmem:[#allocation2 + $0x70] sm:$0xf] }
 0x17c   : > { %2781 = vmatmul.bf16.vlgmr.msra.gmra.mxu2 %v2553_v4  ;;  %v4639_v18 = vpop.permute.xlu2 %1513  ;;  %v1484_v4 = vpack.c.b16 %v1272_v49, %v1468_v9  ;;  %453 = vst [vmem:[#allocation2 + $0x98] sm:$0x1] %v452_v14  ;;  %v1377_v41 = vshll.u32 %v1292_v5, 16  ;;  %v1375_v60 = vshrl.u32 %v1292_v5, 16  ;;  %v1273_v57 = vunpack.c.l.b16 %v4666_v43  ;;  %v1163_v9 = vld [vmem:[#allocation2 + $0x70] sm:$0xe] }
 0x17d   : > { %v1590_v56 = vpop.permute.xlu1 %1589 }
 0x17e   : > { %1939 = vrot.lane.b32.xlu0 %v1914_v59, %s3690_s29  ;;  %v1100_v59 = vld [vmem:[#allocation2 + $0x74] sm:$0x1]  ;;  %v1500_v53 = vrot.slane %v1484_v4, 1  ;;  %v1379_v49 = vrot.slane %v1377_v41, 1  ;;  %v1804_v41 = vunpack.c.l.b16 %v1163_v9  ;;  %v1680_v9 = vshrl.u32 %v4204_v32, 16 }
 0x17f   : > { %v1274_v15 = vunpack.c.l.b16 %v1100_v59  ;;  %v3585_v59 = vld [vmem:[#allocation2 + $0x18] sm:$0xf] }
 0x180   : > { %v1948_v52 = vpop.permute.xlu0 %1947  ;;  %v1380_v14 = vor.u32 %v1379_v49, %v1375_v60 }
 0x181   : > { %v4653_v19 = vsel %vm2258_vm4, %v4554_v16, %v1948_v52  ;;  %v1485_v29 = vpack.c.b16 %v1274_v15, %v1469_v23  ;;  %v3584_v52 = vld [vmem:[#allocation2 + $0x10] sm:$0xf] }
 0x182   : > { %1941 = vrot.lane.b32.xlu2 %v1915_v61, %s3690_s29  ;;  %v1166_v61 = vld [vmem:[#allocation2 + $0x88] sm:$0xe] }
 0x183   : > { %2129 = vrot.lane.b32.xlu1 %v2063_v55, %s3692_s21  ;;  %v1807_v42 = vunpack.c.l.b16 %v1166_v61  ;;  %v2218_v55 = vsel %vm2209_vm0, %v3584_v52, %v1414_v2  ;;  %v1501_v27 = vrot.slane %v1485_v29, 1  ;;  %v1682_v52 = vshll.u32 %v4204_v32, 16  ;;  %v1184_v29 = vld [vmem:[#allocation2 + $0x98] sm:$0xf] }
 0x184   : > { %v4660_v16 = vpop.permute.xlu2 %2119  ;;  %v2264_v58 = vsel %vm2258_vm4, %v2218_v55, %v4445_v1 }
 0x185   : > { %v1416_v44 = vpop.permute.xlu1 %1415  ;;  %v2297_v4 = vsel %vm2291_vm8, %v2264_v58, %v1590_v56  ;;  %v1684_v58 = vrot.slane %v1682_v52, 1  ;;  %v1277_v52 = vunpack.c.l.b16 %v4699_v54 }
 0x186   : > { %1861 = vrot.lane.b32.xlu0 %v1835_v7, %s3691_s30  ;;  %v2221_v2 = vsel %vm2209_vm0, %v3585_v59, %v1416_v44  ;;  %v1687_v59 = vshrl.u32 %v4211_v38, 16 }
 0x187   : > { %v1685_v32 = vor.u32 %v1684_v58, %v1680_v9 }
 0x188   : > { %v4662_v37 = vpop.permute.xlu0 %1845 }
 0x18a   : > { %1607 = vrot.lane.b32.xlu2 %v1580_v10, %s3692_s21  ;;  %v5126_v10 = vunpack.c.l.b16 %v4570_v30  ;;  %v2474_v30 = vunpack.c.l.b16 %v2297_v4  ;;  %v1102_v4 = vld [vmem:[#allocation2 + $0x84] sm:$0x1] }
 0x18b   : > { %1605 = vrot.lane.b32.xlu1 %v1579_v47, %s3692_s21  ;;  %v1293_v47 = vpack.c.b16 %v1274_v15, %v1273_v57  ;;  %v1820_v15 = vpack.c.b16 %v1644_v17, %v1804_v41 }
 0x18c   : > { %v1823_v5 = vpack.c.b16 %v5126_v10, %v1807_v42  ;;  %v4681_v61 = vpop.permute.xlu2 %1929  ;;  %v5127_v42 = vunpack.c.l.b16 %v4286_v40 }
 0x18d   : > { %v4671_v7 = vpop.permute.xlu1 %1847  ;;  %v1384_v49 = vshll.u32 %v1293_v47, 16  ;;  %v1836_v10 = vrot.slane %v1820_v15, 1  ;;  %v1382_v40 = vshrl.u32 %v1293_v47, 16  ;;  %v1278_v47 = vunpack.c.l.b16 %v1102_v4 }
 0x18e   : > { %1527 = vrot.lane.b32.xlu0 %v1500_v53, %s3690_s29  ;;  %v1839_v44 = vrot.slane %v1823_v5, 1  ;;  %v1995_v55 = vpack.c.b16 %v5127_v42, %v4632_v24 }
 0x18f   : > { %v1386_v24 = vrot.slane %v1384_v49, 1  ;;  %v1295_v42 = vpack.c.b16 %v1278_v47, %v1277_v52 }
 0x190   : > { %v1512_v23 = vpop.permute.xlu0 %1511  ;;  %v2074_v5 = vshll.u32 %v1995_v55, 16 }
 0x191   : > { %v2266_v53 = vsel %vm2258_vm4, %v2221_v2, %v1512_v23  ;;  %v5128_v23 = vunpack.c.l.b16 %v4410_v45  ;;  %v1398_v4 = vshll.u32 %v1295_v42, 16 }
 0x192   : > { %1529 = vrot.lane.b32.xlu2 %v1501_v27, %s3690_s29  ;;  %v2299_v1 = vsel %vm2291_vm8, %v2266_v53, %v4615_v34  ;;  %v1689_v27 = vshll.u32 %v4211_v38, 16  ;;  %v1904_v34 = vunpack.c.l.b16 %v1184_v29  ;;  %v1183_v53 = vld [vmem:[#allocation2 + $0x90] sm:$0xf]  ;;  %v2072_v38 = vshrl.u32 %v1995_v55, 16 }
 0x193   : > { %1431 = vrot.lane.b32.xlu1 %v1380_v14, %s3691_s30  ;;  %v2477_v56 = vunpack.c.l.b16 %v2299_v1  ;;  %v1582_v14 = vpack.c.b16 %v4486_v35, %v4486_v35  ;;  %v2332_v1 = vsel %vm2209_vm0, %v1685_v32, %v4662_v37  ;;  %v2076_v29 = vrot.slane %v2074_v5, 1 }
 0x194   : > { %v1691_v2 = vrot.slane %v1689_v27, 1  ;;  %v2000_v35 = vpack.c.b16 %v5128_v23, %v1904_v34  ;;  %v4708_v41 = vpop.permute.xlu2 %1595  ;;  %v1903_v15 = vunpack.c.l.b16 %v1183_v53  ;;  %v2377_v45 = vsel %vm2258_vm4, %v2332_v1, %v4590_v25  ;;  %v1119_v1 = vld [vmem:[#allocation2 + $0x88] sm:$0xe] }
 0x195   : > { %v2118_v60 = vpop.permute.xlu1 %2117  ;;  %v2555_v57 = vpack.c.b16 %v2477_v56, %v2474_v30  ;;  %v1387_v30 = vor.u32 %v1386_v24, %v1382_v40  ;;  %v2077_v27 = vor.u32 %v2076_v29, %v2072_v38  ;;  %v1103_v38 = vld [vmem:[#allocation2 + $0x8c] sm:$0x1] }
 0x196   : > { %1869 = vrot.lane.b32.xlu0 %v1839_v44, %s3691_s30  ;;  %v1692_v44 = vor.u32 %v1691_v2, %v1687_v59  ;;  %v2109_v49 = vshll.u32 %v2000_v35, 16  ;;  %v2409_v9 = vsel %vm2291_vm8, %v2377_v45, %v2118_v60  ;;  %v1919_v37 = vpack.c.b16 %v1903_v15, %v1903_v15  ;;  %v1118_v60 = vld [vmem:[#allocation2 + $0x80] sm:$0xe]  ;;  %v1167_v2 = vld [vmem:[#allocation2 + $0x90] sm:$0xe] }
 0x197   : > { %2737 = vmatmul.bf16.gmra.mxu1 %v2555_v57  ;;  %v2107_v25 = vshrl.u32 %v2000_v35, 16  ;;  %v2475_v24 = vunpack.c.l.b16 %v2409_v9  ;;  %v1471_v53 = vunpack.c.l.b16 %v1118_v60  ;;  %v1400_v35 = vrot.slane %v1398_v4, 1 }
 0x198   : > { %v4701_v17 = vpop.permute.xlu0 %1417  ;;  %v2335_v57 = vsel %vm2209_vm0, %v1692_v44, %v4671_v7  ;;  %v2111_v40 = vrot.slane %v2109_v49, 1  ;;  %v1808_v52 = vunpack.c.l.b16 %v1167_v2  ;;  %v1472_v44 = vunpack.c.l.b16 %v1119_v1  ;;  %v3586_v49 = vld [vmem:[#allocation2 + $0x20] sm:$0xf] }
 0x199   : > { %v1487_v29 = vpack.c.b16 %v1278_v47, %v1471_v53  ;;  %v2224_v45 = vsel %vm2209_vm0, %v3586_v49, %v4701_v17  ;;  %v1696_v60 = vshll.u32 %v4284_v33, 16 }
 0x19a   : > { %1611 = vrot.lane.b32.xlu2 %v1582_v14, %s3692_s21  ;;  %v1920_v14 = vpack.c.b16 %v1904_v34, %v1904_v34  ;;  %v2112_v23 = vor.u32 %v2111_v40, %v2107_v25  ;;  %v2268_v47 = vsel %vm2258_vm4, %v2224_v45, %v4639_v18 }
 0x19b   : > { %1863 = vrot.lane.b32.xlu1 %v1836_v10, %s3691_s30  ;;  %v1698_v1 = vrot.slane %v1696_v60, 1 }
 0x19c   : > { %v4724_v32 = vpop.permute.xlu2 %1517 }
 0x19d   : > { %v1594_v56 = vpop.permute.xlu1 %1593 }
 0x19e   : > { %1433 = vrot.lane.b32.xlu0 %v1387_v30, %s3691_s30  ;;  %v1396_v30 = vshrl.u32 %v1295_v42, 16  ;;  %v2301_v40 = vsel %vm2291_vm8, %v2268_v47, %v1594_v56 }
 0x1a0   : > { %v1928_v58 = vpop.permute.xlu0 %1927 }
 0x1a1   : > { %v2379_v55 = vsel %vm2258_vm4, %v2335_v57, %v1928_v58  ;;  %v1401_v57 = vor.u32 %v1400_v35, %v1396_v30  ;;  %v5129_v58 = vunpack.c.l.b16 %v4558_v36  ;;  %v3587_v36 = vld [vmem:[#allocation2 + $0x28] sm:$0xf]  ;;  %v1703_v30 = vshll.u32 %v4304_v62, 16 }
 0x1a2   : > { %1949 = vrot.lane.b32.xlu2 %v1919_v37, %s3690_s29  ;;  %v2411_v10 = vsel %vm2291_vm8, %v2379_v55, %v4660_v16  ;;  %v1581_v16 = vpack.c.b16 %v4447_v50, %v4447_v50  ;;  %v5130_v37 = vunpack.c.l.b16 %v4423_v48  ;;  %v4737_v55 = vld [vmem:[#allocation2 + $0x88] sm:$0xf] }
 0x1a3   : > { %2133 = vrot.lane.b32.xlu1 %v2077_v27, %s3692_s21  ;;  %v2478_v5 = vunpack.c.l.b16 %v2411_v10  ;;  %v1824_v50 = vpack.c.b16 %v5129_v58, %v1808_v52  ;;  %v1503_v10 = vrot.slane %v1487_v29, 1  ;;  %v1279_v17 = vunpack.c.l.b16 %v4737_v55 }
 0x1a4   : > { %v1999_v27 = vpack.c.b16 %v5130_v37, %v1903_v15  ;;  %v2124_v42 = vpop.permute.xlu2 %2123  ;;  %v1694_v52 = vshrl.u32 %v4284_v33, 16  ;;  %v1705_v58 = vrot.slane %v1703_v30, 1 }
 0x1a5   : > { %v1420_v7 = vpop.permute.xlu1 %1419  ;;  %v2556_v59 = vpack.c.b16 %v2478_v5, %v2475_v24  ;;  %v1840_v15 = vrot.slane %v1824_v50, 1 }
 0x1a6   : > { %1951 = vrot.lane.b32.xlu0 %v1920_v14, %s3690_s29  ;;  %v1280_v14 = vunpack.c.l.b16 %v1103_v38  ;;  %v2227_v24 = vsel %vm2209_vm0, %v3587_v36, %v1420_v7  ;;  %v2102_v5 = vshll.u32 %v1999_v27, 16  ;;  %v2100_v53 = vshrl.u32 %v1999_v27, 16 }
 0x1a7   : > { %2786 = vmatmul.bf16.gmra.mxu2 %v2556_v59  ;;  %v2480_v59 = vunpack.c.l.b16 %v2301_v40  ;;  %v1699_v45 = vor.u32 %v1698_v1, %v1694_v52 }
 0x1a8   : > { %v1850_v34 = vpop.permute.xlu0 %1849  ;;  %v1488_v25 = vpack.c.b16 %v1280_v14, %v1472_v44  ;;  %v2104_v7 = vrot.slane %v2102_v5, 1 }
 0x1a9   : > { %v2338_v33 = vsel %vm2209_vm0, %v1699_v45, %v1850_v34 }
 0x1aa   : > { %2143 = vrot.lane.b32.xlu2 %v2112_v23, %s3692_s21  ;;  %v1504_v56 = vrot.slane %v1488_v25, 1  ;;  %v2105_v29 = vor.u32 %v2104_v7, %v2100_v53  ;;  %v3588_v53 = vld [vmem:[#allocation2 + $0x30] sm:$0xf] }
 0x1ab   : > { %1609 = vrot.lane.b32.xlu1 %v1581_v16, %s3692_s21  ;;  %v1296_v16 = vpack.c.b16 %v1280_v14, %v1279_v17 }
 0x1ac   : > { %v1934_v49 = vpop.permute.xlu2 %1933 }
 0x1ad   : > { %v1852_v9 = vpop.permute.xlu1 %1851  ;;  %v1405_v44 = vshll.u32 %v1296_v16, 16  ;;  %v1403_v37 = vshrl.u32 %v1296_v16, 16 }
 0x1ae   : > { %1437 = vrot.lane.b32.xlu0 %v1401_v57, %s3691_s30  ;;  %v1701_v57 = vshrl.u32 %v4304_v62, 16 }
 0x1af   : > { %v1407_v27 = vrot.slane %v1405_v44, 1 }
 0x1b0   : > { %v1516_v48 = vpop.permute.xlu0 %1515  ;;  %v1706_v14 = vor.u32 %v1705_v58, %v1701_v57 }
 0x1b1   : > { %v2270_v4 = vsel %vm2258_vm4, %v2227_v24, %v1516_v48  ;;  %v1408_v62 = vor.u32 %v1407_v27, %v1403_v37  ;;  %v1717_v48 = vshll.u32 %v4402_v28, 16 }
 0x1b2   : > { %1533 = vrot.lane.b32.xlu2 %v1503_v10, %s3690_s29  ;;  %v2303_v18 = vsel %vm2291_vm8, %v2270_v4, %v4708_v41  ;;  %v1584_v41 = vpack.c.b16 %v4564_v20, %v4564_v20  ;;  %v2381_v20 = vsel %vm2258_vm4, %v2338_v33, %v4681_v61  ;;  %v2341_v47 = vsel %vm2209_vm0, %v1706_v14, %v1852_v9 }
 0x1b3   : > { %1871 = vrot.lane.b32.xlu1 %v1840_v15, %s3691_s30  ;;  %v2483_v2 = vunpack.c.l.b16 %v2303_v18  ;;  %v1710_v61 = vshll.u32 %v4363_v13, 16  ;;  %v1715_v9 = vshrl.u32 %v4402_v28, 16  ;;  %v1719_v4 = vrot.slane %v1717_v48, 1 }
 0x1b4   : > { %v1600_v34 = vpop.permute.xlu2 %1599  ;;  %v1583_v18 = vpack.c.b16 %v4587_v21, %v4587_v21 }
 0x1b5   : > { %v2122_v23 = vpop.permute.xlu1 %2121  ;;  %v2558_v35 = vpack.c.b16 %v2483_v2, %v2480_v59  ;;  %v1712_v59 = vrot.slane %v1710_v61, 1  ;;  %v1720_v2 = vor.u32 %v1719_v4, %v1715_v9 }
 0x1b6   : > { %1535 = vrot.lane.b32.xlu0 %v1504_v56, %s3690_s29  ;;  %v2413_v10 = vsel %vm2291_vm8, %v2381_v20, %v2122_v23  ;;  %v2431_v56 = vsel %vm2291_vm8, %v4653_v19, %v4551_v63  ;;  %v2505_v23 = vunpack.c.l.b16 %v4594_v39  ;;  %s3208_s29 = sshll.u32 %s3205_s12, 4  ;;  %s3209_s29 = int_to_ptr.hbm [resolvable:$true] %s3208_s29 }
 0x1b7   : > { %2742 = vmatmul.bf16.gmra.mxu1 %v2558_v35  ;;  %v2481_v36 = vunpack.c.l.b16 %v2413_v10  ;;  %v2508_v16 = vunpack.c.l.b16 %v2431_v56  ;;  %v3589_v10 = vld [vmem:[#allocation2 + $0x50] sm:$0xf] }
 0x1b8   : > { %v1422_v38 = vpop.permute.xlu0 %1421 }
 0x1b9   : > { %v2230_v28 = vsel %vm2209_vm0, %v3588_v53, %v1422_v38  ;;  %v4780_v52 = vpack.c.b16 %v2508_v16, %v2505_v23  ;;  %v3503_v23 = vld [vmem:[%s5086_s7 + $0x8] sm:$0xff]  ;;  %v3502_v16 = vld [vmem:[%s5086_s7] sm:$0xff] }
 0x1ba   : > { %1615 = vrot.lane.b32.xlu2 %v1584_v41, %s3692_s21  ;;  %3013 = vmatpush.bf16.msrb.mxu3 %v3503_v23 }
 0x1bb   : > { %2141 = vrot.lane.b32.xlu1 %v2105_v29, %s3692_s21 }
 0x1bc   : > { %v1938_v35 = vpop.permute.xlu2 %1937 }
 0x1bd   : > { %v1598_v50 = vpop.permute.xlu1 %1597 }
 0x1be   : > { %3014 = vmatpush.bf16.msrb.mxu3 %v3502_v16 }
 0x1c0   : > { %v1932_v25 = vpop.permute.xlu0 %1931 }
 0x1c1   : > { %v2383_v17 = vsel %vm2258_vm4, %v2341_v47, %v1932_v25  ;;  %v2236_v25 = vsel %vm2209_vm0, %v3589_v10, %v4370_v3  ;;  %v5131_v10 = vld [vmem:[#allocation13_spill] sm:$0xff] }
 0x1c2   : > { %v2415_v40 = vsel %vm2291_vm8, %v2383_v17, %v2124_v42  ;;  %v1708_v42 = vshrl.u32 %v4363_v13, 16  ;;  %v2272_v13 = vsel %vm2258_vm4, %v2230_v28, %v4724_v32  ;;  %v1731_v17 = vshll.u32 %v4535_v6, 16 }
 0x1c3   : > { %1439 = vrot.lane.b32.xlu1 %v1408_v62, %s3691_s30  ;;  %v2484_v24 = vunpack.c.l.b16 %v2415_v40  ;;  %v2305_v30 = vsel %vm2291_vm8, %v2272_v13, %v1598_v50  ;;  %s3634_s30 = sshra.s32 %s3209_s29, 4  ;;  %s3635_s30 = int_to_ptr.hbm [resolvable:$true] %s3634_s30 }
 0x1c4   : > { %v1713_v1 = vor.u32 %v1712_v59, %v1708_v42  ;;  %v2486_v44 = vunpack.c.l.b16 %v2305_v30  ;;  %v1604_v37 = vpop.permute.xlu2 %1603  ;;  %v1733_v61 = vrot.slane %v1731_v17, 1  ;;  %p3641_p3 = scmp.lt.s32.totalorder %s3635_s30, %s5089_s10 }
 0x1c5   : > { %v1424_v15 = vpop.permute.xlu1 %1423  ;;  %v2559_v5 = vpack.c.b16 %v2484_v24, %v2481_v36  ;;  %v1724_v24 = vshll.u32 %v4466_v11, 16 }
 0x1c6   : > { %v2233_v63 = vsel %vm2209_vm0, %v4395_v46, %v1424_v15 }
 0x1c7   : > { %2791 = vmatmul.bf16.gmra.mxu2 %v2559_v5  ;;  %v1729_v5 = vshrl.u32 %v4535_v6, 16 }
 0x1c8   : > { %v1854_v60 = vpop.permute.xlu0 %1853 }
 0x1c9   : > { %v2344_v38 = vsel %vm2209_vm0, %v1713_v1, %v1854_v60  ;;  %v1722_v60 = vshrl.u32 %v4466_v11, 16  ;;  %v1734_v42 = vor.u32 %v1733_v61, %v1729_v5  ;;  %v1736_v5 = vshrl.u32 %v5131_v10, 16 }
 0x1ca   : > { %v2385_v58 = vsel %vm2258_vm4, %v2344_v38, %v1934_v49  ;;  %v2276_v49 = vsel %vm2258_vm4, %v2236_v25, %v4266_v22  ;;  %v1738_v25 = vshll.u32 %v5131_v10, 16 }
 0x1cb   : > { %1613 = vrot.lane.b32.xlu1 %v1583_v18, %s3692_s21  ;;  %v1726_v18 = vrot.slane %v1724_v24, 1  ;;  %s368_s21 = sand.u32 1, %s3678_s14  }
 0x1cc   : > { %v1740_v61 = vrot.slane %v1738_v25, 1  ;;  %s3289_s27 = sshll.u32 %s368_s21, 7  ;;  %s3193_s17 = scalar_lea.sflag [#allocation5], %s368_s21 }
 0x1cd   : > { %v1856_v7 = vpop.permute.xlu1 %1855  ;;  %s4940_s28 = scalar_lea.vmem [#allocation6], %s3289_s27  ;;  %s3636_s27 = scalar_lea.hbm %s3635_s30, 128 }
 0x1ce   : > { %v2347_v21 = vsel %vm2209_vm0, %v1720_v2, %v1856_v7  ;;  %v1727_v2 = vor.u32 %v1726_v18, %v1722_v60  ;;  %v1741_v18 = vor.u32 %v1740_v61, %v1736_v5  ;;  %s3206_s26 = sshll.u32 %s4940_s28, 4  ;;  %p3637_p0 = scmp.ne.s32.totalorder %s3635_s30, %s3636_s27  ;;  %s3207_s26 = int_to_ptr.vmem [resolvable:$true] %s3206_s26 }
 0x1cf   : > { %v2387_v39 = vsel %vm2258_vm4, %v2347_v21, %v4296_v8 }
 0x1d0   : > { %v1520_v19 = vpop.permute.xlu0 %1519  ;;  %v2419_v32 = vsel %vm2291_vm8, %v2387_v39, %v4313_v31  ;;  %v1526_v31 = vpop.permute.xlu2 %1525  ;;  %p3638_p1 = pnand %p3637_p0, %p3789_p5 }
 0x1d1   : > { %v2274_v41 = vsel %vm2258_vm4, %v2233_v63, %v1520_v19  ;;  %v2490_v8 = vunpack.c.l.b16 %v2419_v32 }
 0x1d2   : > { %v2307_v29 = vsel %vm2291_vm8, %v2274_v41, %v1600_v34  ;;  %v2831_v41 = vpop.f32.mrf.mxu0  ;;  %p3639_p2 = pneg %p3638_p1 }
 0x1d3   : > { %v2489_v45 = vunpack.c.l.b16 %v2307_v29 }
 0x1d5   : > { %v2126_v57 = vpop.permute.xlu1 %2125  ;;  %v2561_v33 = vpack.c.b16 %v2489_v45, %v2486_v44 }
 0x1d6   : > { %v2417_v46 = vsel %vm2291_vm8, %v2385_v58, %v2126_v57  ;;  %v4826_v57 = vld [vmem:[%s5084_s5] ss:$0 sm:$0xff] }
 0x1d7   : > { %v2487_v50 = vunpack.c.l.b16 %v2417_v46  ;;  %2747 = vmatmul.bf16.gmra.mxu1 %v2561_v33 }
 0x1d8   : > { %v1858_v27 = vpop.permute.xlu0 %1857  ;;  %v2132_v4 = vpop.permute.xlu2 %2131 }
 0x1d9   : > { %v2562_v14 = vpack.c.b16 %v2490_v8, %v2487_v50  ;;  %v2350_v6 = vsel %vm2209_vm0, %v1727_v2, %v1858_v27  ;;  %v2733_v19 = vpop.f32.mrf.mxu1  ;;  %v1745_v50 = vshll.u32 %v4643_v0, 16  ;;  %v5133_v2 = vld [vmem:[#allocation10_spill] sm:$0xff] }
 0x1da   : > { %v2389_v7 = vsel %vm2258_vm4, %v2350_v6, %v1938_v35 }
 0x1db   : > { %2796 = vmatmul.bf16.gmra.mxu2 %v2562_v14 }
 0x1dd   : > { %v1602_v20 = vpop.permute.xlu1 %1601 }
 0x1de   : > { %v2309_v40 = vsel %vm2291_vm8, %v2276_v49, %v1602_v20 }
 0x1df   : > { %v2492_v15 = vunpack.c.l.b16 %v2309_v40  ;;  %v1743_v40 = vshrl.u32 %v4643_v0, 16 }
 0x1e0   : > { %v1524_v47 = vpop.permute.xlu0 %1523  ;;  %v1942_v21 = vpop.permute.xlu2 %1941 }
 0x1e1   : > { %v2735_v14 = vpop.f32.mrf.mxu1 }
 0x1e5   : > { %v1428_v62 = vpop.permute.xlu1 %1427 }
 0x1e6   : > { %v2239_v34 = vsel %vm2209_vm0, %v4528_v51, %v1428_v62  ;;  %v2833_v62 = vpop.f32.mrf.mxu0 }
 0x1e7   : > { %v2278_v36 = vsel %vm2258_vm4, %v2239_v34, %v1524_v47  ;;  %v1747_v34 = vrot.slane %v1745_v50, 1 }
 0x1e8   : > { %v2311_v48 = vsel %vm2291_vm8, %v2278_v36, %v1604_v37  ;;  %v1430_v3 = vpop.permute.xlu0 %1429  ;;  %v1608_v44 = vpop.permute.xlu2 %1607 }
 0x1e9   : > { %v2495_v22 = vunpack.c.l.b16 %v2311_v48  ;;  %v2242_v35 = vsel %vm2209_vm0, %v4541_v26, %v1430_v3  ;;  %v4835_v26 = vld [vmem:[%s5085_s6] ss:$0 sm:$0xff] }
 0x1ea   : > { %v2280_v33 = vsel %vm2258_vm4, %v2242_v35, %v1526_v31 }
 0x1eb   : > { %v2564_v9 = vpack.c.b16 %v2495_v22, %v2492_v15  ;;  %v1748_v22 = vor.u32 %v1747_v34, %v1743_v40 }
 0x1ed   : > { %v1860_v59 = vpop.permute.xlu1 %1859  ;;  %2752 = vmatmul.bf16.gmra.mxu1 %v2564_v9 }
 0x1ee   : > { %v2353_v51 = vsel %vm2209_vm0, %v1734_v42, %v1860_v59  ;;  %v5132_v42 = vmov 0.0   ;;  %v2836_v40 = vpop.f32.mrf.mxu0 }
 0x1f0   : > { %v1940_v56 = vpop.permute.xlu0 %1939  ;;  %v1530_v24 = vpop.permute.xlu2 %1529 }
 0x1f1   : > { %v2391_v53 = vsel %vm2258_vm4, %v2353_v51, %v1940_v56 }
 0x1f2   : > { %v2423_v28 = vsel %vm2291_vm8, %v2391_v53, %v2132_v4 }
 0x1f3   : > { %v2496_v30 = vunpack.c.l.b16 %v2423_v28  ;;  %v5134_v28 = vld [vmem:[#allocation9_spill] sm:$0xff] }
 0x1f5   : > { %v2130_v11 = vpop.permute.xlu1 %2129 }
 0x1f6   : > { %v2421_v13 = vsel %vm2291_vm8, %v2389_v7, %v2130_v11 }
 0x1f7   : > { %v2493_v1 = vunpack.c.l.b16 %v2421_v13 }
 0x1f8   : > { %v1862_v39 = vpop.permute.xlu0 %1861  ;;  %v1612_v53 = vpop.permute.xlu2 %1611 }
 0x1f9   : > { %v2565_v63 = vpack.c.b16 %v2496_v30, %v2493_v1  ;;  %v2356_v6 = vsel %vm2209_vm0, %v1741_v18, %v1862_v39  ;;  %v5135_v39 = vld [vmem:[#allocation11_spill] sm:$0xff] }
 0x1fa   : > { %v2393_v16 = vsel %vm2258_vm4, %v2356_v6, %v1942_v21 }
 0x1fb   : > { %2801 = vmatmul.bf16.gmra.mxu2 %v2565_v63 }
 0x1fd   : > { %v1606_v38 = vpop.permute.xlu1 %1605 }
 0x1fe   : > { %v2313_v8 = vsel %vm2291_vm8, %v2280_v33, %v1606_v38 }
 0x1ff   : > { %v2782_v29 = vpop.f32.mrf.mxu2  ;;  %v2498_v17 = vunpack.c.l.b16 %v2313_v8 }
 0x200   : > { %v2783_v45 = vadd.f32 %v2782_v29, %v2733_v19  ;;  %v1528_v58 = vpop.permute.xlu0 %1527  ;;  %v5136_v29 = vld [vmem:[#allocation12_spill] sm:$0xff] }
 0x201   : > { %v1771_v8 = vshrl.u32 %v5136_v29, 16 }
 0x202   : > { %v2832_v32 = vadd.f32 %v2831_v41, %v2783_v45  ;;  %v2319_v41 = vsel %vm2291_vm8, %v5135_v39, %v1612_v53  ;;  %v1950_v45 = vpop.permute.xlu2 %1949 }
 0x204   : > { %v2875_v37 = vmul.f32 %v4826_v57, %v2832_v32 }
 0x205   : > { %v1432_v46 = vpop.permute.xlu1 %1431 }
 0x206   : > { %v2245_v27 = vsel %vm2209_vm0, %v4637_v12, %v1432_v46  ;;  %v2895_v48 = vadd.f32 %v4835_v26, %v2875_v37  ;;  %v5137_v46 = vld [vmem:[#allocation14_spill] sm:$0xff] }
 0x207   : > { %v2282_v20 = vsel %vm2258_vm4, %v2245_v27, %v1528_v58  ;;  %v2784_v47 = vpop.f32.mrf.mxu2  ;;  %v2507_v58 = vunpack.c.l.b16 %v2319_v41  ;;  %v1766_v50 = vshll.u32 %v5137_v46, 16  ;;  %v1764_v27 = vshrl.u32 %v5137_v46, 16 }
 0x208   : > { %v2785_v31 = vadd.f32 %v2784_v47, %v2735_v14  ;;  %v2315_v49 = vsel %vm2291_vm8, %v2282_v20, %v1608_v44  ;;  %vm2911_vm2 = vcmp.ge.f32.partialorder %v2895_v48, 1.0  ;;  %v1870_v4 = vpop.permute.xlu0 %1869  ;;  %v1773_v44 = vshll.u32 %v5136_v29, 16 }
 0x209   : > { %v2501_v36 = vunpack.c.l.b16 %v2315_v49  ;;  %v3421_v59 = vsel %vm2911_vm2, 1.0, %v5132_v42  ;;  %v1768_v14 = vrot.slane %v1766_v50, 1 }
 0x20a   : > { %v2834_v15 = vadd.f32 %v2833_v62, %v2785_v31  ;;  %v1775_v37 = vrot.slane %v1773_v44, 1  ;;  %v2144_v31 = vpop.permute.xlu2 %2143  ;;  %v2851_v44 = vpop.f32.mrf.mxu3 }
 0x20b   : > { %v2567_v12 = vpack.c.b16 %v2501_v36, %v2498_v17  ;;  %v1769_v49 = vor.u32 %v1768_v14, %v1764_v27 }
 0x20c   : > { %v2876_v3 = vmul.f32 %v4826_v57, %v2834_v15  ;;  %v1776_v47 = vor.u32 %v1775_v37, %v1771_v8 }
 0x20d   : > { %v1864_v9 = vpop.permute.xlu1 %1863  ;;  %2757 = vmatmul.bf16.gmra.mxu1 %v2567_v12  ;;  %v2368_v34 = vsel %vm2209_vm0, %v1769_v49, %v1870_v4 }
 0x20e   : > { %v2896_v60 = vadd.f32 %v4835_v26, %v2876_v3  ;;  %v2359_v0 = vsel %vm2209_vm0, %v1748_v22, %v1864_v9  ;;  %v2401_v3 = vsel %vm2258_vm4, %v2368_v34, %v1950_v45 }
 0x20f   : > { %v2395_v56 = vsel %vm2258_vm4, %v2359_v0, %v5133_v2  ;;  %v2838_v2 = vpop.f32.mrf.mxu0 }
 0x210   : > { %vm2912_vm11 = vcmp.ge.f32.partialorder %v2896_v60, 1.0  ;;  %v2427_v11 = vsel %vm2291_vm8, %v2395_v56, %v5134_v28  ;;  %v1434_v1 = vpop.permute.xlu0 %1433 }
 0x211   : > { %v3422_v51 = vsel %vm2912_vm11, 1.0, %v5132_v42  ;;  %v2502_v63 = vunpack.c.l.b16 %v2427_v11  ;;  %v2248_v38 = vsel %vm2209_vm0, %v4666_v43, %v1434_v1 }
 0x212   : > { %v2959_v23 = vpack.c.bf16 %v3422_v51, %v3421_v59  ;;  %v2284_v32 = vsel %vm2258_vm4, %v2248_v38, %v1530_v24  ;;  %v1534_v60 = vpop.permute.xlu2 %1533 }
 0x214   : > { %3445 = vmatmul.msk.bf16.vlgmr.msrb.gmra.mxu3 %vm2209_vm0, %v2959_v23  ;;  %v2738_v62 = vpop.f32.mrf.mxu1 }
 0x215   : > { %v2134_v7 = vpop.permute.xlu1 %2133 }
 0x216   : > { %v2425_v13 = vsel %vm2291_vm8, %v2393_v16, %v2134_v7 }
 0x217   : > { %v2499_v30 = vunpack.c.l.b16 %v2425_v13 }
 0x218   : > { %v1952_v20 = vpop.permute.xlu0 %1951 }
 0x219   : > { %v2568_v19 = vpack.c.b16 %v2502_v63, %v2499_v30 }
 0x21a   : > { %v1616_v13 = vpop.permute.xlu2 %1615 }
 0x21b   : > { %2806 = vmatmul.bf16.gmra.mxu2 %v2568_v19 }
 0x21c   : > { %v2740_v4 = vpop.f32.mrf.mxu1 }
 0x21d   : > { %v1610_v35 = vpop.permute.xlu1 %1609 }
 0x21e   : > { %v2317_v21 = vsel %vm2291_vm8, %v2284_v32, %v1610_v35  ;;  %v2841_v35 = vpop.f32.mrf.mxu0 }
 0x21f   : > { %v2504_v33 = vunpack.c.l.b16 %v2317_v21 }
 0x220   : > { %v1438_v5 = vpop.permute.xlu0 %1437 }
 0x221   : > { %v2570_v43 = vpack.c.b16 %v2507_v58, %v2504_v33  ;;  %v2254_v16 = vsel %vm2209_vm0, %v4699_v54, %v1438_v5  ;;  %v2853_v33 = vpop.f32.mrf.mxu3 }
 0x222   : > { %v2288_v38 = vsel %vm2258_vm4, %v2254_v16, %v1534_v60 }
 0x223   : > { %2762 = vmatmul.bf16.gmra.mxu1 %v2570_v43 }
 0x225   : > { %v1872_v10 = vpop.permute.xlu1 %1871 }
 0x226   : > { %v2371_v25 = vsel %vm2209_vm0, %v1776_v47, %v1872_v10  ;;  %v2843_v43 = vpop.f32.mrf.mxu0 }
 0x227   : > { %v2403_v17 = vsel %vm2258_vm4, %v2371_v25, %v1952_v20 }
 0x228   : > { %v2435_v48 = vsel %vm2291_vm8, %v2403_v17, %v2144_v31  ;;  %v1536_v28 = vpop.permute.xlu0 %1535 }
 0x229   : > { %v2514_v9 = vunpack.c.l.b16 %v2435_v48  ;;  %v4894_v25 = vpop.f32.mrf.mxu3 }
 0x22a   : > { %v2787_v36 = vpop.f32.mrf.mxu2 }
 0x22b   : > { %v2788_v24 = vadd.f32 %v2787_v36, %v2738_v62  ;;  %2811 = vmatmul.bf16.gmra.mxu2 %v4780_v52 }
 0x22d   : > { %v2837_v15 = vadd.f32 %v2836_v40, %v2788_v24  ;;  %v2142_v12 = vpop.permute.xlu1 %2141 }
 0x22e   : > { %v2433_v61 = vsel %vm2291_vm8, %v2401_v3, %v2142_v12  ;;  %v2846_v62 = vpop.f32.mrf.mxu0 }
 0x22f   : > { %v2511_v22 = vunpack.c.l.b16 %v2433_v61  ;;  %v2877_v0 = vmul.f32 %v4826_v57, %v2837_v15 }
 0x231   : > { %v2574_v18 = vpack.c.b16 %v2514_v9, %v2511_v22  ;;  %v2897_v23 = vadd.f32 %v4835_v26, %v2877_v0  ;;  %v4900_v12 = vpop.f32.mrf.mxu3 }
 0x232   : > { %v2789_v59 = vpop.f32.mrf.mxu2 }
 0x233   : > { %v2790_v51 = vadd.f32 %v2789_v59, %v2740_v4  ;;  %vm2913_vm12 = vcmp.ge.f32.partialorder %v2897_v23, 1.0 }
 0x234   : > { %v3423_v1 = vsel %vm2913_vm12, 1.0, %v5132_v42  ;;  %v2743_v45 = vpop.f32.mrf.mxu1 }
 0x235   : > { %v2839_v52 = vadd.f32 %v2838_v2, %v2790_v51  ;;  %v1440_v56 = vpop.permute.xlu1 %1439 }
 0x236   : > { %v2257_v6 = vsel %vm2209_vm0, %v4737_v55, %v1440_v56  ;;  %v2848_v5 = vpop.f32.mrf.mxu0 }
 0x237   : > { %v2878_v53 = vmul.f32 %v4826_v57, %v2839_v52  ;;  %v2290_v11 = vsel %vm2258_vm4, %v2257_v6, %v1536_v28 }
 0x238   : > { %v2323_v55 = vsel %vm2291_vm8, %v2290_v11, %v1616_v13 }
 0x239   : > { %v2898_v7 = vadd.f32 %v4835_v26, %v2878_v53  ;;  %v2513_v29 = vunpack.c.l.b16 %v2323_v55  ;;  %v4907_v4 = vpop.f32.mrf.mxu3 }
 0x23b   : > { %2816 = vmatmul.bf16.gmra.mxu2 %v2574_v18  ;;  %vm2914_vm13 = vcmp.ge.f32.partialorder %v2898_v7, 1.0 }
 0x23c   : > { %v3424_v30 = vsel %vm2914_vm13, 1.0, %v5132_v42  ;;  %v2745_v50 = vpop.f32.mrf.mxu1 }
 0x23d   : > { %v2960_v63 = vpack.c.bf16 %v3424_v30, %v3423_v1  ;;  %v1614_v19 = vpop.permute.xlu1 %1613 }
 0x23e   : > { %v2321_v39 = vsel %vm2291_vm8, %v2288_v38, %v1614_v19 }
 0x23f   : > { %3446 = vmatmul.msk.bf16.gmra.mxu3 %vm2209_vm0, %v2960_v63  ;;  %v2510_v41 = vunpack.c.l.b16 %v2321_v39  ;;  %v4926_v39 = vld [vmem:[%s5087_s8] ss:$0 sm:$0xff] }
 0x241   : > { %v2573_v54 = vpack.c.b16 %v2513_v29, %v2510_v41  ;;  %v4910_v51 = vpop.f32.mrf.mxu3  ;;  %v4931_v41 = vld [vmem:[%s5088_s9] ss:$0 sm:$0xff] }
 0x243   : > { %2767 = vmatmul.bf16.gmra.mxu1 %v2573_v54 }
 0x249   : > { %v4912_v6 = vpop.f32.mrf.mxu3 }
 0x24a   : > { %v2792_v32 = vpop.f32.mrf.mxu2 }
 0x24b   : > { %v2793_v21 = vadd.f32 %v2792_v32, %v2743_v45 }
 0x24d   : > { %v2842_v58 = vadd.f32 %v2841_v35, %v2793_v21  ;;  %v3144_v35 = vld [vmem:[%s3822_s20] sm:$0xff] }
 0x24f   : > { %v2879_v46 = vmul.f32 %v4826_v57, %v2842_v58 }
 0x251   : > { %v2899_v14 = vadd.f32 %v4835_v26, %v2879_v46  ;;  %v4918_v55 = vpop.f32.mrf.mxu3 }
 0x252   : > { %v2794_v8 = vpop.f32.mrf.mxu2 }
 0x253   : > { %v2795_v37 = vadd.f32 %v2794_v8, %v2745_v50  ;;  %vm2915_vm14 = vcmp.ge.f32.partialorder %v2899_v14, 1.0 }
 0x254   : > { %v2748_v10 = vpop.f32.mrf.mxu1  ;;  %v3425_v31 = vsel %vm2915_vm14, 1.0, %v5132_v42 }
 0x255   : > { %v2844_v27 = vadd.f32 %v2843_v43, %v2795_v37  ;;  %v3145_v43 = vld [vmem:[%s3822_s20 + $0x8] sm:$0xff] }
 0x257   : > { %v2880_v20 = vmul.f32 %v4826_v57, %v2844_v27 }
 0x259   : > { %v2900_v47 = vadd.f32 %v4835_v26, %v2880_v20 }
 0x25b   : > { %vm2916_vm15 = vcmp.ge.f32.partialorder %v2900_v47, 1.0 }
 0x25c   : > { %v3426_v49 = vsel %vm2916_vm15, 1.0, %v5132_v42  ;;  %v2750_v48 = vpop.f32.mrf.mxu1 }
 0x25d   : > { %v2961_v17 = vpack.c.bf16 %v3426_v49, %v3425_v31 }
 0x25e   : > { %v2797_v40 = vpop.f32.mrf.mxu2 }
 0x25f   : > { %v2798_v34 = vadd.f32 %v2797_v40, %v2748_v10  ;;  %3447 = vmatmul.msk.bf16.gmra.mxu3 %vm2209_vm0, %v2961_v17 }
 0x261   : > { %v2847_v36 = vadd.f32 %v2846_v62, %v2798_v34 }
 0x263   : > { %v2881_v24 = vmul.f32 %v4826_v57, %v2847_v36 }
 0x265   : > { %v2901_v22 = vadd.f32 %v4835_v26, %v2881_v24 }
 0x266   : > { %v2799_v15 = vpop.f32.mrf.mxu2 }
 0x267   : > { %v2800_v3 = vadd.f32 %v2799_v15, %v2750_v48  ;;  %vm2917_vm1 = vcmp.ge.f32.partialorder %v2901_v22, 1.0 }
 0x268   : > { %v3427_v0 = vsel %vm2917_vm1, 1.0, %v5132_v42 }
 0x269   : > { %v2849_v61 = vadd.f32 %v2848_v5, %v2800_v3 }
 0x26a   : > { %v2753_v2 = vpop.f32.mrf.mxu1 }
 0x26b   : > { %v2882_v9 = vmul.f32 %v4826_v57, %v2849_v61 }
 0x26d   : > { %v2902_v60 = vadd.f32 %v4835_v26, %v2882_v9 }
 0x26f   : > { %vm2918_vm3 = vcmp.ge.f32.partialorder %v2902_v60, 1.0 }
 0x270   : > { %v3428_v18 = vsel %vm2918_vm3, 1.0, %v5132_v42 }
 0x271   : > { %v2962_v59 = vpack.c.bf16 %v3428_v18, %v3427_v0 }
 0x272   : > { %v2755_v28 = vpop.f32.mrf.mxu1 }
 0x273   : > { %3448 = vmatmul.msk.bf16.gmra.mxu3 %vm2209_vm0, %v2962_v59 }
 0x27e   : > { %v2802_v52 = vpop.f32.mrf.mxu2 }
 0x27f   : > { %v2803_v56 = vadd.f32 %v2802_v52, %v2753_v2 }
 0x281   : > { %v2852_v23 = vadd.f32 %v2851_v44, %v2803_v56 }
 0x283   : > { %v2883_v53 = vmul.f32 %v4826_v57, %v2852_v23 }
 0x285   : > { %v2903_v13 = vadd.f32 %v4835_v26, %v2883_v53 }
 0x286   : > { %v2804_v11 = vpop.f32.mrf.mxu2 }
 0x287   : > { %v2805_v7 = vadd.f32 %v2804_v11, %v2755_v28  ;;  %vm2919_vm5 = vcmp.ge.f32.partialorder %v2903_v13, 1.0 }
 0x288   : > { %v3429_v63 = vsel %vm2919_vm5, 1.0, %v5132_v42 }
 0x289   : > { %v2854_v16 = vadd.f32 %v2853_v33, %v2805_v7  ;;  %v3146_v7 = vld [vmem:[%s3822_s20 + $0x10] sm:$0xff] }
 0x28a   : > { %v2758_v45 = vpop.f32.mrf.mxu1 }
 0x28b   : > { %v2884_v1 = vmul.f32 %v4826_v57, %v2854_v16 }
 0x28d   : > { %v2904_v30 = vadd.f32 %v4835_v26, %v2884_v1 }
 0x28f   : > { %vm2920_vm6 = vcmp.ge.f32.partialorder %v2904_v30, 1.0 }
 0x290   : > { %v3430_v19 = vsel %vm2920_vm6, 1.0, %v5132_v42 }
 0x291   : > { %v2963_v38 = vpack.c.bf16 %v3430_v19, %v3429_v63 }
 0x292   : > { %v2760_v27 = vpop.f32.mrf.mxu1 }
 0x293   : > { %3449 = vmatmul.msk.bf16.gmra.mxu3 %vm2209_vm0, %v2963_v38 }
 0x297   : > { %v3016_v29 = vpop.f32.mrf.mxu3 }
 0x298   : > { %v3060_v54 = vmul.f32 %v4926_v39, %v3016_v29 }
 0x29a   : > { %v3080_v44 = vadd.f32 %v4931_v41, %v3060_v54 }
 0x29c   : > { %vm3096_vm7 = vcmp.ge.f32.partialorder %v3080_v44, 1.0 }
 0x29d   : > { %v3453_v32 = vsel %vm3096_vm7, 1.0, %v5132_v42 }
 0x29e   : > { %v3160_v21 = vadd.f32 %v3453_v32, %v3144_v35  ;;  %v2807_v58 = vpop.f32.mrf.mxu2  ;;  %v3147_v35 = vld [vmem:[%s3822_s20 + $0x18] sm:$0xff] }
 0x29f   : > { %v3018_v33 = vpop.f32.mrf.mxu3  ;;  %v2808_v46 = vadd.f32 %v2807_v58, %v2758_v45 }
 0x2a0   : > { %3176 = vst [vmem:[%s4940_s28] sm:$0xff] %v3160_v21  ;;  %v3061_v50 = vmul.f32 %v4926_v39, %v3018_v33 }
 0x2a1   : > { %v2857_v8 = vadd.f32 %v4894_v25, %v2808_v46  ;;  %v2763_v25 = vpop.f32.mrf.mxu1 }
 0x2a2   : > { %v3081_v37 = vadd.f32 %v4931_v41, %v3061_v50 }
 0x2a3   : > { %v2885_v20 = vmul.f32 %v4826_v57, %v2857_v8  ;;  %v3148_v8 = vld [vmem:[%s3822_s20 + $0x20] sm:$0xff] }
 0x2a4   : > { %vm3097_vm9 = vcmp.ge.f32.partialorder %v3081_v37, 1.0 }
 0x2a5   : > { %v3454_v14 = vsel %vm3097_vm9, 1.0, %v5132_v42  ;;  %v2905_v62 = vadd.f32 %v4835_v26, %v2885_v20 }
 0x2a6   : > { %v3161_v47 = vadd.f32 %v3454_v14, %v3145_v43  ;;  %v2809_v10 = vpop.f32.mrf.mxu2 }
 0x2a7   : > { %v2810_v31 = vadd.f32 %v2809_v10, %v2760_v27  ;;  %vm2921_vm10 = vcmp.ge.f32.partialorder %v2905_v62, 1.0 }
 0x2a8   : > { %3177 = vst [vmem:[%s4940_s28 + $0x8] sm:$0xff] %v3161_v47  ;;  %v3431_v24 = vsel %vm2921_vm10, 1.0, %v5132_v42  ;;  %v3149_v47 = vld [vmem:[%s3822_s20 + $0x28] sm:$0xff] }
 0x2a9   : > { %v2859_v49 = vadd.f32 %v4900_v12, %v2810_v31  ;;  %v2765_v5 = vpop.f32.mrf.mxu1 }
 0x2ab   : > { %v2886_v17 = vmul.f32 %v4826_v57, %v2859_v49 }
 0x2ad   : > { %v2906_v40 = vadd.f32 %v4835_v26, %v2886_v17 }
 0x2ae   : > { %v2812_v34 = vpop.f32.mrf.mxu2 }
 0x2af   : > { %v2813_v36 = vadd.f32 %v2812_v34, %v2763_v25  ;;  %vm2922_vm4 = vcmp.ge.f32.partialorder %v2906_v40, 1.0  ;;  %v3150_v25 = vld [vmem:[%s3822_s20 + $0x30] sm:$0xff] }
 0x2b0   : > { %v3432_v48 = vsel %vm2922_vm4, 1.0, %v5132_v42 }
 0x2b1   : > { %v2862_v15 = vadd.f32 %v4907_v4, %v2813_v36  ;;  %v2964_v3 = vpack.c.bf16 %v3432_v48, %v3431_v24 }
 0x2b3   : > { %3450 = vmatmul.msk.bf16.gmra.mxu3 %vm2209_vm0, %v2964_v3  ;;  %v2887_v12 = vmul.f32 %v4826_v57, %v2862_v15  ;;  %v3151_v15 = vld [vmem:[%s3822_s20 + $0x38] sm:$0xff] }
 0x2b5   : > { %v2907_v60 = vadd.f32 %v4835_v26, %v2887_v12 }
 0x2b6   : > { %v2814_v61 = vpop.f32.mrf.mxu2 }
 0x2b7   : > { %v2815_v22 = vadd.f32 %v2814_v61, %v2765_v5  ;;  %vm2923_vm8 = vcmp.ge.f32.partialorder %v2907_v60, 1.0 }
 0x2b8   : > { %v3433_v2 = vsel %vm2923_vm8, 1.0, %v5132_v42 }
 0x2b9   : > { %v2864_v9 = vadd.f32 %v4910_v51, %v2815_v22 }
 0x2bb   : > { %v2888_v0 = vmul.f32 %v4826_v57, %v2864_v9  ;;  %v3152_v9 = vld [vmem:[%s3822_s20 + $0x40] sm:$0xff] }
 0x2bd   : > { %v2908_v18 = vadd.f32 %v4835_v26, %v2888_v0 }
 0x2be   : > { %v2817_v59 = vpop.f32.mrf.mxu2 }
 0x2bf   : > { %vm2924_vm2 = vcmp.ge.f32.partialorder %v2908_v18, 1.0 }
 0x2c0   : > { %v2768_v4 = vpop.f32.mrf.mxu1  ;;  %v3434_v52 = vsel %vm2924_vm2, 1.0, %v5132_v42 }
 0x2c1   : > { %v2818_v56 = vadd.f32 %v2817_v59, %v2768_v4  ;;  %v2965_v23 = vpack.c.bf16 %v3434_v52, %v3433_v2  ;;  %v3153_v2 = vld [vmem:[%s3822_s20 + $0x48] sm:$0xff] }
 0x2c2   : > { %v3021_v53 = vpop.f32.mrf.mxu3 }
 0x2c3   : > { %v3062_v51 = vmul.f32 %v4926_v39, %v3021_v53  ;;  %v2867_v28 = vadd.f32 %v4912_v6, %v2818_v56  ;;  %3451 = vmatmul.msk.bf16.gmra.mxu3 %vm2209_vm0, %v2965_v23 }
 0x2c5   : > { %v3082_v11 = vadd.f32 %v4931_v41, %v3062_v51  ;;  %v2889_v16 = vmul.f32 %v4826_v57, %v2867_v28  ;;  %v3154_v28 = vld [vmem:[%s3822_s20 + $0x50] sm:$0xff] }
 0x2c6   : > { %v2819_v1 = vpop.f32.mrf.mxu2 }
 0x2c7   : > { %vm3098_vm11 = vcmp.ge.f32.partialorder %v3082_v11, 1.0  ;;  %v2909_v54 = vadd.f32 %v4835_v26, %v2889_v16 }
 0x2c8   : > { %v3455_v13 = vsel %vm3098_vm11, 1.0, %v5132_v42  ;;  %v2770_v30 = vpop.f32.mrf.mxu1 }
 0x2c9   : > { %v3162_v63 = vadd.f32 %v3455_v13, %v3146_v7  ;;  %v2820_v19 = vadd.f32 %v2819_v1, %v2770_v30  ;;  %vm2925_vm13 = vcmp.ge.f32.partialorder %v2909_v54, 1.0  ;;  %v3155_v30 = vld [vmem:[%s3822_s20 + $0x58] sm:$0xff]  ;;  %v3156_v54 = vld [vmem:[%s3822_s20 + $0x60] sm:$0xff] }
 0x2ca   : > { %v3023_v38 = vpop.f32.mrf.mxu3  ;;  %v3435_v33 = vsel %vm2925_vm13, 1.0, %v5132_v42 }
 0x2cb   : > { %3178 = vst [vmem:[%s4940_s28 + $0x10] sm:$0xff] %v3162_v63  ;;  %v3063_v6 = vmul.f32 %v4926_v39, %v3023_v38  ;;  %v2869_v29 = vadd.f32 %v4918_v55, %v2820_v19 }
 0x2cd   : > { %v3083_v44 = vadd.f32 %v4931_v41, %v3063_v6  ;;  %v2890_v45 = vmul.f32 %v4826_v57, %v2869_v29 }
 0x2cf   : > { %vm3099_vm12 = vcmp.ge.f32.partialorder %v3083_v44, 1.0  ;;  %v2910_v32 = vadd.f32 %v4835_v26, %v2890_v45 }
 0x2d0   : > { %v3456_v21 = vsel %vm3099_vm12, 1.0, %v5132_v42 }
 0x2d1   : > { %v3163_v58 = vadd.f32 %v3456_v21, %v3147_v35  ;;  %vm2926_vm14 = vcmp.ge.f32.partialorder %v2910_v32, 1.0 }
 0x2d2   : > { %v3436_v55 = vsel %vm2926_vm14, 1.0, %v5132_v42 }
 0x2d3   : > { %3179 = vst [vmem:[%s4940_s28 + $0x18] sm:$0xff] %v3163_v58  ;;  %v2966_v46 = vpack.c.bf16 %v3436_v55, %v3435_v33  ;;  %v3157_v58 = vld [vmem:[%s3822_s20 + $0x68] sm:$0xff] }
 0x2d5   : > { %3452 = vmatmul.msk.bf16.gmra.mxu3 %vm2209_vm0, %v2966_v46 }
 0x2e2   : > { %v3026_v57 = vpop.f32.mrf.mxu3 }
 0x2e3   : > { %v3064_v50 = vmul.f32 %v4926_v39, %v3026_v57 }
 0x2e5   : > { %v3084_v26 = vadd.f32 %v4931_v41, %v3064_v50 }
 0x2e7   : > { %vm3100_vm15 = vcmp.ge.f32.partialorder %v3084_v26, 1.0  ;;  %v3158_v26 = vld [vmem:[%s3822_s20 + $0x70] sm:$0xff] }
 0x2e8   : > { %v3457_v37 = vsel %vm3100_vm15, 1.0, %v5132_v42 }
 0x2e9   : > { %v3164_v43 = vadd.f32 %v3457_v37, %v3148_v8 }
 0x2ea   : > { %v3028_v27 = vpop.f32.mrf.mxu3 }
 0x2eb   : > { %3180 = vst [vmem:[%s4940_s28 + $0x20] sm:$0xff] %v3164_v43  ;;  %v3065_v14 = vmul.f32 %v4926_v39, %v3028_v27 }
 0x2ed   : > { %v3085_v20 = vadd.f32 %v4931_v41, %v3065_v14 }
 0x2ef   : > { %vm3101_vm0 = vcmp.ge.f32.partialorder %v3085_v20, 1.0  ;;  %v3159_v20 = vld [vmem:[%s3822_s20 + $0x78] sm:$0xff]  ;;  %s3640_s20 = scalar_lea.hbm %s5089_s10, 256 }
 0x2f0   : > { %v3458_v10 = vsel %vm3101_vm0, 1.0, %v5132_v42  ;;  %p3642_p4 = scmp.lt.s32.totalorder %s3640_s20, %s3636_s27 }
 0x2f1   : > { %v3165_v31 = vadd.f32 %v3458_v10, %v3149_v47 }
 0x2f2   : > { %p3643_p7 = por %p3642_p4, %p3641_p3 }
 0x2f3   : > { %3181 = vst [vmem:[%s4940_s28 + $0x28] sm:$0xff] %v3165_v31 }
 0x2f4   : > { %p3644_p8 = pnand %p3643_p7, %p3639_p2 }
 0x2f6   : > { %v3031_v49 = vpop.f32.mrf.mxu3 }
 0x2f7   : > { %v3066_v62 = vmul.f32 %v4926_v39, %v3031_v49 }
 0x2f9   : > { %v3086_v17 = vadd.f32 %v4931_v41, %v3066_v62 }
 0x2fb   : > { %vm3102_vm1 = vcmp.ge.f32.partialorder %v3086_v17, 1.0 }
 0x2fc   : > { %v3459_v40 = vsel %vm3102_vm1, 1.0, %v5132_v42 }
 0x2fd   : > { %v3166_v34 = vadd.f32 %v3459_v40, %v3150_v25 }
 0x2fe   : > { %v3033_v36 = vpop.f32.mrf.mxu3 }
 0x2ff   : > { %3182 = vst [vmem:[%s4940_s28 + $0x30] sm:$0xff] %v3166_v34  ;;  %v3067_v24 = vmul.f32 %v4926_v39, %v3033_v36 }
 0x301   : > { %v3087_v48 = vadd.f32 %v4931_v41, %v3067_v24 }
 0x303   : > { %vm3103_vm3 = vcmp.ge.f32.partialorder %v3087_v48, 1.0 }
 0x304   : > { %v3460_v3 = vsel %vm3103_vm3, 1.0, %v5132_v42 }
 0x305   : > { %v3167_v12 = vadd.f32 %v3460_v3, %v3151_v15 }
 0x307   : > { %3183 = vst [vmem:[%s4940_s28 + $0x38] sm:$0xff] %v3167_v12 }
 0x316   : > { %v3036_v5 = vpop.f32.mrf.mxu3 }
 0x317   : > { %v3068_v61 = vmul.f32 %v4926_v39, %v3036_v5 }
 0x319   : > { %v3088_v22 = vadd.f32 %v4931_v41, %v3068_v61 }
 0x31b   : > { %vm3104_vm5 = vcmp.ge.f32.partialorder %v3088_v22, 1.0 }
 0x31c   : > { %v3461_v60 = vsel %vm3104_vm5, 1.0, %v5132_v42 }
 0x31d   : > { %v3168_v0 = vadd.f32 %v3461_v60, %v3152_v9 }
 0x31e   : > { %v3038_v18 = vpop.f32.mrf.mxu3 }
 0x31f   : > { %3184 = vst [vmem:[%s4940_s28 + $0x40] sm:$0xff] %v3168_v0  ;;  %v3069_v59 = vmul.f32 %v4926_v39, %v3038_v18 }
 0x321   : > { %v3089_v4 = vadd.f32 %v4931_v41, %v3069_v59 }
 0x323   : > { %vm3105_vm6 = vcmp.ge.f32.partialorder %v3089_v4, 1.0 }
 0x324   : > { %v3462_v52 = vsel %vm3105_vm6, 1.0, %v5132_v42 }
 0x325   : > { %v3169_v56 = vadd.f32 %v3462_v52, %v3153_v2 }
 0x327   : > { %3185 = vst [vmem:[%s4940_s28 + $0x48] sm:$0xff] %v3169_v56 }
 0x336   : > { %v3041_v23 = vpop.f32.mrf.mxu3 }
 0x337   : > { %v3070_v53 = vmul.f32 %v4926_v39, %v3041_v23 }
 0x339   : > { %v3090_v51 = vadd.f32 %v4931_v41, %v3070_v53 }
 0x33b   : > { %vm3106_vm7 = vcmp.ge.f32.partialorder %v3090_v51, 1.0 }
 0x33c   : > { %v3463_v11 = vsel %vm3106_vm7, 1.0, %v5132_v42 }
 0x33d   : > { %v3170_v7 = vadd.f32 %v3463_v11, %v3154_v28 }
 0x33e   : > { %v3043_v16 = vpop.f32.mrf.mxu3 }
 0x33f   : > { %3186 = vst [vmem:[%s4940_s28 + $0x50] sm:$0xff] %v3170_v7  ;;  %v3071_v13 = vmul.f32 %v4926_v39, %v3043_v16 }
 0x341   : > { %v3091_v1 = vadd.f32 %v4931_v41, %v3071_v13 }
 0x343   : > { %vm3107_vm9 = vcmp.ge.f32.partialorder %v3091_v1, 1.0 }
 0x344   : > { %v3464_v63 = vsel %vm3107_vm9, 1.0, %v5132_v42 }
 0x345   : > { %v3171_v19 = vadd.f32 %v3464_v63, %v3155_v30 }
 0x346   : > { %v3046_v38 = vpop.f32.mrf.mxu3 }
 0x347   : > { %3187 = vst [vmem:[%s4940_s28 + $0x58] sm:$0xff] %v3171_v19  ;;  %v3072_v6 = vmul.f32 %v4926_v39, %v3046_v38 }
 0x349   : > { %v3092_v29 = vadd.f32 %v4931_v41, %v3072_v6 }
 0x34b   : > { %vm3108_vm10 = vcmp.ge.f32.partialorder %v3092_v29, 1.0 }
 0x34c   : > { %v3465_v44 = vsel %vm3108_vm10, 1.0, %v5132_v42 }
 0x34d   : > { %v3172_v45 = vadd.f32 %v3465_v44, %v3156_v54 }
 0x34e   : > { %v3048_v35 = vpop.f32.mrf.mxu3 }
 0x34f   : > { %3188 = vst [vmem:[%s4940_s28 + $0x60] sm:$0xff] %v3172_v45  ;;  %v3073_v32 = vmul.f32 %v4926_v39, %v3048_v35 }
 0x351   : > { %v3093_v21 = vadd.f32 %v4931_v41, %v3073_v32 }
 0x353   : > { %vm3109_vm4 = vcmp.ge.f32.partialorder %v3093_v21, 1.0 }
 0x354   : > { %v3466_v33 = vsel %vm3109_vm4, 1.0, %v5132_v42 }
 0x355   : > { %v3173_v55 = vadd.f32 %v3466_v33, %v3157_v58 }
 0x357   : > { %3189 = vst [vmem:[%s4940_s28 + $0x68] sm:$0xff] %v3173_v55 }
 0x358   : > { %v3051_v46 = vpop.f32.mrf.mxu3 }
 0x359   : > { %v3074_v57 = vmul.f32 %v4926_v39, %v3051_v46 }
 0x35b   : > { %v3094_v50 = vadd.f32 %v4931_v41, %v3074_v57 }
 0x35d   : > { %vm3110_vm8 = vcmp.ge.f32.partialorder %v3094_v50, 1.0 }
 0x35e   : > { %v3467_v8 = vsel %vm3110_vm8, 1.0, %v5132_v42 }
 0x35f   : > { %v3174_v37 = vadd.f32 %v3467_v8, %v3158_v26 }
 0x360   : > { %v3053_v43 = vpop.f32.mrf.mxu3 }
 0x361   : > { %3190 = vst [vmem:[%s4940_s28 + $0x70] sm:$0xff] %v3174_v37  ;;  %v3075_v27 = vmul.f32 %v4926_v39, %v3053_v43 }
 0x363   : > { %v3095_v14 = vadd.f32 %v4931_v41, %v3075_v27 }
 0x365   : > { %vm3111_vm2 = vcmp.ge.f32.partialorder %v3095_v14, 1.0 }
 0x366   : > { %v3468_v47 = vsel %vm3111_vm2, 1.0, %v5132_v42 }
 0x367   : > { %v3175_v10 = vadd.f32 %v3468_v47, %v3159_v20 }
 0x369   : > { %3191 = vst [vmem:[%s4940_s28 + $0x78] sm:$0xff] %v3175_v10 }
 0x36a   : > { %3647 = shalt.err (!%p3644_p8)
}
 0x36b   : > { %s3694_s21 = smov 128   ;;  %s3695_s28 = smov 8  }
 0x36c   : > { %3520 = dma.vmem_to_hbm [thread:$0]  (%p3789_p5), %s3207_s26, 2048, %s3209_s29, %s3193_s17, %s3694_s21, %s3694_s21, %s3695_s28  }
 0x36d PF: > { %p3532_p9 = scmp.ge.s32.totalorder %s3686_s16, 2  ;;  %s3223_s11 = sand.u32 1, %s3674_s13  }
 0x36e   : > { %s3224_s18 = scalar_lea.sflag [#allocation5], %s3223_s11 }
 0x36f   : > { %p3527_p10 = pnand %p3532_p9, %p3793_p6 }
 0x371   : > { %p3528_p11 = pneg %p3527_p10 }
 0x373   : > { %3669 = dma.done.wait (%p3528_p11), %s3224_s18, 2048  }
 0x374   : > { %3671 = vsyncadd (%p3528_p11), %s3224_s18, 4294965248  ;;  %p21_p12 = scmp.ge.s32.totalorder %s3776_s19, 4   ;;  %s5138_s13 = smov %s3678_s14 }
 0x375   : > { %s5139_s14 = smov %s3682_s15  ;;  %s5140_s15 = smov %s3787_s22 }
 0x376   : > { %s5141_s16 = smov %s3776_s19  ;;  %23 = sbr.rel (!%p21_p12) target bundleno = 4 (0x4), region = 103 }
 0x37b   :  { %3230 = vsyncpa [#allocation4], 1 }
 0x37c   :  { %3232 = vsyncpa [#allocation4 + $0x1], 1 }
 0x37d   :  { %3233 = vsyncpa [#allocation5], 1 }
 0x37e   :  { %3235 = vsyncpa [#allocation5 + $0x1], 1 }

</bundles_post_ra>
